<compile_context>
chip_gen: v6e
topology: v6e:2x2x1
jax: 0.10.0
libtpu: 0.0.40
codegen_flags: <defaults>
</compile_context>

<pallas_src>
import functools

import jax
import jax.numpy as jnp
from jax.experimental import pallas as pl
from jax.experimental.pallas import tpu as pltpu


def _round_up(x, m):
    return (x + m - 1) // m * m


def _vmem_limit_bytes():
    """Per-generation scoped-VMEM budget (leave headroom below physical)."""
    try:
        cap = pltpu.get_tpu_info().vmem_capacity_bytes
    except Exception:  # pragma: no cover - conservative fallback
        cap = 128 * 1024 * 1024
    return int(min(max(cap * 3 // 4, 32 * 1024 * 1024), 100 * 1024 * 1024))


def _pick_toh(oh, ow, target_rows=512):
    """Largest divisor of OH with toh*OW % 128 == 0 and <= ~512 rows/step."""
    best = None
    for d in range(1, oh + 1):
        if oh % d:
            continue
        if (d * ow) % 128:
            continue
        if d * ow <= target_rows:
            best = d
    if best is None:
        for d in range(1, oh + 1):
            if oh % d == 0 and (d * ow) % 128 == 0:
                best = d
                break
    if best is None:
        best = oh  # full-extent fallback: block == full array dim, always legal
    return best


def _pick_sp_tile(sp, ocr, bytes_per=4, budget=8 << 20):
    """Pass-2 spatial tile: largest 128-multiple divisor within a VMEM budget."""
    cap = max(128, budget // (ocr * bytes_per))
    for d in range(min(sp, cap), 0, -1):
        if sp % d == 0 and d % 128 == 0:
            return d
    return sp


def _conv_stats_kernel(x_ref, w_ref, y_ref, stats_ref, acc_ref, *,
                       toh, ow, kh, kw, stride, hs, oc_r):
    """Pass 1: conv via in-kernel im2col taps + per-tile BN partial stats.

    x_ref:     [1, PH*Hs, Ws, Cp]  padded (phase-split) image, bf16, resident
    w_ref:     [KH*KW, Cp, OCp]    weights, bf16, one [Cp, OCp] slab per tap
    y_ref:     [1, OCr, toh*OW]    conv output tile, channels-major, lane-dense
    stats_ref: [1, 1, 2, OCp]      per-tile (sum, centered sum-of-squares)
    acc_ref:   [toh*OW, OCp] f32   VMEM accumulator scratch
    """
    s = stride
    cp = x_ref.shape[-1]
    ocp = w_ref.shape[-1]
    rows = toh * ow
    row0 = pl.multiple_of(pl.program_id(1) * toh, toh)

    acc_ref[...] = jnp.zeros_like(acc_ref)
    for i in range(kh):
        for j in range(kw):
            # Phase plane (i%s, j%s) makes every tap slice contiguous even for
            # stride > 1; base/dr/dc are static Python ints.
            base = ((i % s) * s + (j % s)) * hs
            dr, dc = i // s, j // s
            # Per-tap load straight from the ref: only [toh, ow, cp] live.
            tap = x_ref[0, pl.ds(base + row0 + dr, toh), dc:dc + ow, :]
            acc_ref[...] += jnp.dot(tap.reshape(rows, cp), w_ref[i * kw + j],
                                    preferred_element_type=jnp.float32)

    acc = acc_ref[...]
    # Mean-shifted per-tile partials (numerically robust variance combine).
    s1 = jnp.sum(acc, axis=0, keepdims=True)                  # [1, OCp]
    mu = s1 * (1.0 / rows)
    d = acc - mu
    ssc = jnp.sum(d * d, axis=0, keepdims=True)               # [1, OCp]
    stats_ref[...] = jnp.concatenate([s1, ssc], axis=0).reshape(1, 1, 2, ocp)

    # De-padded, channels-major store: sublane dim = OCr (8-aligned), lane dim
    # = spatial rows (multiple of 128) -> lane-dense, no 128/OC amplification.
    y_ref[...] = acc.T[:oc_r, :].reshape(1, oc_r, rows)


def _bn_apply_kernel(y_ref, scale_ref, shift_ref, o_ref):
    """Pass 2: fused BN affine, out = y * scale + shift (one FMA / element)."""
    o_ref[...] = y_ref[...] * scale_ref[...] + shift_ref[...]


@functools.partial(jax.jit, static_argnames=("stride", "padding", "eps", "toh"))
def conv_block_forward(x, weight, bias, gamma, beta, *, stride, padding,
                       eps=1e-5, toh=None):
    """ConvBlock.forward: bn(conv(x)) with training-mode (biased) batch stats.

    x:      [N, C_in, H, W]  (NCHW, matching PyTorch)
    weight: [OC, C_in, KH, KW]
    bias, gamma, beta: [OC]
    returns [N, OC, OH, OW]
    """
    del bias  # per-channel conv bias is exactly cancelled by BN mean subtraction
    N, C_in, H, W = x.shape
    OC, _, KH, KW = weight.shape
    OH = (H + 2 * padding - KH) // stride + 1
    OW = (W + 2 * padding - KW) // stride + 1
    Hp, Wp = H + 2 * padding, W + 2 * padding
    SP = OH * OW

    Cp = _round_up(C_in, 8)       # sublane-aligned contraction dim
    OCp = _round_up(OC, 128)      # lane-dense MXU output columns
    OCr = _round_up(OC, 8)        # sublane-aligned channel rows for y/out

    # ---- layout prep (wrapper-side glue, done once) ----
    x_nhwc = jnp.transpose(x, (0, 2, 3, 1)).astype(jnp.bfloat16)
    x_pad = jnp.pad(x_nhwc, ((0, 0), (padding, padding),
                             (padding, padding), (0, Cp - C_in)))
    s = stride
    if s == 1:
        Hs, Ws = Hp, Wp
        x_ph = x_pad                                   # single phase plane
    else:
        # Pre-split into s*s phase planes so in-kernel tap slices are contiguous.
        Hs, Ws = -(-Hp // s), -(-Wp // s)
        planes = []
        for pi in range(s):
            for pj in range(s):
                p = x_pad[:, pi::s, pj::s, :]
                p = jnp.pad(p, ((0, 0), (0, Hs - p.shape[1]),
                                (0, Ws - p.shape[2]), (0, 0)))
                planes.append(p)
        x_ph = jnp.concatenate(planes, axis=1)         # [N, s*s*Hs, Ws, Cp]

    # weight [OC, C, KH, KW] -> [KH*KW, Cp, OCp], bf16 for the MXU.
    w = jnp.transpose(weight, (2, 3, 1, 0)).reshape(KH * KW, C_in, OC)
    w = jnp.pad(w, ((0, 0), (0, Cp - C_in), (0, OCp - OC))).astype(jnp.bfloat16)

    # ---- tiling ----
    if toh is None:
        toh = _pick_toh(OH, OW)
    else:
        assert OH % toh == 0 and ((toh * OW) % 128 == 0 or toh == OH), \
            "toh must divide OH and keep toh*OW a multiple of 128"
    T = OH // toh
    rows = toh * OW

    cparams = pltpu.CompilerParams(
        dimension_semantics=("parallel", "parallel"),
        vmem_limit_bytes=_vmem_limit_bytes())

    kernel_a = functools.partial(_conv_stats_kernel, toh=toh, ow=OW, kh=KH,
                                 kw=KW, stride=s, hs=Hs, oc_r=OCr)
    y, stats = pl.pallas_call(
        kernel_a,
        out_shape=(jax.ShapeDtypeStruct((N, OCr, SP), jnp.float32),
                   jax.ShapeDtypeStruct((N, T, 2, OCp), jnp.float32)),
        grid_spec=pltpu.PrefetchScalarGridSpec(
            num_scalar_prefetch=0,
            grid=(N, T),
            in_specs=[
                # Resident padded image (bf16). TODO(synk): single-buffer /
                # halo-DMA this block for large frames on v7x (64 MiB VMEM).
                pl.BlockSpec((1, x_ph.shape[1], Ws, Cp),
                             lambda n, t: (n, 0, 0, 0)),
                pl.BlockSpec((KH * KW, Cp, OCp), lambda n, t: (0, 0, 0)),
            ],
            out_specs=[
                pl.BlockSpec((1, OCr, rows), lambda n, t: (n, 0, t)),
                pl.BlockSpec((1, 1, 2, OCp), lambda n, t: (n, t, 0, 0)),
            ],
            scratch_shapes=[pltpu.VMEM((rows, OCp), jnp.float32)],
        ),
        compiler_params=cparams,
    )(x_ph, w)

    # ---- BN statistics: tiny JAX combine of per-tile partials (f32) ----
    m_tot = float(N * OH * OW)
    s1 = stats[:, :, 0, :]                                   # [N, T, OCp]
    ssc = stats[:, :, 1, :]                                  # [N, T, OCp]
    mean_t = s1 / float(rows)
    mean = jnp.sum(s1, axis=(0, 1)) / m_tot
    var = (jnp.sum(ssc, axis=(0, 1))
           + float(rows) * jnp.sum((mean_t - mean) ** 2, axis=(0, 1))) / m_tot
    var = jnp.maximum(var, 0.0)
    gamma_p = jnp.pad(gamma, (0, OCp - OC))
    beta_p = jnp.pad(beta, (0, OCp - OC))
    scale = gamma_p * jax.lax.rsqrt(var + eps)
    shift = beta_p - mean * scale
    scale_r = scale[:OCr].reshape(OCr, 1)
    shift_r = shift[:OCr].reshape(OCr, 1)

    # ---- pass 2: fused BN affine, in-place on the conv buffer (aliased) ----
    tile_sp = _pick_sp_tile(SP, OCr)
    Q = SP // tile_sp
    out = pl.pallas_call(
        _bn_apply_kernel,
        out_shape=jax.ShapeDtypeStruct((N, OCr, SP), jnp.float32),
        grid_spec=pltpu.PrefetchScalarGridSpec(
            num_scalar_prefetch=0,
            grid=(N, Q),
            in_specs=[
                pl.BlockSpec((1, OCr, tile_sp), lambda n, q: (n, 0, q)),
                pl.BlockSpec((OCr, 1), lambda n, q: (0, 0)),
                pl.BlockSpec((OCr, 1), lambda n, q: (0, 0)),
            ],
            out_specs=pl.BlockSpec((1, OCr, tile_sp), lambda n, q: (n, 0, q)),
        ),
        compiler_params=cparams,
        input_output_aliases={0: 0},
    )(y, scale_r, shift_r)

    # Channels-major de-padded output: the NCHW view is a free reshape
    # (slice is a no-op when OC is already a multiple of 8).
    return out[:, :OC, :].reshape(N, OC, OH, OW)


def _reference(x, weight, bias, gamma, beta, *, stride, padding, eps=1e-5):
    # Plain-JAX reference for verification (includes the conv bias; it is
    # mathematically cancelled by the BN mean subtraction).
    y = jax.lax.conv_general_dilated(
        x, weight, window_strides=(stride, stride),
        padding=[(padding, padding), (padding, padding)],
        dimension_numbers=("NCHW", "OIHW", "NCHW"))
    y = y + bias.reshape(1, -1, 1, 1)
    mean = jnp.mean(y, axis=(0, 2, 3), keepdims=True)
    var = jnp.mean((y - mean) ** 2, axis=(0, 2, 3), keepdims=True)
    y_hat = (y - mean) * jax.lax.rsqrt(var + eps)
    return y_hat * gamma.reshape(1, -1, 1, 1) + beta.reshape(1, -1, 1, 1)


if __name__ == "__main__":
    # ConvBlock(in_channels=4, out_channels=8, kernel_size=3, stride=1, padding=1)
    N, C_in, H, W = 2, 4, 16, 16
    OC, KH, KW = 8, 3, 3
    stride, padding = 1, 1

    key = jax.random.PRNGKey(0)
    kx, kw, kb, kg, kbe = jax.random.split(key, 5)
    x = jax.random.normal(kx, (N, C_in, H, W), dtype=jnp.float32)
    weight = jax.random.normal(kw, (OC, C_in, KH, KW), dtype=jnp.float32) * 0.1
    bias = jax.random.normal(kb, (OC,), dtype=jnp.float32) * 0.1
    gamma = 1.0 + 0.1 * jax.random.normal(kg, (OC,), dtype=jnp.float32)
    beta = 0.1 * jax.random.normal(kbe, (OC,), dtype=jnp.float32)

    out = conv_block_forward(x, weight, bias, gamma, beta,
                             stride=stride, padding=padding)
    out = jax.block_until_ready(out)
    assert out.shape == (N, OC, H, W), out.shape

    # References: exact f32, and one with bf16-rounded conv operands (the
    # kernel's MXU operands are bf16 with f32 accumulation, per perf review).
    ref_f32 = _reference(x, weight, bias, gamma, beta,
                         stride=stride, padding=padding)
    x_b = x.astype(jnp.bfloat16).astype(jnp.float32)
    w_b = weight.astype(jnp.bfloat16).astype(jnp.float32)
    ref_b16 = _reference(x_b, w_b, bias, gamma, beta,
                         stride=stride, padding=padding)

    assert jnp.allclose(out, ref_b16, atol=2e-3, rtol=2e-3), \
        float(jnp.max(jnp.abs(out - ref_b16)))
    assert jnp.allclose(out, ref_f32, atol=5e-2, rtol=5e-2), \
        float(jnp.max(jnp.abs(out - ref_f32)))

    # Exercise the multi-tile path (T=2) and the cross-tile stats combine.
    out2 = conv_block_forward(x, weight, bias, gamma, beta,
                              stride=stride, padding=padding, toh=8)
    out2 = jax.block_until_ready(out2)
    assert jnp.allclose(out2, ref_b16, atol=2e-3, rtol=2e-3), \
        float(jnp.max(jnp.abs(out2 - ref_b16)))

    print("KERNEL_OK")
</pallas_src>

<mosaic_0001>
module attributes {stable_mosaic.version = 11 : i64} {
  func.func @_conv_stats_kernel(%arg0: i32, %arg1: i32, %arg2: memref<1x18x18x8xbf16, #tpu.memory_space<vmem>>, %arg3: memref<9x8x128xbf16, #tpu.memory_space<vmem>>, %arg4: memref<1x8x256xf32, #tpu.memory_space<vmem>>, %arg5: memref<1x1x2x128xf32, #tpu.memory_space<vmem>>, %arg6: memref<256x128xf32, #tpu.memory_space<vmem>>) attributes {dimension_semantics = [#tpu.dimension_semantics<parallel>, #tpu.dimension_semantics<parallel>], iteration_bounds = array<i64: 2, 1>, scalar_prefetch = 0 : i64, scratch_operands = 1 : i64, tpu.core_type = #tpu.core_type<tc>, window_params = [{transform_indices = @transform_0, window_bounds = array<i64: 1, 18, 18, 8>}, {pipeline_mode = #tpu.pipeline_mode<synchronous>, transform_indices = @transform_1, window_bounds = array<i64: 9, 8, 128>}, {transform_indices = @transform_2, window_bounds = array<i64: 1, 8, 256>}, {transform_indices = @transform_3, window_bounds = array<i64: 1, 1, 2, 128>}]} {
    %c16_i32 = arith.constant 16 : i32
    %0 = arith.muli %arg1, %c16_i32 : i32
    %1 = tpu.assume_multiple %0, 16 : i32
    %cst = arith.constant 0.000000e+00 : f32
    %2 = vector.broadcast %cst : f32 to vector<256x128xf32>
    %c0 = arith.constant 0 : index
    %c0_0 = arith.constant 0 : index
    %3 = vector.load %arg6[%c0, %c0_0] : memref<256x128xf32, #tpu.memory_space<vmem>>, vector<256x128xf32>
    tpu.vector_store %arg6[%c0, %c0_0], %2 {strides = array<i32>} : memref<256x128xf32, #tpu.memory_space<vmem>>, vector<256x128xf32>,
    %c0_i32 = arith.constant 0 : i32
    %4 = arith.addi %c0_i32, %1 : i32
    %c0_i32_1 = arith.constant 0 : i32
    %5 = arith.addi %4, %c0_i32_1 : i32
    %c0_2 = arith.constant 0 : index
    %6 = arith.index_cast %5 : i32 to index
    %c0_3 = arith.constant 0 : index
    %c0_4 = arith.constant 0 : index
    %7 = vector.load %arg2[%c0_2, %6, %c0_3, %c0_4] : memref<1x18x18x8xbf16, #tpu.memory_space<vmem>>, vector<1x16x16x8xbf16>
    %8 = vector.shape_cast %7 : vector<1x16x16x8xbf16> to vector<16x16x8xbf16>
    %c0_5 = arith.constant 0 : index
    %c0_6 = arith.constant 0 : index
    %9 = vector.load %arg6[%c0_5, %c0_6] : memref<256x128xf32, #tpu.memory_space<vmem>>, vector<256x128xf32>
    %10 = vector.shape_cast %8 : vector<16x16x8xbf16> to vector<256x8xbf16>
    %c0_7 = arith.constant 0 : index
    %c0_8 = arith.constant 0 : index
    %c0_9 = arith.constant 0 : index
    %11 = vector.load %arg3[%c0_7, %c0_8, %c0_9] : memref<9x8x128xbf16, #tpu.memory_space<vmem>>, vector<1x8x128xbf16>
    %12 = vector.shape_cast %11 : vector<1x8x128xbf16> to vector<8x128xbf16>
    %cst_10 = arith.constant dense<0.000000e+00> : vector<256x128xf32>
    %13 = tpu.matmul %10, %12, %cst_10 {dimension_numbers = #tpu.dot_dimension_numbers<[1], [0], [0], [1], [0, 0, 1, 1], [], []>} : vector<256x8xbf16>, vector<8x128xbf16>, vector<256x128xf32> -> vector<256x128xf32>
    %14 = arith.addf %9, %13 : vector<256x128xf32>
    %c0_11 = arith.constant 0 : index
    %c0_12 = arith.constant 0 : index
    %15 = vector.load %arg6[%c0_11, %c0_12] : memref<256x128xf32, #tpu.memory_space<vmem>>, vector<256x128xf32>
    tpu.vector_store %arg6[%c0_11, %c0_12], %14 {strides = array<i32>} : memref<256x128xf32, #tpu.memory_space<vmem>>, vector<256x128xf32>,
    %c0_i32_13 = arith.constant 0 : i32
    %16 = arith.addi %c0_i32_13, %1 : i32
    %c0_i32_14 = arith.constant 0 : i32
    %17 = arith.addi %16, %c0_i32_14 : i32
    %c0_15 = arith.constant 0 : index
    %18 = arith.index_cast %17 : i32 to index
    %c1 = arith.constant 1 : index
    %c0_16 = arith.constant 0 : index
    %19 = vector.load %arg2[%c0_15, %18, %c1, %c0_16] : memref<1x18x18x8xbf16, #tpu.memory_space<vmem>>, vector<1x16x16x8xbf16>
    %20 = vector.shape_cast %19 : vector<1x16x16x8xbf16> to vector<16x16x8xbf16>
    %c0_17 = arith.constant 0 : index
    %c0_18 = arith.constant 0 : index
    %21 = vector.load %arg6[%c0_17, %c0_18] : memref<256x128xf32, #tpu.memory_space<vmem>>, vector<256x128xf32>
    %22 = vector.shape_cast %20 : vector<16x16x8xbf16> to vector<256x8xbf16>
    %c1_19 = arith.constant 1 : index
    %c0_20 = arith.constant 0 : index
    %c0_21 = arith.constant 0 : index
    %23 = vector.load %arg3[%c1_19, %c0_20, %c0_21] : memref<9x8x128xbf16, #tpu.memory_space<vmem>>, vector<1x8x128xbf16>
    %24 = vector.shape_cast %23 : vector<1x8x128xbf16> to vector<8x128xbf16>
    %cst_22 = arith.constant dense<0.000000e+00> : vector<256x128xf32>
    %25 = tpu.matmul %22, %24, %cst_22 {dimension_numbers = #tpu.dot_dimension_numbers<[1], [0], [0], [1], [0, 0, 1, 1], [], []>} : vector<256x8xbf16>, vector<8x128xbf16>, vector<256x128xf32> -> vector<256x128xf32>
    %26 = arith.addf %21, %25 : vector<256x128xf32>
    %c0_23 = arith.constant 0 : index
    %c0_24 = arith.constant 0 : index
    %27 = vector.load %arg6[%c0_23, %c0_24] : memref<256x128xf32, #tpu.memory_space<vmem>>, vector<256x128xf32>
    tpu.vector_store %arg6[%c0_23, %c0_24], %26 {strides = array<i32>} : memref<256x128xf32, #tpu.memory_space<vmem>>, vector<256x128xf32>,
    %c0_i32_25 = arith.constant 0 : i32
    %28 = arith.addi %c0_i32_25, %1 : i32
    %c0_i32_26 = arith.constant 0 : i32
    %29 = arith.addi %28, %c0_i32_26 : i32
    %c0_27 = arith.constant 0 : index
    %30 = arith.index_cast %29 : i32 to index
    %c2 = arith.constant 2 : index
    %c0_28 = arith.constant 0 : index
    %31 = vector.load %arg2[%c0_27, %30, %c2, %c0_28] : memref<1x18x18x8xbf16, #tpu.memory_space<vmem>>, vector<1x16x16x8xbf16>
    %32 = vector.shape_cast %31 : vector<1x16x16x8xbf16> to vector<16x16x8xbf16>
    %c0_29 = arith.constant 0 : index
    %c0_30 = arith.constant 0 : index
    %33 = vector.load %arg6[%c0_29, %c0_30] : memref<256x128xf32, #tpu.memory_space<vmem>>, vector<256x128xf32>
    %34 = vector.shape_cast %32 : vector<16x16x8xbf16> to vector<256x8xbf16>
    %c2_31 = arith.constant 2 : index
    %c0_32 = arith.constant 0 : index
    %c0_33 = arith.constant 0 : index
    %35 = vector.load %arg3[%c2_31, %c0_32, %c0_33] : memref<9x8x128xbf16, #tpu.memory_space<vmem>>, vector<1x8x128xbf16>
    %36 = vector.shape_cast %35 : vector<1x8x128xbf16> to vector<8x128xbf16>
    %cst_34 = arith.constant dense<0.000000e+00> : vector<256x128xf32>
    %37 = tpu.matmul %34, %36, %cst_34 {dimension_numbers = #tpu.dot_dimension_numbers<[1], [0], [0], [1], [0, 0, 1, 1], [], []>} : vector<256x8xbf16>, vector<8x128xbf16>, vector<256x128xf32> -> vector<256x128xf32>
    %38 = arith.addf %33, %37 : vector<256x128xf32>
    %c0_35 = arith.constant 0 : index
    %c0_36 = arith.constant 0 : index
    %39 = vector.load %arg6[%c0_35, %c0_36] : memref<256x128xf32, #tpu.memory_space<vmem>>, vector<256x128xf32>
    tpu.vector_store %arg6[%c0_35, %c0_36], %38 {strides = array<i32>} : memref<256x128xf32, #tpu.memory_space<vmem>>, vector<256x128xf32>,
    %c0_i32_37 = arith.constant 0 : i32
    %40 = arith.addi %c0_i32_37, %1 : i32
    %c1_i32 = arith.constant 1 : i32
    %41 = arith.addi %40, %c1_i32 : i32
    %c0_38 = arith.constant 0 : index
    %42 = arith.index_cast %41 : i32 to index
    %c0_39 = arith.constant 0 : index
    %c0_40 = arith.constant 0 : index
    %43 = vector.load %arg2[%c0_38, %42, %c0_39, %c0_40] : memref<1x18x18x8xbf16, #tpu.memory_space<vmem>>, vector<1x16x16x8xbf16>
    %44 = vector.shape_cast %43 : vector<1x16x16x8xbf16> to vector<16x16x8xbf16>
    %c0_41 = arith.constant 0 : index
    %c0_42 = arith.constant 0 : index
    %45 = vector.load %arg6[%c0_41, %c0_42] : memref<256x128xf32, #tpu.memory_space<vmem>>, vector<256x128xf32>
    %46 = vector.shape_cast %44 : vector<16x16x8xbf16> to vector<256x8xbf16>
    %c3 = arith.constant 3 : index
    %c0_43 = arith.constant 0 : index
    %c0_44 = arith.constant 0 : index
    %47 = vector.load %arg3[%c3, %c0_43, %c0_44] : memref<9x8x128xbf16, #tpu.memory_space<vmem>>, vector<1x8x128xbf16>
    %48 = vector.shape_cast %47 : vector<1x8x128xbf16> to vector<8x128xbf16>
    %cst_45 = arith.constant dense<0.000000e+00> : vector<256x128xf32>
    %49 = tpu.matmul %46, %48, %cst_45 {dimension_numbers = #tpu.dot_dimension_numbers<[1], [0], [0], [1], [0, 0, 1, 1], [], []>} : vector<256x8xbf16>, vector<8x128xbf16>, vector<256x128xf32> -> vector<256x128xf32>
    %50 = arith.addf %45, %49 : vector<256x128xf32>
    %c0_46 = arith.constant 0 : index
    %c0_47 = arith.constant 0 : index
    %51 = vector.load %arg6[%c0_46, %c0_47] : memref<256x128xf32, #tpu.memory_space<vmem>>, vector<256x128xf32>
    tpu.vector_store %arg6[%c0_46, %c0_47], %50 {strides = array<i32>} : memref<256x128xf32, #tpu.memory_space<vmem>>, vector<256x128xf32>,
    %c0_i32_48 = arith.constant 0 : i32
    %52 = arith.addi %c0_i32_48, %1 : i32
    %c1_i32_49 = arith.constant 1 : i32
    %53 = arith.addi %52, %c1_i32_49 : i32
    %c0_50 = arith.constant 0 : index
    %54 = arith.index_cast %53 : i32 to index
    %c1_51 = arith.constant 1 : index
    %c0_52 = arith.constant 0 : index
    %55 = vector.load %arg2[%c0_50, %54, %c1_51, %c0_52] : memref<1x18x18x8xbf16, #tpu.memory_space<vmem>>, vector<1x16x16x8xbf16>
    %56 = vector.shape_cast %55 : vector<1x16x16x8xbf16> to vector<16x16x8xbf16>
    %c0_53 = arith.constant 0 : index
    %c0_54 = arith.constant 0 : index
    %57 = vector.load %arg6[%c0_53, %c0_54] : memref<256x128xf32, #tpu.memory_space<vmem>>, vector<256x128xf32>
    %58 = vector.shape_cast %56 : vector<16x16x8xbf16> to vector<256x8xbf16>
    %c4 = arith.constant 4 : index
    %c0_55 = arith.constant 0 : index
    %c0_56 = arith.constant 0 : index
    %59 = vector.load %arg3[%c4, %c0_55, %c0_56] : memref<9x8x128xbf16, #tpu.memory_space<vmem>>, vector<1x8x128xbf16>
    %60 = vector.shape_cast %59 : vector<1x8x128xbf16> to vector<8x128xbf16>
    %cst_57 = arith.constant dense<0.000000e+00> : vector<256x128xf32>
    %61 = tpu.matmul %58, %60, %cst_57 {dimension_numbers = #tpu.dot_dimension_numbers<[1], [0], [0], [1], [0, 0, 1, 1], [], []>} : vector<256x8xbf16>, vector<8x128xbf16>, vector<256x128xf32> -> vector<256x128xf32>
    %62 = arith.addf %57, %61 : vector<256x128xf32>
    %c0_58 = arith.constant 0 : index
    %c0_59 = arith.constant 0 : index
    %63 = vector.load %arg6[%c0_58, %c0_59] : memref<256x128xf32, #tpu.memory_space<vmem>>, vector<256x128xf32>
    tpu.vector_store %arg6[%c0_58, %c0_59], %62 {strides = array<i32>} : memref<256x128xf32, #tpu.memory_space<vmem>>, vector<256x128xf32>,
    %c0_i32_60 = arith.constant 0 : i32
    %64 = arith.addi %c0_i32_60, %1 : i32
    %c1_i32_61 = arith.constant 1 : i32
    %65 = arith.addi %64, %c1_i32_61 : i32
    %c0_62 = arith.constant 0 : index
    %66 = arith.index_cast %65 : i32 to index
    %c2_63 = arith.constant 2 : index
    %c0_64 = arith.constant 0 : index
    %67 = vector.load %arg2[%c0_62, %66, %c2_63, %c0_64] : memref<1x18x18x8xbf16, #tpu.memory_space<vmem>>, vector<1x16x16x8xbf16>
    %68 = vector.shape_cast %67 : vector<1x16x16x8xbf16> to vector<16x16x8xbf16>
    %c0_65 = arith.constant 0 : index
    %c0_66 = arith.constant 0 : index
    %69 = vector.load %arg6[%c0_65, %c0_66] : memref<256x128xf32, #tpu.memory_space<vmem>>, vector<256x128xf32>
    %70 = vector.shape_cast %68 : vector<16x16x8xbf16> to vector<256x8xbf16>
    %c5 = arith.constant 5 : index
    %c0_67 = arith.constant 0 : index
    %c0_68 = arith.constant 0 : index
    %71 = vector.load %arg3[%c5, %c0_67, %c0_68] : memref<9x8x128xbf16, #tpu.memory_space<vmem>>, vector<1x8x128xbf16>
    %72 = vector.shape_cast %71 : vector<1x8x128xbf16> to vector<8x128xbf16>
    %cst_69 = arith.constant dense<0.000000e+00> : vector<256x128xf32>
    %73 = tpu.matmul %70, %72, %cst_69 {dimension_numbers = #tpu.dot_dimension_numbers<[1], [0], [0], [1], [0, 0, 1, 1], [], []>} : vector<256x8xbf16>, vector<8x128xbf16>, vector<256x128xf32> -> vector<256x128xf32>
    %74 = arith.addf %69, %73 : vector<256x128xf32>
    %c0_70 = arith.constant 0 : index
    %c0_71 = arith.constant 0 : index
    %75 = vector.load %arg6[%c0_70, %c0_71] : memref<256x128xf32, #tpu.memory_space<vmem>>, vector<256x128xf32>
    tpu.vector_store %arg6[%c0_70, %c0_71], %74 {strides = array<i32>} : memref<256x128xf32, #tpu.memory_space<vmem>>, vector<256x128xf32>,
    %c0_i32_72 = arith.constant 0 : i32
    %76 = arith.addi %c0_i32_72, %1 : i32
    %c2_i32 = arith.constant 2 : i32
    %77 = arith.addi %76, %c2_i32 : i32
    %c0_73 = arith.constant 0 : index
    %78 = arith.index_cast %77 : i32 to index
    %c0_74 = arith.constant 0 : index
    %c0_75 = arith.constant 0 : index
    %79 = vector.load %arg2[%c0_73, %78, %c0_74, %c0_75] : memref<1x18x18x8xbf16, #tpu.memory_space<vmem>>, vector<1x16x16x8xbf16>
    %80 = vector.shape_cast %79 : vector<1x16x16x8xbf16> to vector<16x16x8xbf16>
    %c0_76 = arith.constant 0 : index
    %c0_77 = arith.constant 0 : index
    %81 = vector.load %arg6[%c0_76, %c0_77] : memref<256x128xf32, #tpu.memory_space<vmem>>, vector<256x128xf32>
    %82 = vector.shape_cast %80 : vector<16x16x8xbf16> to vector<256x8xbf16>
    %c6 = arith.constant 6 : index
    %c0_78 = arith.constant 0 : index
    %c0_79 = arith.constant 0 : index
    %83 = vector.load %arg3[%c6, %c0_78, %c0_79] : memref<9x8x128xbf16, #tpu.memory_space<vmem>>, vector<1x8x128xbf16>
    %84 = vector.shape_cast %83 : vector<1x8x128xbf16> to vector<8x128xbf16>
    %cst_80 = arith.constant dense<0.000000e+00> : vector<256x128xf32>
    %85 = tpu.matmul %82, %84, %cst_80 {dimension_numbers = #tpu.dot_dimension_numbers<[1], [0], [0], [1], [0, 0, 1, 1], [], []>} : vector<256x8xbf16>, vector<8x128xbf16>, vector<256x128xf32> -> vector<256x128xf32>
    %86 = arith.addf %81, %85 : vector<256x128xf32>
    %c0_81 = arith.constant 0 : index
    %c0_82 = arith.constant 0 : index
    %87 = vector.load %arg6[%c0_81, %c0_82] : memref<256x128xf32, #tpu.memory_space<vmem>>, vector<256x128xf32>
    tpu.vector_store %arg6[%c0_81, %c0_82], %86 {strides = array<i32>} : memref<256x128xf32, #tpu.memory_space<vmem>>, vector<256x128xf32>,
    %c0_i32_83 = arith.constant 0 : i32
    %88 = arith.addi %c0_i32_83, %1 : i32
    %c2_i32_84 = arith.constant 2 : i32
    %89 = arith.addi %88, %c2_i32_84 : i32
    %c0_85 = arith.constant 0 : index
    %90 = arith.index_cast %89 : i32 to index
    %c1_86 = arith.constant 1 : index
    %c0_87 = arith.constant 0 : index
    %91 = vector.load %arg2[%c0_85, %90, %c1_86, %c0_87] : memref<1x18x18x8xbf16, #tpu.memory_space<vmem>>, vector<1x16x16x8xbf16>
    %92 = vector.shape_cast %91 : vector<1x16x16x8xbf16> to vector<16x16x8xbf16>
    %c0_88 = arith.constant 0 : index
    %c0_89 = arith.constant 0 : index
    %93 = vector.load %arg6[%c0_88, %c0_89] : memref<256x128xf32, #tpu.memory_space<vmem>>, vector<256x128xf32>
    %94 = vector.shape_cast %92 : vector<16x16x8xbf16> to vector<256x8xbf16>
    %c7 = arith.constant 7 : index
    %c0_90 = arith.constant 0 : index
    %c0_91 = arith.constant 0 : index
    %95 = vector.load %arg3[%c7, %c0_90, %c0_91] : memref<9x8x128xbf16, #tpu.memory_space<vmem>>, vector<1x8x128xbf16>
    %96 = vector.shape_cast %95 : vector<1x8x128xbf16> to vector<8x128xbf16>
    %cst_92 = arith.constant dense<0.000000e+00> : vector<256x128xf32>
    %97 = tpu.matmul %94, %96, %cst_92 {dimension_numbers = #tpu.dot_dimension_numbers<[1], [0], [0], [1], [0, 0, 1, 1], [], []>} : vector<256x8xbf16>, vector<8x128xbf16>, vector<256x128xf32> -> vector<256x128xf32>
    %98 = arith.addf %93, %97 : vector<256x128xf32>
    %c0_93 = arith.constant 0 : index
    %c0_94 = arith.constant 0 : index
    %99 = vector.load %arg6[%c0_93, %c0_94] : memref<256x128xf32, #tpu.memory_space<vmem>>, vector<256x128xf32>
    tpu.vector_store %arg6[%c0_93, %c0_94], %98 {strides = array<i32>} : memref<256x128xf32, #tpu.memory_space<vmem>>, vector<256x128xf32>,
    %c0_i32_95 = arith.constant 0 : i32
    %100 = arith.addi %c0_i32_95, %1 : i32
    %c2_i32_96 = arith.constant 2 : i32
    %101 = arith.addi %100, %c2_i32_96 : i32
    %c0_97 = arith.constant 0 : index
    %102 = arith.index_cast %101 : i32 to index
    %c2_98 = arith.constant 2 : index
    %c0_99 = arith.constant 0 : index
    %103 = vector.load %arg2[%c0_97, %102, %c2_98, %c0_99] : memref<1x18x18x8xbf16, #tpu.memory_space<vmem>>, vector<1x16x16x8xbf16>
    %104 = vector.shape_cast %103 : vector<1x16x16x8xbf16> to vector<16x16x8xbf16>
    %c0_100 = arith.constant 0 : index
    %c0_101 = arith.constant 0 : index
    %105 = vector.load %arg6[%c0_100, %c0_101] : memref<256x128xf32, #tpu.memory_space<vmem>>, vector<256x128xf32>
    %106 = vector.shape_cast %104 : vector<16x16x8xbf16> to vector<256x8xbf16>
    %c8 = arith.constant 8 : index
    %c0_102 = arith.constant 0 : index
    %c0_103 = arith.constant 0 : index
    %107 = vector.load %arg3[%c8, %c0_102, %c0_103] : memref<9x8x128xbf16, #tpu.memory_space<vmem>>, vector<1x8x128xbf16>
    %108 = vector.shape_cast %107 : vector<1x8x128xbf16> to vector<8x128xbf16>
    %cst_104 = arith.constant dense<0.000000e+00> : vector<256x128xf32>
    %109 = tpu.matmul %106, %108, %cst_104 {dimension_numbers = #tpu.dot_dimension_numbers<[1], [0], [0], [1], [0, 0, 1, 1], [], []>} : vector<256x8xbf16>, vector<8x128xbf16>, vector<256x128xf32> -> vector<256x128xf32>
    %110 = arith.addf %105, %109 : vector<256x128xf32>
    %c0_105 = arith.constant 0 : index
    %c0_106 = arith.constant 0 : index
    %111 = vector.load %arg6[%c0_105, %c0_106] : memref<256x128xf32, #tpu.memory_space<vmem>>, vector<256x128xf32>
    tpu.vector_store %arg6[%c0_105, %c0_106], %110 {strides = array<i32>} : memref<256x128xf32, #tpu.memory_space<vmem>>, vector<256x128xf32>,
    %c0_107 = arith.constant 0 : index
    %c0_108 = arith.constant 0 : index
    %112 = vector.load %arg6[%c0_107, %c0_108] : memref<256x128xf32, #tpu.memory_space<vmem>>, vector<256x128xf32>
    %cst_109 = arith.constant dense<0.000000e+00> : vector<128xf32>
    %113 = vector.multi_reduction <add>, %112, %cst_109 [0] : vector<256x128xf32> to vector<128xf32>
    %114 = vector.shape_cast %113 : vector<128xf32> to vector<1x128xf32>
    %cst_110 = arith.constant 3.906250e-03 : f32
    %115 = vector.broadcast %cst_110 : f32 to vector<1x128xf32>
    %116 = arith.mulf %114, %115 : vector<1x128xf32>
    %117 = vector.broadcast %116 : vector<1x128xf32> to vector<256x128xf32>
    %118 = arith.subf %112, %117 : vector<256x128xf32>
    %119 = arith.mulf %118, %118 : vector<256x128xf32>
    %cst_111 = arith.constant dense<0.000000e+00> : vector<128xf32>
    %120 = vector.multi_reduction <add>, %119, %cst_111 [0] : vector<256x128xf32> to vector<128xf32>
    %121 = vector.shape_cast %120 : vector<128xf32> to vector<1x128xf32>
    %122 = tpu.concatenate %114, %121 in 0 : vector<1x128xf32>, vector<1x128xf32> -> vector<2x128xf32>
    %123 = vector.shape_cast %122 : vector<2x128xf32> to vector<1x1x2x128xf32>
    %c0_112 = arith.constant 0 : index
    %c0_113 = arith.constant 0 : index
    %c0_114 = arith.constant 0 : index
    %c0_115 = arith.constant 0 : index
    %124 = vector.load %arg5[%c0_112, %c0_113, %c0_114, %c0_115] : memref<1x1x2x128xf32, #tpu.memory_space<vmem>>, vector<1x1x2x128xf32>
    tpu.vector_store %arg5[%c0_112, %c0_113, %c0_114, %c0_115], %123 {strides = array<i32>} : memref<1x1x2x128xf32, #tpu.memory_space<vmem>>, vector<1x1x2x128xf32>,
    %125 = tpu.transpose %112, [1, 0] : vector<256x128xf32> -> vector<128x256xf32>
    %126 = vector.extract_strided_slice %125 {offsets = [0, 0], sizes = [8, 256], strides = [1, 1]} : vector<128x256xf32> to vector<8x256xf32>
    %127 = vector.shape_cast %126 : vector<8x256xf32> to vector<1x8x256xf32>
    %c0_116 = arith.constant 0 : index
    %c0_117 = arith.constant 0 : index
    %c0_118 = arith.constant 0 : index
    %128 = vector.load %arg4[%c0_116, %c0_117, %c0_118] : memref<1x8x256xf32, #tpu.memory_space<vmem>>, vector<1x8x256xf32>
    tpu.vector_store %arg4[%c0_116, %c0_117, %c0_118], %127 {strides = array<i32>} : memref<1x8x256xf32, #tpu.memory_space<vmem>>, vector<1x8x256xf32>,
    return
  }
  func.func @transform_0(%arg0: i32, %arg1: i32) -> (i32, i32, i32, i32) {
    %c0_i32 = arith.constant 0 : i32
    %c0_i32_0 = arith.constant 0 : i32
    %c0_i32_1 = arith.constant 0 : i32
    %c0_i32_2 = arith.constant 0 : i32
    return %arg0, %c0_i32, %c0_i32_0, %c0_i32_1 : i32, i32, i32, i32
  }
  func.func @transform_1(%arg0: i32, %arg1: i32) -> (i32, i32, i32) {
    %c0_i32 = arith.constant 0 : i32
    %c0_i32_0 = arith.constant 0 : i32
    %c0_i32_1 = arith.constant 0 : i32
    %c0_i32_2 = arith.constant 0 : i32
    return %c0_i32, %c0_i32_0, %c0_i32_1 : i32, i32, i32
  }
  func.func @transform_2(%arg0: i32, %arg1: i32) -> (i32, i32, i32) {
    %c0_i32 = arith.constant 0 : i32
    %c0_i32_0 = arith.constant 0 : i32
    return %arg0, %c0_i32, %arg1 : i32, i32, i32
  }
  func.func @transform_3(%arg0: i32, %arg1: i32) -> (i32, i32, i32, i32) {
    %c0_i32 = arith.constant 0 : i32
    %c0_i32_0 = arith.constant 0 : i32
    %c0_i32_1 = arith.constant 0 : i32
    return %arg0, %arg1, %c0_i32, %c0_i32_0 : i32, i32, i32, i32
  }
}

module attributes {stable_mosaic.version = 11 : i64} {
  func.func @_bn_apply_kernel(%arg0: i32, %arg1: i32, %arg2: memref<1x8x256xf32, #tpu.memory_space<vmem>>, %arg3: memref<8x1xf32, #tpu.memory_space<vmem>>, %arg4: memref<8x1xf32, #tpu.memory_space<vmem>>, %arg5: memref<1x8x256xf32, #tpu.memory_space<vmem>>) attributes {dimension_semantics = [#tpu.dimension_semantics<parallel>, #tpu.dimension_semantics<parallel>], iteration_bounds = array<i64: 2, 1>, scalar_prefetch = 0 : i64, scratch_operands = 0 : i64, tpu.core_type = #tpu.core_type<tc>, window_params = [{transform_indices = @transform_0, window_bounds = array<i64: 1, 8, 256>}, {pipeline_mode = #tpu.pipeline_mode<synchronous>, transform_indices = @transform_1, window_bounds = array<i64: 8, 1>}, {pipeline_mode = #tpu.pipeline_mode<synchronous>, transform_indices = @transform_2, window_bounds = array<i64: 8, 1>}, {transform_indices = @transform_3, window_bounds = array<i64: 1, 8, 256>}]} {
    %c0 = arith.constant 0 : index
    %c0_0 = arith.constant 0 : index
    %c0_1 = arith.constant 0 : index
    %0 = vector.load %arg2[%c0, %c0_0, %c0_1] : memref<1x8x256xf32, #tpu.memory_space<vmem>>, vector<1x8x256xf32>
    %c0_2 = arith.constant 0 : index
    %c0_3 = arith.constant 0 : index
    %1 = vector.load %arg3[%c0_2, %c0_3] : memref<8x1xf32, #tpu.memory_space<vmem>>, vector<8x1xf32>
    %2 = vector.shape_cast %1 : vector<8x1xf32> to vector<1x8x1xf32>
    %3 = vector.broadcast %2 : vector<1x8x1xf32> to vector<1x8x256xf32>
    %4 = arith.mulf %0, %3 : vector<1x8x256xf32>
    %c0_4 = arith.constant 0 : index
    %c0_5 = arith.constant 0 : index
    %5 = vector.load %arg4[%c0_4, %c0_5] : memref<8x1xf32, #tpu.memory_space<vmem>>, vector<8x1xf32>
    %6 = vector.shape_cast %5 : vector<8x1xf32> to vector<1x8x1xf32>
    %7 = vector.broadcast %6 : vector<1x8x1xf32> to vector<1x8x256xf32>
    %8 = arith.addf %4, %7 : vector<1x8x256xf32>
    %c0_6 = arith.constant 0 : index
    %c0_7 = arith.constant 0 : index
    %c0_8 = arith.constant 0 : index
    %9 = vector.load %arg5[%c0_6, %c0_7, %c0_8] : memref<1x8x256xf32, #tpu.memory_space<vmem>>, vector<1x8x256xf32>
    tpu.vector_store %arg5[%c0_6, %c0_7, %c0_8], %8 {strides = array<i32>} : memref<1x8x256xf32, #tpu.memory_space<vmem>>, vector<1x8x256xf32>,
    return
  }
  func.func @transform_0(%arg0: i32, %arg1: i32) -> (i32, i32, i32) {
    %c0_i32 = arith.constant 0 : i32
    %c0_i32_0 = arith.constant 0 : i32
    return %arg0, %c0_i32, %arg1 : i32, i32, i32
  }
  func.func @transform_1(%arg0: i32, %arg1: i32) -> (i32, i32) {
    %c0_i32 = arith.constant 0 : i32
    %c0_i32_0 = arith.constant 0 : i32
    %c0_i32_1 = arith.constant 0 : i32
    return %c0_i32, %c0_i32_0 : i32, i32
  }
  func.func @transform_2(%arg0: i32, %arg1: i32) -> (i32, i32) {
    %c0_i32 = arith.constant 0 : i32
    %c0_i32_0 = arith.constant 0 : i32
    %c0_i32_1 = arith.constant 0 : i32
    return %c0_i32, %c0_i32_0 : i32, i32
  }
  func.func @transform_3(%arg0: i32, %arg1: i32) -> (i32, i32, i32) {
    %c0_i32 = arith.constant 0 : i32
    %c0_i32_0 = arith.constant 0 : i32
    return %arg0, %c0_i32, %arg1 : i32, i32, i32
  }
}

</mosaic_0001>

<bundles_post_ra>
// kernel: conv_block_forward.3
= control target key start
LH: loop header
LB: loop body
LE: loop exit
PB: predicated region body
PF: predicated region fallthrough
CT: control target
= control target key end

     0   :  { %s401_s12 = smov 0   ;;  %s403_s13 = smov 0   ;;  %s437_s0 = inlined_call_operand.vmem [shape: f32[2,8,256], index: 0, kind: input, shape index: {}, may-alias: {0,3}]   ;;  %s438_s1 = inlined_call_operand.vmem [shape: f32[8,1], index: 1, kind: input, shape index: {}]   ;;  %s439_s2 = inlined_call_operand.vmem [shape: f32[8,1], index: 2, kind: input, shape index: {}]   ;;  %s440_s3 = inlined_call_operand.vmem [shape: f32[2,8,256], index: 3, kind: output, shape index: {}, may-alias: {0,3}]  }
   0x1   :  { %s405_s14 = smov 0  }
   0x2 LB: > { %s25_s15 = sadd.s32 1, %s374_s13  ;;  %p321_p0 = scmp.ge.s32.totalorder %s378_s14, 1  ;;  %s378_s14 = sphi %s405_s14, %s13_s14   ;;  %s374_s13 = sphi %s403_s13, %s442_s13   ;;  %s370_s12 = sphi %s401_s12, %s441_s12  }
   0x3   : > { %p27_p1 = scmp.ge.s32.totalorder %s25_s15, 2  ;;  %p158_p2 = scmp.lt.s32.totalorder %s378_s14, 3 }
   0x5   : > { %s444_s15 = smov (%p27_p1, %s25_s15), 0  ;;  %p159_p3 = pnand %p321_p0, %p158_p2 }
   0x6   : > { %p191_p4 = scmp.lt.s32.totalorder (!%p159_p3), %s370_s12, 1 }
   0x7   : > { %162 = sbr.rel (%p159_p3) target bundleno = 145 (0x91), region = 32 }
   0xc   : > { %v212_v0 = vld [vmem:[%s438_s1] sm:$0xff]  ;;  %v380_v1 = vmov 0   ;;  %s446_s12 = smov (!%p191_p4, %s370_s12), 1 }
   0xd   : > { %355 = vset.pattern.permute.xlu0 %v380_v1  ;;  %v220_v2 = vld [vmem:[%s439_s2] sm:$0xff]  ;;  %s328_s20 = sshll.u32 %s446_s12, 4 }
   0xe   : > { %215 = vperm.xlu0 %355, %v212_v0   ;;  %s198_s23 = scalar_lea.vmem %s437_s0, %s328_s20  ;;  %s208_s26 = scalar_lea.vmem %s440_s3, %s328_s20 }
   0xf   : > { %v210_v4 = vld [vmem:[%s198_s23] sm:$0xff]  ;;  %v211_v5 = vld [vmem:[%s198_s23 + $0x8] sm:$0xff] }
  0x12   : > { %223 = vperm.xlu0 %355, %v220_v2  }
  0x89   : > { %v216_v3 = vpop.permute.xlu0 %215 }
  0x8a   : > { %v218_v6 = vmul.f32 %v216_v3, %v210_v4  ;;  %v219_v7 = vmul.f32 %v216_v3, %v211_v5 }
  0x8d   : > { %v224_v8 = vpop.permute.xlu0 %223 }
  0x8e   : > { %v226_v9 = vadd.f32 %v224_v8, %v218_v6  ;;  %v227_v10 = vadd.f32 %v224_v8, %v219_v7 }
  0x90   : > { %228 = vst [vmem:[%s208_s26] sm:$0xff] %v226_v9  ;;  %229 = vst [vmem:[%s208_s26 + $0x8] sm:$0xff] %v227_v10 }
  0x91 PF: > { %s13_s14 = sadd.s32 1, %s378_s14   ;;  %s441_s12 = smov %s374_s13 }
  0x92   : > { %p10_p5 = scmp.ge.s32.totalorder %s13_s14, 4   ;;  %s442_s13 = smov %s444_s15 }
  0x94   :  { %12 = sbr.rel (!%p10_p5) target bundleno = 2 (0x2), region = 62 }

// kernel: conv_block_forward.2
= control target key start
LH: loop header
LB: loop body
LE: loop exit
PB: predicated region body
PF: predicated region fallthrough
CT: control target
= control target key end

     0   :  { %s7171_s12 = smov 0   ;;  %s7173_s13 = smov 0   ;;  %s8978_s0 = inlined_call_operand.vmem [shape: bf16[2,18,18,8], index: 0, kind: input, shape index: {}]   ;;  %s8979_s1 = inlined_call_operand.vmem [shape: bf16[9,8,128], index: 1, kind: input, shape index: {}]   ;;  %s8980_s2 = inlined_call_operand.vmem [shape: f32[2,8,256], index: 2, kind: output, shape index: {0}]   ;;  %s8981_s3 = inlined_call_operand.vmem [shape: f32[2,1,2,128], index: 3, kind: output, shape index: {1}]  }
   0x1   :  { %s7175_s14 = smov 0  }
   0x2 LB: > { %s26_s15 = sadd.s32 1, %s7145_s13  ;;  %p5975_p0 = scmp.ge.s32.totalorder %s7149_s14, 1  ;;  %s7149_s14 = sphi %s7175_s14, %s14_s14   ;;  %s7145_s13 = sphi %s7173_s13, %s9025_s13   ;;  %s7141_s12 = sphi %s7171_s12, %s9024_s12  }
   0x3   : > { %p28_p1 = scmp.ge.s32.totalorder %s26_s15, 2  ;;  %p156_p2 = scmp.lt.s32.totalorder %s7149_s14, 3 }
   0x5   : > { %s9027_s15 = smov (%p28_p1, %s26_s15), 0  ;;  %p157_p3 = pnand %p5975_p0, %p156_p2 }
   0x7   : > { %160 = sbr.rel (%p157_p3) target bundleno = 644 (0x284), region = 28 }
   0xc   : > { %v314_v0 = vld [vmem:[%s8979_s1] sm:$0xf]  ;;  %vm444_vm0 = vcmask 1043456   ;;  %p191_p4 = scmp.lt.s32.totalorder %s7141_s12, 1  ;;  %v6012_v2 = vld [vmem:[%s8979_s1 + $0x4] sm:$0xf] }
   0xd   : > { %7045 = vmatprep.subr.msk.bf16.mxu1 %vm444_vm0, %v314_v0  ;;  %7044 = vmatprep.subr.msk.bf16.mxu0 %vm444_vm0, %v314_v0  ;;  %v446_v1 = vsel %vm444_vm0, %v314_v0, 0  ;;  %v6061_v3 = vld [vmem:[%s8979_s1 + $0x8] sm:$0xf]  ;;  %vm395_vm1 = vcmask 64512   ;;  %v6126_v8 = vld [vmem:[%s8979_s1 + $0xc] sm:$0xf] }
   0xe   : > { %7043 = vmatpush3.bf16.msra.mxu1 %v446_v1  ;;  %6737 = vmatpush3.bf16.msra.mxu0 %v446_v1  ;;  %s9029_s12 = smov (!%p191_p4, %s7141_s12), 1  ;;  %v1808_v7 = vsel %vm444_vm0, %v6061_v3, 0  ;;  %v1239_v10 = vsel %vm444_vm0, %v6012_v2, 0  ;;  %v6207_v11 = vld [vmem:[%s8979_s1 + $0x10] sm:$0xf]  ;;  %vm1594_vm2 = vcmask 1042432  }
   0xf   : > { %7046 = vmatprep.subr.msk.bf16.mxu1 %vm444_vm0, %v6012_v2  ;;  %7047 = vmatprep.subr.msk.bf16.mxu0 %vm444_vm0, %v6061_v3  ;;  %s7054_s22 = smul.u32 216, %s9029_s12  ;;  %vm753_vm3 = vsmask.f32 3328  ;;  %vm754_vm4 = vsmask.f32 7440  ;;  %vm1595_vm5 = vcmask 1046532  }
  0x10   : > { %v7241_v18 = vld [vmem:[%s8979_s1 + $0x14] sm:$0xf]  ;;  %v7246_v19 = vsel %vm444_vm0, %v6126_v8, 0  ;;  %v7251_v21 = vsel %vm444_vm0, %v6207_v11, 0  ;;  %vm7268_vm6 = vmor %vm1594_vm2, %vm1595_vm5  ;;  %s6582_s11 = sshll.u32 %s9029_s12, 4  ;;  %s5979_s19 = sshll.u32 %s9029_s12, 1 }
  0x11   : > { %s7209_s25 = scalar_lea.vmem %s8978_s0, %s7054_s22  ;;  %v7257_v24 = vsel %vm444_vm0, %v7241_v18, 0  ;;  %vm7282_vm7 = vmor %vm753_vm3, %vm754_vm4  ;;  %s8920_s18 = scalar_lea.vmem %s8980_s2, %s6582_s11  ;;  %vm5770_vm8 = vcmask 1040384  }
  0x12   : > { %v7079_v4 = vld [vmem:[%s7209_s25] sm:$0xff]   ;;  %v7081_v6 = vld [vmem:[%s7209_s25 + $0xc] sm:$0xff]   ;;  %v7083_v12 = vld [vmem:[%s7209_s25 + $0x18] sm:$0xff]   ;;  %s212_s22 = scalar_lea.vmem %s8981_s3, %s5979_s19 }
  0x13   : > { %v7080_v5 = vld [vmem:[%s7209_s25 + $0x60] sm:$0xff]   ;;  %6738 = vmatprep.mubr.msk.bf16.mxu0 %vm395_vm1, %v7079_v4  ;;  %v7082_v9 = vld [vmem:[%s7209_s25 + $0x6c] sm:$0xff]   ;;  %v7084_v13 = vld [vmem:[%s7209_s25 + $0x78] sm:$0xff]  }
  0x14   : > { %6754 = vmatprep.mubr.msk.bf16.mxu1 %vm395_vm1, %v7080_v5  ;;  %6739 = vmatmul.mubr.msk.bf16.vlgmr.msra.gmra.mxu0 %vm395_vm1, %v7081_v6  ;;  %v7085_v14 = vld [vmem:[%s7209_s25 + $0x24] sm:$0xff]   ;;  %v7087_v16 = vld [vmem:[%s7209_s25 + $0x30] sm:$0xff]   ;;  %v7089_v20 = vld [vmem:[%s7209_s25 + $0x3c] sm:$0xff]  }
  0x15   : > { %6755 = vmatmul.mubr.msk.bf16.vlgmr.msra.gmra.mxu1 %vm395_vm1, %v7082_v9  ;;  %6805 = vmatpush3.bf16.msra.mxu0 %v1808_v7  ;;  %v7086_v15 = vld [vmem:[%s7209_s25 + $0x84] sm:$0xff]   ;;  %v7088_v17 = vld [vmem:[%s7209_s25 + $0x90] sm:$0xff]   ;;  %v7090_v22 = vld [vmem:[%s7209_s25 + $0x9c] sm:$0xff]  }
  0x16   : > { %6771 = vmatpush3.bf16.msra.mxu1 %v1239_v10  ;;  %6742 = vmatprep.mubr.msk.bf16.mxu0 %vm395_vm1, %v7083_v12  ;;  %v7091_v23 = vld [vmem:[%s7209_s25 + $0x48] sm:$0xff]   ;;  %v673_v26 = vld [vmem:[%s7209_s25] sm:$0xf]  ;;  %v674_v27 = vld [vmem:[%s7209_s25 + $0x4] sm:$0xf] }
  0x17   : > { %6758 = vmatprep.mubr.msk.bf16.mxu1 %vm395_vm1, %v7084_v13  ;;  %7048 = vmatprep.subr.msk.bf16.mxu1 %vm444_vm0, %v6126_v8  ;;  %v7092_v25 = vld [vmem:[%s7209_s25 + $0xa8] sm:$0xff]   ;;  %v757_v29 = vshrl.u32 %v673_v26, 16  ;;  %v760_v30 = vshll.u32 %v673_v26, 16  ;;  %v766_v31 = vshll.u32 %v674_v27, 16  ;;  %v770_v32 = vshrl.u32 %v674_v27, 16  ;;  %v7093_v2 = vld [vmem:[%s7209_s25 + $0x54] sm:$0xff]  }
  0x18   : > { %7049 = vmatprep.subr.msk.bf16.mxu0 %vm444_vm0, %v6207_v11  ;;  %v675_v28 = vld [vmem:[%s7209_s25 + $0x8] sm:$0x1]  ;;  %v1466_v33 = vld [vmem:[%s7209_s25] sm:$0xe]  ;;  %v1467_v35 = vld [vmem:[%s7209_s25 + $0x4] sm:$0xf] }
  0x19   : > { %v776_v34 = vshll.u32 %v675_v28, 16  ;;  %v1468_v36 = vld [vmem:[%s7209_s25 + $0x8] sm:$0x1]  ;;  %v6045_v37 = vrot.slane %v1466_v33, 9  ;;  %v759_v38 = vrot.slane %v757_v29, 4  ;;  %v762_v39 = vrot.slane %v760_v30, 5 }
  0x1a   : > { %v768_v40 = vrot.slane %v766_v31, 5  ;;  %v772_v41 = vrot.slane %v770_v32, 4  ;;  %v676_v43 = vld [vmem:[%s7209_s25 + $0xc] sm:$0xf]  ;;  %v1599_v45 = vrot.slane %v1467_v35, 5  ;;  %v1602_v46 = vrot.slane %v1468_v36, 5 }
  0x1b   : > { %v778_v44 = vrot.slane %v776_v34, 5  ;;  %v677_v47 = vld [vmem:[%s7209_s25 + $0x10] sm:$0xf]  ;;  %v781_v48 = vshrl.u32 %v676_v43, 16  ;;  %v763_v49 = vor.u32 %v762_v39, %v759_v38  ;;  %v678_v51 = vld [vmem:[%s7209_s25 + $0x14] sm:$0x1] }
  0x1c   : > { %6743 = vmatmul.mubr.msk.bf16.gmra.mxu0 %vm395_vm1, %v7085_v14  ;;  %v773_v50 = vor.u32 %v772_v41, %v768_v40  ;;  %v784_v52 = vshll.u32 %v676_v43, 16  ;;  %v790_v53 = vshll.u32 %v677_v47, 16  ;;  %v1469_v54 = vld [vmem:[%s7209_s25 + $0xc] sm:$0xe]  ;;  %v1600_v56 = vsel %vm7268_vm6, %v6045_v37, %v1599_v45  ;;  %v1470_v60 = vld [vmem:[%s7209_s25 + $0x10] sm:$0xf] }
  0x1d   : > { %6759 = vmatmul.mubr.msk.bf16.gmra.mxu1 %vm395_vm1, %v7086_v15  ;;  %6746 = vmatprep.mubr.msk.bf16.mxu0 %vm395_vm1, %v7087_v16  ;;  %v1601_v57 = vrot.slane %v1599_v45, 4  ;;  %v783_v58 = vrot.slane %v781_v48, 4  ;;  %v794_v59 = vshrl.u32 %v677_v47, 16  ;;  %v764_v61 = vrot.slane %v763_v49, 4  ;;  %v1471_v1 = vld [vmem:[%s7209_s25 + $0x14] sm:$0x1] }
  0x1e   : > { %6762 = vmatprep.mubr.msk.bf16.mxu1 %vm395_vm1, %v7088_v17  ;;  %v774_v62 = vrot.slane %v773_v50, 4  ;;  %v786_v63 = vrot.slane %v784_v52, 5  ;;  %v792_v0 = vrot.slane %v790_v53, 5  ;;  %v800_v5 = vshll.u32 %v678_v51, 16  ;;  %v679_v7 = vld [vmem:[%s7209_s25 + $0x18] sm:$0xf] }
  0x1f   : > { %v1603_v3 = vsel %vm7268_vm6, %v1601_v57, %v1602_v46  ;;  %v796_v4 = vrot.slane %v794_v59, 4  ;;  %v6046_v6 = vrot.slane %v1469_v54, 9  ;;  %v7094_v8 = vld [vmem:[%s7209_s25 + $0xb4] sm:$0xff]   ;;  %v769_v9 = vsel %vm7282_vm7, %v764_v61, %v768_v40  ;;  %v680_v13 = vld [vmem:[%s7209_s25 + $0x1c] sm:$0xf] }
  0x20   : > { %v779_v10 = vsel %vm7282_vm7, %v774_v62, %v778_v44  ;;  %v6062_v11 = vcombine.low %v1600_v56, %v1603_v3  ;;  %v787_v12 = vor.u32 %v786_v63, %v783_v58  ;;  %v802_v16 = vrot.slane %v800_v5, 5  ;;  %v1472_v27 = vld [vmem:[%s7209_s25 + $0x18] sm:$0xe]  ;;  %v1473_v32 = vld [vmem:[%s7209_s25 + $0x1c] sm:$0xf] }
  0x21   : > { %v6013_v14 = vcombine.low %v769_v9, %v779_v10  ;;  %v797_v15 = vor.u32 %v796_v4, %v792_v0  ;;  %v1606_v17 = vrot.slane %v1470_v60, 5  ;;  %v808_v26 = vshll.u32 %v679_v7, 16  ;;  %v1474_v37 = vld [vmem:[%s7209_s25 + $0x20] sm:$0x1]  ;;  %v682_v43 = vld [vmem:[%s7209_s25 + $0x24] sm:$0xf] }
  0x22   : > { %v814_v31 = vshll.u32 %v680_v13, 16  ;;  %v818_v36 = vshrl.u32 %v680_v13, 16  ;;  %v683_v48 = vld [vmem:[%s7209_s25 + $0x28] sm:$0xf]  ;;  %v6047_v50 = vrot.slane %v1472_v27, 9  ;;  %v1613_v51 = vrot.slane %v1473_v32, 5 }
  0x23   : > { %v798_v28 = vrot.slane %v797_v15, 4  ;;  %v1607_v29 = vsel %vm7268_vm6, %v6046_v6, %v1606_v17  ;;  %v1608_v30 = vrot.slane %v1606_v17, 4  ;;  %v810_v35 = vrot.slane %v808_v26, 5  ;;  %v684_v53 = vld [vmem:[%s7209_s25 + $0x2c] sm:$0x1] }
  0x24   : > { %6747 = vmatmul.mubr.msk.bf16.gmra.mxu0 %vm395_vm1, %v7089_v20  ;;  %v681_v20 = vld [vmem:[%s7209_s25 + $0x20] sm:$0x1]  ;;  %v816_v40 = vrot.slane %v814_v31, 5  ;;  %v820_v47 = vrot.slane %v818_v36, 4  ;;  %v1616_v52 = vrot.slane %v1474_v37, 5  ;;  %v829_v57 = vshrl.u32 %v682_v43, 16 }
  0x25   : > { %6763 = vmatmul.mubr.msk.bf16.gmra.mxu1 %vm395_vm1, %v7090_v22  ;;  %6750 = vmatprep.mubr.msk.bf16.mxu0 %vm395_vm1, %v7091_v23  ;;  %v788_v22 = vrot.slane %v787_v12, 4  ;;  %v1609_v23 = vrot.slane %v1471_v1, 5  ;;  %v803_v38 = vsel %vm7282_vm7, %v798_v28, %v802_v16  ;;  %v824_v41 = vshll.u32 %v681_v20, 16  ;;  %v1475_v59 = vld [vmem:[%s7209_s25 + $0x24] sm:$0xe] }
  0x26   : > { %6766 = vmatprep.mubr.msk.bf16.mxu1 %vm395_vm1, %v7092_v25  ;;  %v805_v25 = vshrl.u32 %v679_v7, 16  ;;  %v821_v56 = vor.u32 %v820_v47, %v816_v40  ;;  %v832_v58 = vshll.u32 %v682_v43, 16  ;;  %v1614_v60 = vsel %vm7268_vm6, %v6047_v50, %v1613_v51  ;;  %v1477_v5 = vld [vmem:[%s7209_s25 + $0x2c] sm:$0x1]  ;;  %v685_v10 = vld [vmem:[%s7209_s25 + $0x30] sm:$0xf] }
  0x27   : > { %v793_v33 = vsel %vm7282_vm7, %v788_v22, %v792_v0  ;;  %v1610_v39 = vsel %vm7268_vm6, %v1608_v30, %v1609_v23  ;;  %v826_v49 = vrot.slane %v824_v41, 5  ;;  %v1615_v61 = vrot.slane %v1613_v51, 4  ;;  %v1476_v0 = vld [vmem:[%s7209_s25 + $0x28] sm:$0xf]  ;;  %v686_v15 = vld [vmem:[%s7209_s25 + $0x34] sm:$0xf] }
  0x28   : > { %v807_v34 = vrot.slane %v805_v25, 4  ;;  %v6014_v44 = vcombine.low %v793_v33, %v803_v38  ;;  %v6063_v45 = vcombine.low %v1607_v29, %v1610_v39  ;;  %v838_v62 = vshll.u32 %v683_v48, 16  ;;  %v687_v23 = vld [vmem:[%s7209_s25 + $0x38] sm:$0x1]  ;;  %v1478_v28 = vld [vmem:[%s7209_s25 + $0x30] sm:$0xe] }
  0x29   : > { %v842_v63 = vshrl.u32 %v683_v48, 16  ;;  %v831_v3 = vrot.slane %v829_v57, 4  ;;  %v834_v4 = vrot.slane %v832_v58, 5  ;;  %v1617_v6 = vsel %vm7268_vm6, %v1615_v61, %v1616_v52  ;;  %v1479_v32 = vld [vmem:[%s7209_s25 + $0x34] sm:$0xf] }
  0x2a   : > { %v811_v46 = vor.u32 %v810_v35, %v807_v34  ;;  %v840_v7 = vrot.slane %v838_v62, 5  ;;  %v848_v9 = vshll.u32 %v684_v53, 16  ;;  %v6064_v12 = vcombine.low %v1614_v60, %v1617_v6  ;;  %v1480_v37 = vld [vmem:[%s7209_s25 + $0x38] sm:$0x1]  ;;  %v688_v41 = vld [vmem:[%s7209_s25 + $0x3c] sm:$0xf] }
  0x2b   : > { %v835_v13 = vor.u32 %v834_v4, %v831_v3  ;;  %v1620_v22 = vrot.slane %v1476_v0, 5  ;;  %v853_v26 = vshrl.u32 %v685_v10, 16  ;;  %v856_v27 = vshll.u32 %v685_v10, 16  ;;  %v689_v47 = vld [vmem:[%s7209_s25 + $0x40] sm:$0xf] }
  0x2c   : > { %6751 = vmatmul.mubr.msk.bf16.gmra.mxu0 %vm395_vm1, %v7093_v2  ;;  %v812_v54 = vrot.slane %v811_v46, 4  ;;  %v822_v2 = vrot.slane %v821_v56, 4  ;;  %v850_v20 = vrot.slane %v848_v9, 5  ;;  %v862_v31 = vshll.u32 %v686_v15, 16  ;;  %v690_v52 = vld [vmem:[%s7209_s25 + $0x44] sm:$0x1] }
  0x2d   : > { %6767 = vmatmul.mubr.msk.bf16.gmra.mxu1 %vm395_vm1, %v7094_v8  ;;  %6806 = vmatprep.mubr.msk.bf16.mxu0 %vm395_vm1, %v6062_v11  ;;  %v844_v8 = vrot.slane %v842_v63, 4  ;;  %v836_v25 = vrot.slane %v835_v13, 4  ;;  %v1622_v30 = vrot.slane %v1620_v22, 4  ;;  %v855_v34 = vrot.slane %v853_v26, 4  ;;  %v1481_v58 = vld [vmem:[%s7209_s25 + $0x3c] sm:$0xe] }
  0x2e   : > { %6772 = vmatprep.mubr.msk.bf16.mxu1 %vm395_vm1, %v6013_v14  ;;  %v817_v1 = vsel %vm7282_vm7, %v812_v54, %v816_v40  ;;  %v827_v11 = vsel %vm7282_vm7, %v822_v2, %v826_v49  ;;  %v6048_v14 = vrot.slane %v1475_v59, 9  ;;  %v858_v35 = vrot.slane %v856_v27, 5  ;;  %v1482_v63 = vld [vmem:[%s7209_s25 + $0x40] sm:$0xf]  ;;  %v1483_v4 = vld [vmem:[%s7209_s25 + $0x44] sm:$0x1] }
  0x2f   : > { %v6015_v16 = vcombine.low %v817_v1, %v827_v11  ;;  %v845_v17 = vor.u32 %v844_v8, %v840_v7  ;;  %v841_v33 = vsel %vm7282_vm7, %v836_v25, %v840_v7  ;;  %v866_v36 = vshrl.u32 %v686_v15, 16  ;;  %v691_v9 = vld [vmem:[%s7209_s25 + $0x48] sm:$0xf] }
  0x30   : > { %v1621_v29 = vsel %vm7268_vm6, %v6048_v14, %v1620_v22  ;;  %v864_v39 = vrot.slane %v862_v31, 5  ;;  %v872_v40 = vshll.u32 %v687_v23, 16  ;;  %v6049_v49 = vrot.slane %v1478_v28, 9  ;;  %v692_v14 = vld [vmem:[%s7209_s25 + $0x4c] sm:$0xf] }
  0x31   : > { %v868_v46 = vrot.slane %v866_v36, 4  ;;  %v1627_v50 = vrot.slane %v1479_v32, 5  ;;  %v1630_v51 = vrot.slane %v1480_v37, 5  ;;  %v877_v56 = vshrl.u32 %v688_v41, 16  ;;  %v693_v22 = vld [vmem:[%s7209_s25 + $0x50] sm:$0x1] }
  0x32   : > { %v874_v48 = vrot.slane %v872_v40, 5  ;;  %v880_v57 = vshll.u32 %v688_v41, 16  ;;  %v886_v61 = vshll.u32 %v689_v47, 16  ;;  %v890_v62 = vshrl.u32 %v689_v47, 16  ;;  %v1484_v27 = vld [vmem:[%s7209_s25 + $0x48] sm:$0xe] }
  0x33   : > { %v869_v54 = vor.u32 %v868_v46, %v864_v39  ;;  %v1628_v59 = vsel %vm7268_vm6, %v6049_v49, %v1627_v50  ;;  %v1629_v60 = vrot.slane %v1627_v50, 4  ;;  %v879_v2 = vrot.slane %v877_v56, 4  ;;  %v1485_v31 = vld [vmem:[%s7209_s25 + $0x4c] sm:$0xf]  ;;  %v1486_v36 = vld [vmem:[%s7209_s25 + $0x50] sm:$0x1] }
  0x34   : > { %6807 = vmatmul.mubr.msk.bf16.vlgmr.msra.gmra.mxu0 %vm395_vm1, %v6063_v45  ;;  %v859_v45 = vor.u32 %v858_v35, %v855_v34  ;;  %v882_v3 = vrot.slane %v880_v57, 5  ;;  %v888_v6 = vrot.slane %v886_v61, 5  ;;  %v892_v7 = vrot.slane %v890_v62, 4  ;;  %v694_v40 = vld [vmem:[%s7209_s25 + $0x54] sm:$0xf] }
  0x35   : > { %6773 = vmatmul.mubr.msk.bf16.vlgmr.msra.gmra.mxu1 %vm395_vm1, %v6014_v44  ;;  %6873 = vmatpush3.bf16.msra.mxu0 %v7251_v21  ;;  %v1623_v21 = vrot.slane %v1477_v5, 5  ;;  %v870_v1 = vrot.slane %v869_v54, 4  ;;  %v1631_v5 = vsel %vm7268_vm6, %v1629_v60, %v1630_v51  ;;  %v896_v8 = vshll.u32 %v690_v52, 16  ;;  %v695_v46 = vld [vmem:[%s7209_s25 + $0x58] sm:$0xf] }
  0x36   : > { %6839 = vmatpush3.bf16.msra.mxu1 %v7246_v19  ;;  %6810 = vmatprep.mubr.msk.bf16.mxu0 %vm395_vm1, %v6064_v12  ;;  %v846_v19 = vrot.slane %v845_v17, 4  ;;  %v860_v53 = vrot.slane %v859_v45, 4  ;;  %v6066_v11 = vcombine.low %v1628_v59, %v1631_v5  ;;  %v883_v12 = vor.u32 %v882_v3, %v879_v2  ;;  %v696_v51 = vld [vmem:[%s7209_s25 + $0x5c] sm:$0x1]  ;;  %v1487_v57 = vld [vmem:[%s7209_s25 + $0x54] sm:$0xe] }
  0x37   : > { %7050 = vmatprep.subr.msk.bf16.mxu1 %vm444_vm0, %v7241_v18  ;;  %6776 = vmatprep.mubr.msk.bf16.mxu1 %vm395_vm1, %v6015_v16  ;;  %v1624_v38 = vsel %vm7268_vm6, %v1622_v30, %v1623_v21  ;;  %v875_v10 = vsel %vm7282_vm7, %v870_v1, %v874_v48  ;;  %v6050_v13 = vrot.slane %v1481_v58, 9  ;;  %v893_v16 = vor.u32 %v892_v7, %v888_v6  ;;  %v1488_v62 = vld [vmem:[%s7209_s25 + $0x58] sm:$0xf]  ;;  %v1489_v3 = vld [vmem:[%s7209_s25 + $0x5c] sm:$0x1] }
  0x38   : > { %v851_v18 = vsel %vm7282_vm7, %v846_v19, %v850_v20  ;;  %v6065_v44 = vcombine.low %v1621_v29, %v1624_v38  ;;  %v865_v0 = vsel %vm7282_vm7, %v860_v53, %v864_v39  ;;  %v898_v17 = vrot.slane %v896_v8, 5  ;;  %v697_v8 = vld [vmem:[%s7209_s25 + $0x60] sm:$0xf] }
  0x39   : > { %v6016_v43 = vcombine.low %v841_v33, %v851_v18  ;;  %v6017_v15 = vcombine.low %v865_v0, %v875_v10  ;;  %v1634_v20 = vrot.slane %v1482_v63, 5  ;;  %v884_v23 = vrot.slane %v883_v12, 4 }
  0x3a   : > { %v1637_v25 = vrot.slane %v1483_v4, 5  ;;  %v901_v21 = vshrl.u32 %v691_v9, 16  ;;  %v904_v26 = vshll.u32 %v691_v9, 16  ;;  %v894_v28 = vrot.slane %v893_v16, 4 }
  0x3b   : > { %v1635_v19 = vsel %vm7268_vm6, %v6050_v13, %v1634_v20  ;;  %v1636_v29 = vrot.slane %v1634_v20, 4  ;;  %v910_v30 = vshll.u32 %v692_v14, 16  ;;  %v889_v32 = vsel %vm7282_vm7, %v884_v23, %v888_v6  ;;  %v698_v13 = vld [vmem:[%s7209_s25 + $0x64] sm:$0xf]  ;;  %v699_v20 = vld [vmem:[%s7209_s25 + $0x68] sm:$0x1] }
  0x3c   : > { %6811 = vmatmul.mubr.msk.bf16.gmra.mxu0 %vm395_vm1, %v6065_v44  ;;  %v903_v33 = vrot.slane %v901_v21, 4  ;;  %v906_v34 = vrot.slane %v904_v26, 5  ;;  %v914_v35 = vshrl.u32 %v692_v14, 16  ;;  %v899_v37 = vsel %vm7282_vm7, %v894_v28, %v898_v17  ;;  %v1490_v26 = vld [vmem:[%s7209_s25 + $0x60] sm:$0xe] }
  0x3d   : > { %6777 = vmatmul.mubr.msk.bf16.gmra.mxu1 %vm395_vm1, %v6016_v43  ;;  %6814 = vmatprep.mubr.msk.bf16.mxu0 %vm395_vm1, %v6066_v11  ;;  %v1638_v18 = vsel %vm7268_vm6, %v1636_v29, %v1637_v25  ;;  %v912_v38 = vrot.slane %v910_v30, 5  ;;  %v920_v39 = vshll.u32 %v693_v22, 16  ;;  %v6018_v41 = vcombine.low %v889_v32, %v899_v37  ;;  %v1491_v30 = vld [vmem:[%s7209_s25 + $0x64] sm:$0xf] }
  0x3e   : > { %6780 = vmatprep.mubr.msk.bf16.mxu1 %vm395_vm1, %v6017_v15  ;;  %v6067_v43 = vcombine.low %v1635_v19, %v1638_v18  ;;  %v907_v44 = vor.u32 %v906_v34, %v903_v33  ;;  %v916_v45 = vrot.slane %v914_v35, 4  ;;  %v6051_v48 = vrot.slane %v1484_v27, 9  ;;  %v1492_v35 = vld [vmem:[%s7209_s25 + $0x68] sm:$0x1] }
  0x3f   : > { %v922_v47 = vrot.slane %v920_v39, 5  ;;  %v1641_v49 = vrot.slane %v1485_v31, 5  ;;  %v1644_v50 = vrot.slane %v1486_v36, 5  ;;  %v925_v54 = vshrl.u32 %v694_v40, 16  ;;  %v700_v39 = vld [vmem:[%s7209_s25 + $0x6c] sm:$0xf] }
  0x40   : > { %v908_v52 = vrot.slane %v907_v44, 4  ;;  %v917_v53 = vor.u32 %v916_v45, %v912_v38  ;;  %v928_v56 = vshll.u32 %v694_v40, 16  ;;  %v934_v60 = vshll.u32 %v695_v46, 16  ;;  %v701_v45 = vld [vmem:[%s7209_s25 + $0x70] sm:$0xf] }
  0x41   : > { %v1642_v58 = vsel %vm7268_vm6, %v6051_v48, %v1641_v49  ;;  %v1643_v59 = vrot.slane %v1641_v49, 4  ;;  %v938_v61 = vshrl.u32 %v695_v46, 16  ;;  %v927_v1 = vrot.slane %v925_v54, 4 }
  0x42   : > { %v913_v63 = vsel %vm7282_vm7, %v908_v52, %v912_v38  ;;  %v918_v0 = vrot.slane %v917_v53, 4  ;;  %v930_v2 = vrot.slane %v928_v56, 5  ;;  %v936_v5 = vrot.slane %v934_v60, 5  ;;  %v1493_v56 = vld [vmem:[%s7209_s25 + $0x6c] sm:$0xe] }
  0x43   : > { %v1645_v4 = vsel %vm7268_vm6, %v1643_v59, %v1644_v50  ;;  %v940_v6 = vrot.slane %v938_v61, 4  ;;  %v944_v7 = vshll.u32 %v696_v51, 16  ;;  %v6052_v12 = vrot.slane %v1487_v57, 9  ;;  %v702_v50 = vld [vmem:[%s7209_s25 + $0x74] sm:$0x1] }
  0x44   : > { %6815 = vmatmul.mubr.msk.bf16.gmra.mxu0 %vm395_vm1, %v6067_v43  ;;  %v923_v9 = vsel %vm7282_vm7, %v918_v0, %v922_v47  ;;  %v6068_v10 = vcombine.low %v1642_v58, %v1645_v4  ;;  %v931_v11 = vor.u32 %v930_v2, %v927_v1  ;;  %v1648_v17 = vrot.slane %v1488_v62, 5  ;;  %v1494_v61 = vld [vmem:[%s7209_s25 + $0x70] sm:$0xf]  ;;  %v1495_v2 = vld [vmem:[%s7209_s25 + $0x74] sm:$0x1] }
  0x45   : > { %6781 = vmatmul.mubr.msk.bf16.gmra.mxu1 %vm395_vm1, %v6018_v41  ;;  %v6019_v14 = vcombine.low %v913_v63, %v923_v9  ;;  %v941_v15 = vor.u32 %v940_v6, %v936_v5  ;;  %v946_v16 = vrot.slane %v944_v7, 5  ;;  %v1651_v23 = vrot.slane %v1489_v3, 5  ;;  %v703_v7 = vld [vmem:[%s7209_s25 + $0x78] sm:$0xf] }
  0x46   : > { %6818 = vmatprep.mubr.msk.bf16.mxu0 %vm395_vm1, %v6068_v10  ;;  %v932_v22 = vrot.slane %v931_v11, 4  ;;  %v949_v25 = vshrl.u32 %v697_v8, 16  ;;  %v952_v21 = vshll.u32 %v697_v8, 16  ;;  %v1649_v28 = vsel %vm7268_vm6, %v6052_v12, %v1648_v17  ;;  %v704_v12 = vld [vmem:[%s7209_s25 + $0x7c] sm:$0xf] }
  0x47   : > { %6784 = vmatprep.mubr.msk.bf16.mxu1 %vm395_vm1, %v6019_v14  ;;  %v942_v27 = vrot.slane %v941_v15, 4  ;;  %v1650_v19 = vrot.slane %v1648_v17, 4  ;;  %v958_v29 = vshll.u32 %v698_v13, 16  ;;  %v962_v34 = vshrl.u32 %v698_v13, 16  ;;  %v705_v17 = vld [vmem:[%s7209_s25 + $0x80] sm:$0x1] }
  0x48   : > { %v937_v31 = vsel %vm7282_vm7, %v932_v22, %v936_v5  ;;  %v951_v32 = vrot.slane %v949_v25, 4  ;;  %v954_v33 = vrot.slane %v952_v21, 5  ;;  %v968_v38 = vshll.u32 %v699_v20, 16  ;;  %v1496_v21 = vld [vmem:[%s7209_s25 + $0x78] sm:$0xe] }
  0x49   : > { %v947_v36 = vsel %vm7282_vm7, %v942_v27, %v946_v16  ;;  %v1652_v37 = vsel %vm7268_vm6, %v1650_v19, %v1651_v23  ;;  %v960_v18 = vrot.slane %v958_v29, 5  ;;  %v964_v44 = vrot.slane %v962_v34, 4  ;;  %v1497_v29 = vld [vmem:[%s7209_s25 + $0x7c] sm:$0xf]  ;;  %v1498_v34 = vld [vmem:[%s7209_s25 + $0x80] sm:$0x1] }
  0x4a   : > { %v6020_v40 = vcombine.low %v937_v31, %v947_v36  ;;  %v6069_v41 = vcombine.low %v1649_v28, %v1652_v37  ;;  %v955_v43 = vor.u32 %v954_v33, %v951_v32  ;;  %v970_v46 = vrot.slane %v968_v38, 5  ;;  %v706_v38 = vld [vmem:[%s7209_s25 + $0x84] sm:$0xf] }
  0x4b   : > { %v6053_v47 = vrot.slane %v1490_v26, 9  ;;  %v1655_v48 = vrot.slane %v1491_v30, 5  ;;  %v1658_v49 = vrot.slane %v1492_v35, 5  ;;  %v965_v52 = vor.u32 %v964_v44, %v960_v18  ;;  %v707_v44 = vld [vmem:[%s7209_s25 + $0x88] sm:$0xf] }
  0x4c   : > { %6819 = vmatmul.mubr.msk.bf16.gmra.mxu0 %vm395_vm1, %v6069_v41  ;;  %v956_v51 = vrot.slane %v955_v43, 4  ;;  %v973_v53 = vshrl.u32 %v700_v39, 16  ;;  %v976_v54 = vshll.u32 %v700_v39, 16  ;;  %v982_v59 = vshll.u32 %v701_v45, 16 }
  0x4d   : > { %6785 = vmatmul.mubr.msk.bf16.gmra.mxu1 %vm395_vm1, %v6020_v40  ;;  %v1656_v57 = vsel %vm7268_vm6, %v6053_v47, %v1655_v48  ;;  %v1657_v58 = vrot.slane %v1655_v48, 4  ;;  %v986_v60 = vshrl.u32 %v701_v45, 16  ;;  %v966_v63 = vrot.slane %v965_v52, 4 }
  0x4e   : > { %v961_v62 = vsel %vm7282_vm7, %v956_v51, %v960_v18  ;;  %v975_v0 = vrot.slane %v973_v53, 4  ;;  %v978_v1 = vrot.slane %v976_v54, 5  ;;  %v984_v4 = vrot.slane %v982_v59, 5  ;;  %v1499_v54 = vld [vmem:[%s7209_s25 + $0x84] sm:$0xe] }
  0x4f   : > { %v1659_v3 = vsel %vm7268_vm6, %v1657_v58, %v1658_v49  ;;  %v988_v5 = vrot.slane %v986_v60, 4  ;;  %v992_v6 = vshll.u32 %v702_v50, 16  ;;  %v971_v8 = vsel %vm7282_vm7, %v966_v63, %v970_v46  ;;  %v708_v49 = vld [vmem:[%s7209_s25 + $0x8c] sm:$0x1]  ;;  %v1500_v60 = vld [vmem:[%s7209_s25 + $0x88] sm:$0xf] }
  0x50   : > { %v6070_v9 = vcombine.low %v1656_v57, %v1659_v3  ;;  %v979_v10 = vor.u32 %v978_v1, %v975_v0  ;;  %v6054_v11 = vrot.slane %v1493_v56, 9  ;;  %v6021_v13 = vcombine.low %v961_v62, %v971_v8  ;;  %v1501_v1 = vld [vmem:[%s7209_s25 + $0x8c] sm:$0x1] }
  0x51   : > { %v989_v14 = vor.u32 %v988_v5, %v984_v4  ;;  %v994_v15 = vrot.slane %v992_v6, 5  ;;  %v1662_v16 = vrot.slane %v1494_v61, 5  ;;  %v1665_v22 = vrot.slane %v1495_v2, 5  ;;  %v709_v6 = vld [vmem:[%s7209_s25 + $0x90] sm:$0xf] }
  0x52   : > { %6822 = vmatprep.mubr.msk.bf16.mxu0 %vm395_vm1, %v6070_v9  ;;  %v980_v20 = vrot.slane %v979_v10, 4  ;;  %v997_v23 = vshrl.u32 %v703_v7, 16  ;;  %v1000_v25 = vshll.u32 %v703_v7, 16  ;;  %6788 = vmatprep.mubr.msk.bf16.mxu1 %vm395_vm1, %v6021_v13  ;;  %v1006_v19 = vshll.u32 %v704_v12, 16 }
  0x53   : > { %v990_v26 = vrot.slane %v989_v14, 4  ;;  %v1663_v27 = vsel %vm7268_vm6, %v6054_v11, %v1662_v16  ;;  %v1664_v28 = vrot.slane %v1662_v16, 4  ;;  %v1010_v33 = vshrl.u32 %v704_v12, 16  ;;  %v710_v11 = vld [vmem:[%s7209_s25 + $0x94] sm:$0xf] }
  0x54   : > { %v985_v30 = vsel %vm7282_vm7, %v980_v20, %v984_v4  ;;  %v999_v31 = vrot.slane %v997_v23, 4  ;;  %v1002_v32 = vrot.slane %v1000_v25, 5  ;;  %v1008_v37 = vrot.slane %v1006_v19, 5  ;;  %v711_v12 = vld [vmem:[%s7209_s25 + $0x98] sm:$0x1] }
  0x55   : > { %v995_v35 = vsel %vm7282_vm7, %v990_v26, %v994_v15  ;;  %v1666_v36 = vsel %vm7268_vm6, %v1664_v28, %v1665_v22  ;;  %v1016_v18 = vshll.u32 %v705_v17, 16  ;;  %v1012_v43 = vrot.slane %v1010_v33, 4  ;;  %v1502_v25 = vld [vmem:[%s7209_s25 + $0x90] sm:$0xe] }
  0x56   : > { %v6022_v39 = vcombine.low %v985_v30, %v995_v35  ;;  %v6071_v40 = vcombine.low %v1663_v27, %v1666_v36  ;;  %v1003_v41 = vor.u32 %v1002_v32, %v999_v31  ;;  %v6055_v46 = vrot.slane %v1496_v21, 9  ;;  %v1503_v21 = vld [vmem:[%s7209_s25 + $0x94] sm:$0xf] }
  0x57   : > { %v1018_v45 = vrot.slane %v1016_v18, 5  ;;  %v1669_v47 = vrot.slane %v1497_v29, 5  ;;  %v1672_v48 = vrot.slane %v1498_v34, 5  ;;  %v1013_v51 = vor.u32 %v1012_v43, %v1008_v37  ;;  %v1504_v29 = vld [vmem:[%s7209_s25 + $0x98] sm:$0x1] }
  0x58   : > { %6789 = vmatmul.mubr.msk.bf16.gmra.mxu1 %vm395_vm1, %v6022_v39  ;;  %6823 = vmatmul.mubr.msk.bf16.gmra.mxu0 %vm395_vm1, %v6071_v40  ;;  %v1004_v50 = vrot.slane %v1003_v41, 4  ;;  %v1021_v52 = vshrl.u32 %v706_v38, 16  ;;  %v1024_v53 = vshll.u32 %v706_v38, 16  ;;  %v1030_v58 = vshll.u32 %v707_v44, 16  ;;  %v712_v34 = vld [vmem:[%s7209_s25 + $0x9c] sm:$0xf] }
  0x59   : > { %v1670_v56 = vsel %vm7268_vm6, %v6055_v46, %v1669_v47  ;;  %v1671_v57 = vrot.slane %v1669_v47, 4  ;;  %v1034_v59 = vshrl.u32 %v707_v44, 16  ;;  %v1014_v62 = vrot.slane %v1013_v51, 4  ;;  %v713_v43 = vld [vmem:[%s7209_s25 + $0xa0] sm:$0xf] }
  0x5a   : > { %v1009_v61 = vsel %vm7282_vm7, %v1004_v50, %v1008_v37  ;;  %v1023_v63 = vrot.slane %v1021_v52, 4  ;;  %v1026_v0 = vrot.slane %v1024_v53, 5  ;;  %v1032_v3 = vrot.slane %v1030_v58, 5  ;;  %v714_v44 = vld [vmem:[%s7209_s25 + $0xa4] sm:$0x1] }
  0x5b   : > { %v1673_v2 = vsel %vm7268_vm6, %v1671_v57, %v1672_v48  ;;  %v1036_v4 = vrot.slane %v1034_v59, 4  ;;  %v1040_v5 = vshll.u32 %v708_v49, 16  ;;  %v1019_v7 = vsel %vm7282_vm7, %v1014_v62, %v1018_v45  ;;  %v1505_v49 = vld [vmem:[%s7209_s25 + $0x9c] sm:$0xe] }
  0x5c   : > { %v6072_v8 = vcombine.low %v1670_v56, %v1673_v2  ;;  %v1027_v9 = vor.u32 %v1026_v0, %v1023_v63  ;;  %v6056_v10 = vrot.slane %v1499_v54, 9  ;;  %v6023_v13 = vcombine.low %v1009_v61, %v1019_v7  ;;  %v1506_v54 = vld [vmem:[%s7209_s25 + $0xa0] sm:$0xf]  ;;  %v7490_v56 = vld [vmem:[%s8979_s1 + $0x18] sm:$0xf] }
  0x5d   : > { %v1037_v14 = vor.u32 %v1036_v4, %v1032_v3  ;;  %v1042_v15 = vrot.slane %v1040_v5, 5  ;;  %v1676_v16 = vrot.slane %v1500_v60, 5  ;;  %v1679_v20 = vrot.slane %v1501_v1, 5  ;;  %v1507_v61 = vld [vmem:[%s7209_s25 + $0xa4] sm:$0x1]  ;;  %7051 = vmatprep.subr.msk.bf16.mxu0 %vm444_vm0, %v7490_v56 }
  0x5e   : > { %6826 = vmatprep.mubr.msk.bf16.mxu0 %vm395_vm1, %v6072_v8  ;;  %v1028_v17 = vrot.slane %v1027_v9, 4  ;;  %v1045_v22 = vshrl.u32 %v709_v6, 16  ;;  %v1048_v23 = vshll.u32 %v709_v6, 16  ;;  %6792 = vmatprep.mubr.msk.bf16.mxu1 %vm395_vm1, %v6023_v13  ;;  %v1054_v19 = vshll.u32 %v710_v11, 16  ;;  %v715_v6 = vld [vmem:[%s7209_s25 + $0xa8] sm:$0xf] }
  0x5f   : > { %v1038_v26 = vrot.slane %v1037_v14, 4  ;;  %v1677_v27 = vsel %vm7268_vm6, %v6056_v10, %v1676_v16  ;;  %v1678_v28 = vrot.slane %v1676_v16, 4  ;;  %v1058_v33 = vshrl.u32 %v710_v11, 16  ;;  %v716_v11 = vld [vmem:[%s7209_s25 + $0xac] sm:$0xf] }
  0x60   : > { %v1033_v30 = vsel %vm7282_vm7, %v1028_v17, %v1032_v3  ;;  %v1047_v31 = vrot.slane %v1045_v22, 4  ;;  %v1050_v32 = vrot.slane %v1048_v23, 5  ;;  %v1056_v37 = vrot.slane %v1054_v19, 5 }
  0x61   : > { %v1043_v35 = vsel %vm7282_vm7, %v1038_v26, %v1042_v15  ;;  %v1680_v36 = vsel %vm7268_vm6, %v1678_v28, %v1679_v20  ;;  %v1064_v18 = vshll.u32 %v711_v12, 16  ;;  %v1060_v41 = vrot.slane %v1058_v33, 4  ;;  %v717_v12 = vld [vmem:[%s7209_s25 + $0xb0] sm:$0x1] }
  0x62   : > { %v6024_v38 = vcombine.low %v1033_v30, %v1043_v35  ;;  %v6073_v39 = vcombine.low %v1677_v27, %v1680_v36  ;;  %v1051_v40 = vor.u32 %v1050_v32, %v1047_v31  ;;  %v6057_v46 = vrot.slane %v1502_v25, 9  ;;  %v1508_v25 = vld [vmem:[%s7209_s25 + $0xa8] sm:$0xe] }
  0x63   : > { %v1066_v45 = vrot.slane %v1064_v18, 5  ;;  %v1683_v47 = vrot.slane %v1503_v21, 5  ;;  %v1686_v48 = vrot.slane %v1504_v29, 5  ;;  %v1061_v51 = vor.u32 %v1060_v41, %v1056_v37  ;;  %v1509_v21 = vld [vmem:[%s7209_s25 + $0xac] sm:$0xf] }
  0x64   : > { %6793 = vmatmul.mubr.msk.bf16.gmra.mxu1 %vm395_vm1, %v6024_v38  ;;  %6827 = vmatmul.mubr.msk.bf16.gmra.mxu0 %vm395_vm1, %v6073_v39  ;;  %v1052_v50 = vrot.slane %v1051_v40, 4  ;;  %v1069_v52 = vshrl.u32 %v712_v34, 16  ;;  %v1072_v53 = vshll.u32 %v712_v34, 16  ;;  %v1078_v59 = vshll.u32 %v713_v43, 16  ;;  %v1510_v29 = vld [vmem:[%s7209_s25 + $0xb0] sm:$0x1] }
  0x65   : > { %v1684_v57 = vsel %vm7268_vm6, %v6057_v46, %v1683_v47  ;;  %v1685_v58 = vrot.slane %v1683_v47, 4  ;;  %v1082_v60 = vshrl.u32 %v713_v43, 16  ;;  %v1062_v63 = vrot.slane %v1061_v51, 4  ;;  %v718_v34 = vld [vmem:[%s7209_s25 + $0xb4] sm:$0xf] }
  0x66   : > { %v1057_v62 = vsel %vm7282_vm7, %v1052_v50, %v1056_v37  ;;  %v1071_v0 = vrot.slane %v1069_v52, 4  ;;  %v1074_v1 = vrot.slane %v1072_v53, 5  ;;  %v1080_v3 = vrot.slane %v1078_v59, 5  ;;  %v719_v43 = vld [vmem:[%s7209_s25 + $0xb8] sm:$0xf] }
  0x67   : > { %v1687_v2 = vsel %vm7268_vm6, %v1685_v58, %v1686_v48  ;;  %v1084_v4 = vrot.slane %v1082_v60, 4  ;;  %v1088_v5 = vshll.u32 %v714_v44, 16  ;;  %v1067_v7 = vsel %vm7282_vm7, %v1062_v63, %v1066_v45  ;;  %v720_v44 = vld [vmem:[%s7209_s25 + $0xbc] sm:$0x1] }
  0x68   : > { %v6074_v8 = vcombine.low %v1684_v57, %v1687_v2  ;;  %v1075_v9 = vor.u32 %v1074_v1, %v1071_v0  ;;  %v6058_v10 = vrot.slane %v1505_v49, 9  ;;  %v6025_v13 = vcombine.low %v1057_v62, %v1067_v7  ;;  %v1511_v49 = vld [vmem:[%s7209_s25 + $0xb4] sm:$0xe]  ;;  %v1513_v1 = vld [vmem:[%s7209_s25 + $0xbc] sm:$0x1] }
  0x69   : > { %v1085_v14 = vor.u32 %v1084_v4, %v1080_v3  ;;  %v1090_v15 = vrot.slane %v1088_v5, 5  ;;  %v1690_v16 = vrot.slane %v1506_v54, 5  ;;  %v1693_v20 = vrot.slane %v1507_v61, 5  ;;  %v1512_v54 = vld [vmem:[%s7209_s25 + $0xb8] sm:$0xf] }
  0x6a   : > { %6830 = vmatprep.mubr.msk.bf16.mxu0 %vm395_vm1, %v6074_v8  ;;  %v1076_v17 = vrot.slane %v1075_v9, 4  ;;  %v1093_v22 = vshrl.u32 %v715_v6, 16  ;;  %v1096_v23 = vshll.u32 %v715_v6, 16  ;;  %6796 = vmatprep.mubr.msk.bf16.mxu1 %vm395_vm1, %v6025_v13  ;;  %v1102_v19 = vshll.u32 %v716_v11, 16  ;;  %v6159_v6 = vld [vmem:[%s7209_s25 + $0xc] sm:$0xf] }
  0x6b   : > { %v1086_v26 = vrot.slane %v1085_v14, 4  ;;  %v1691_v27 = vsel %vm7268_vm6, %v6058_v10, %v1690_v16  ;;  %v1692_v28 = vrot.slane %v1690_v16, 4  ;;  %v1106_v33 = vshrl.u32 %v716_v11, 16  ;;  %v6160_v11 = vld [vmem:[%s7209_s25 + $0x10] sm:$0xf] }
  0x6c   : > { %v1081_v30 = vsel %vm7282_vm7, %v1076_v17, %v1080_v3  ;;  %v1095_v31 = vrot.slane %v1093_v22, 4  ;;  %v1098_v32 = vrot.slane %v1096_v23, 5  ;;  %v1104_v37 = vrot.slane %v1102_v19, 5  ;;  %v6161_v16 = vld [vmem:[%s7209_s25 + $0x14] sm:$0x1] }
  0x6d   : > { %v1091_v35 = vsel %vm7282_vm7, %v1086_v26, %v1090_v15  ;;  %v1694_v36 = vsel %vm7268_vm6, %v1692_v28, %v1693_v20  ;;  %v1112_v18 = vshll.u32 %v717_v12, 16  ;;  %v1108_v41 = vrot.slane %v1106_v33, 4  ;;  %v6163_v19 = vld [vmem:[%s7209_s25 + $0x1c] sm:$0xf] }
  0x6e   : > { %v6026_v38 = vcombine.low %v1081_v30, %v1091_v35  ;;  %v6075_v39 = vcombine.low %v1691_v27, %v1694_v36  ;;  %v1099_v40 = vor.u32 %v1098_v32, %v1095_v31  ;;  %v6059_v46 = vrot.slane %v1508_v25, 9  ;;  %v6162_v25 = vld [vmem:[%s7209_s25 + $0x18] sm:$0xf]  ;;  %v7095_v30 = vld [vmem:[%s7209_s25 + $0xc] sm:$0xff]  }
  0x6f   : > { %v1114_v45 = vrot.slane %v1112_v18, 5  ;;  %v1697_v47 = vrot.slane %v1509_v21, 5  ;;  %v1700_v48 = vrot.slane %v1510_v29, 5  ;;  %v1109_v51 = vor.u32 %v1108_v41, %v1104_v37  ;;  %v6164_v18 = vld [vmem:[%s7209_s25 + $0x20] sm:$0x1] }
  0x70   : > { %6797 = vmatmul.mubr.msk.bf16.gmra.mxu1 %vm395_vm1, %v6026_v38  ;;  %6831 = vmatmul.mubr.msk.bf16.gmra.mxu0 %vm395_vm1, %v6075_v39  ;;  %v1100_v50 = vrot.slane %v1099_v40, 4  ;;  %v1117_v52 = vshrl.u32 %v718_v34, 16  ;;  %v1120_v53 = vshll.u32 %v718_v34, 16  ;;  %v1126_v59 = vshll.u32 %v719_v43, 16 }
  0x71   : > { %v1698_v57 = vsel %vm7268_vm6, %v6059_v46, %v1697_v47  ;;  %v1699_v58 = vrot.slane %v1697_v47, 4  ;;  %v1130_v60 = vshrl.u32 %v719_v43, 16  ;;  %v1110_v62 = vrot.slane %v1109_v51, 4  ;;  %v6165_v43 = vld [vmem:[%s7209_s25 + $0x24] sm:$0xf] }
  0x72   : > { %v1105_v61 = vsel %vm7282_vm7, %v1100_v50, %v1104_v37  ;;  %v1119_v63 = vrot.slane %v1117_v52, 4  ;;  %v1122_v0 = vrot.slane %v1120_v53, 5  ;;  %v1128_v3 = vrot.slane %v1126_v59, 5  ;;  %v6167_v59 = vld [vmem:[%s7209_s25 + $0x2c] sm:$0x1] }
  0x73   : > { %v1701_v2 = vsel %vm7268_vm6, %v1699_v58, %v1700_v48  ;;  %v1132_v4 = vrot.slane %v1130_v60, 4  ;;  %v1136_v5 = vshll.u32 %v720_v44, 16  ;;  %v1115_v7 = vsel %vm7282_vm7, %v1110_v62, %v1114_v45  ;;  %v6166_v44 = vld [vmem:[%s7209_s25 + $0x28] sm:$0xf] }
  0x74   : > { %v6076_v8 = vcombine.low %v1698_v57, %v1701_v2  ;;  %v1123_v9 = vor.u32 %v1122_v0, %v1119_v63  ;;  %v6060_v10 = vrot.slane %v1511_v49, 9  ;;  %v6027_v12 = vcombine.low %v1105_v61, %v1115_v7  ;;  %v7096_v0 = vld [vmem:[%s7209_s25 + $0x18] sm:$0xff]  }
  0x75   : > { %v1133_v13 = vor.u32 %v1132_v4, %v1128_v3  ;;  %v1138_v14 = vrot.slane %v1136_v5, 5  ;;  %v1704_v15 = vrot.slane %v1512_v54, 5  ;;  %v1707_v20 = vrot.slane %v1513_v1, 5  ;;  %v6168_v5 = vld [vmem:[%s7209_s25 + $0x30] sm:$0xf] }
  0x76   : > { %6834 = vmatprep.mubr.msk.bf16.mxu0 %vm395_vm1, %v6076_v8  ;;  %v1124_v17 = vrot.slane %v1123_v9, 4  ;;  %v2542_v22 = vshrl.u32 %v6159_v6, 16  ;;  %v2545_v23 = vshll.u32 %v6159_v6, 16  ;;  %6800 = vmatprep.mubr.msk.bf16.mxu1 %vm395_vm1, %v6027_v12  ;;  %v2551_v28 = vshll.u32 %v6160_v11, 16 }
  0x77   : > { %v1134_v21 = vrot.slane %v1133_v13, 4  ;;  %v1705_v26 = vsel %vm7268_vm6, %v6060_v10, %v1704_v15  ;;  %v1706_v27 = vrot.slane %v1704_v15, 4  ;;  %v2555_v33 = vshrl.u32 %v6160_v11, 16  ;;  %v7097_v11 = vld [vmem:[%s7209_s25 + $0x24] sm:$0xff]  }
  0x78   : > { %v1129_v29 = vsel %vm7282_vm7, %v1124_v17, %v1128_v3  ;;  %v2544_v31 = vrot.slane %v2542_v22, 4  ;;  %v2547_v32 = vrot.slane %v2545_v23, 5  ;;  %v2553_v36 = vrot.slane %v2551_v28, 5 }
  0x79   : > { %v1139_v34 = vsel %vm7282_vm7, %v1134_v21, %v1138_v14  ;;  %v1708_v35 = vsel %vm7268_vm6, %v1706_v27, %v1707_v20  ;;  %v2561_v37 = vshll.u32 %v6161_v16, 16  ;;  %v2557_v41 = vrot.slane %v2555_v33, 4  ;;  %v6169_v14 = vld [vmem:[%s7209_s25 + $0x34] sm:$0xf] }
  0x7a   : > { %v6028_v38 = vcombine.low %v1129_v29, %v1139_v34  ;;  %v6077_v39 = vcombine.low %v1705_v26, %v1708_v35  ;;  %v2548_v40 = vor.u32 %v2547_v32, %v2544_v31  ;;  %v2566_v46 = vshrl.u32 %v6162_v25, 16  ;;  %v6172_v35 = vld [vmem:[%s7209_s25 + $0x40] sm:$0xf] }
  0x7b   : > { %v2563_v45 = vrot.slane %v2561_v37, 5  ;;  %v2569_v47 = vshll.u32 %v6162_v25, 16  ;;  %v2575_v48 = vshll.u32 %v6163_v19, 16  ;;  %v2558_v50 = vor.u32 %v2557_v41, %v2553_v36  ;;  %v6170_v25 = vld [vmem:[%s7209_s25 + $0x38] sm:$0x1] }
  0x7c   : > { %6801 = vmatmul.mubr.msk.bf16.gmra.mxu1 %vm395_vm1, %v6028_v38  ;;  %6835 = vmatmul.mubr.msk.bf16.gmra.mxu0 %vm395_vm1, %v6077_v39  ;;  %v2549_v49 = vrot.slane %v2548_v40, 4  ;;  %v2579_v51 = vshrl.u32 %v6163_v19, 16  ;;  %v2585_v52 = vshll.u32 %v6164_v18, 16  ;;  %v2568_v53 = vrot.slane %v2566_v46, 4  ;;  %v6173_v39 = vld [vmem:[%s7209_s25 + $0x44] sm:$0x1] }
  0x7d   : > { %6840 = vmatprep.mubr.msk.bf16.mxu1 %vm395_vm1, %v7095_v30  ;;  %v2571_v54 = vrot.slane %v2569_v47, 5  ;;  %v2577_v57 = vrot.slane %v2575_v48, 5  ;;  %v4016_v58 = vsel %vm444_vm0, %v7490_v56, 0  ;;  %v2559_v61 = vrot.slane %v2558_v50, 4  ;;  %v6171_v30 = vld [vmem:[%s7209_s25 + $0x3c] sm:$0xf] }
  0x7e   : > { %v2554_v60 = vsel %vm7282_vm7, %v2549_v49, %v2553_v36  ;;  %v2581_v62 = vrot.slane %v2579_v51, 4  ;;  %v2587_v63 = vrot.slane %v2585_v52, 5  ;;  %v2590_v2 = vshrl.u32 %v6165_v43, 16  ;;  %v6174_v49 = vld [vmem:[%s7209_s25 + $0x48] sm:$0xf]  ;;  %v7099_v52 = vld [vmem:[%s7209_s25 + $0x3c] sm:$0xff]  }
  0x7f   : > { %v2572_v1 = vor.u32 %v2571_v54, %v2568_v53  ;;  %v2593_v3 = vshll.u32 %v6165_v43, 16  ;;  %v2599_v4 = vshll.u32 %v6166_v44, 16  ;;  %v2564_v6 = vsel %vm7282_vm7, %v2559_v61, %v2563_v45  ;;  %v7098_v45 = vld [vmem:[%s7209_s25 + $0x30] sm:$0xff]  }
  0x80   : > { %v2582_v7 = vor.u32 %v2581_v62, %v2577_v57  ;;  %v2603_v56 = vshrl.u32 %v6166_v44, 16  ;;  %v2609_v8 = vshll.u32 %v6167_v59, 16  ;;  %v6208_v9 = vcombine.low %v2554_v60, %v2564_v6 }
  0x81   : > { %v2573_v10 = vrot.slane %v2572_v1, 4  ;;  %v2592_v12 = vrot.slane %v2590_v2, 4  ;;  %v2595_v13 = vrot.slane %v2593_v3, 5  ;;  %v2601_v16 = vrot.slane %v2599_v4, 5 }
  0x82   : > { %v2583_v15 = vrot.slane %v2582_v7, 4  ;;  %v2605_v17 = vrot.slane %v2603_v56, 4  ;;  %v2611_v20 = vrot.slane %v2609_v8, 5  ;;  %6874 = vmatprep.mubr.msk.bf16.mxu0 %vm395_vm1, %v6208_v9  ;;  %v2614_v21 = vshrl.u32 %v6168_v5, 16  ;;  %v6177_v7 = vld [vmem:[%s7209_s25 + $0x54] sm:$0xf] }
  0x83   : > { %v2578_v22 = vsel %vm7282_vm7, %v2573_v10, %v2577_v57  ;;  %v2596_v23 = vor.u32 %v2595_v13, %v2592_v12  ;;  %v2617_v26 = vshll.u32 %v6168_v5, 16  ;;  %v2623_v19 = vshll.u32 %v6169_v14, 16  ;;  %v6175_v57 = vld [vmem:[%s7209_s25 + $0x4c] sm:$0xf] }
  0x84   : > { %6841 = vmatmul.mubr.msk.bf16.vlgmr.msra.gmra.mxu1 %vm395_vm1, %v7096_v0  ;;  %v2588_v27 = vsel %vm7282_vm7, %v2583_v15, %v2587_v63  ;;  %v2606_v28 = vor.u32 %v2605_v17, %v2601_v16  ;;  %v2627_v29 = vshrl.u32 %v6169_v14, 16  ;;  %v2616_v33 = vrot.slane %v2614_v21, 4  ;;  %v6176_v0 = vld [vmem:[%s7209_s25 + $0x50] sm:$0x1]  ;;  %v7100_v13 = vld [vmem:[%s7209_s25 + $0x48] sm:$0xff]  }
  0x85   : > { %v6209_v31 = vcombine.low %v2578_v22, %v2588_v27  ;;  %6907 = vmatpush3.bf16.msra.mxu1 %v7257_v24  ;;  %6844 = vmatprep.mubr.msk.bf16.mxu1 %vm395_vm1, %v7097_v11  ;;  %v2597_v32 = vrot.slane %v2596_v23, 4  ;;  %v2619_v34 = vrot.slane %v2617_v26, 5  ;;  %v2625_v37 = vrot.slane %v2623_v19, 5  ;;  %v6178_v11 = vld [vmem:[%s7209_s25 + $0x58] sm:$0xf] }
  0x86   : > { %v2607_v36 = vrot.slane %v2606_v28, 4  ;;  %v2629_v18 = vrot.slane %v2627_v29, 4  ;;  %v2633_v38 = vshll.u32 %v6170_v25, 16  ;;  %v2638_v41 = vshrl.u32 %v6171_v30, 16  ;;  %v7101_v22 = vld [vmem:[%s7209_s25 + $0x54] sm:$0xff]  }
  0x87   : > { %6875 = vmatmul.mubr.msk.bf16.vlgmr.msra.gmra.mxu0 %vm395_vm1, %v6209_v31  ;;  %v2602_v40 = vsel %vm7282_vm7, %v2597_v32, %v2601_v16  ;;  %v2620_v24 = vor.u32 %v2619_v34, %v2616_v33  ;;  %v2641_v43 = vshll.u32 %v6171_v30, 16  ;;  %v2647_v48 = vshll.u32 %v6172_v35, 16  ;;  %v6179_v23 = vld [vmem:[%s7209_s25 + $0x5c] sm:$0x1]  ;;  %v6180_v29 = vld [vmem:[%s7209_s25 + $0x60] sm:$0xf] }
  0x88   : > { %6941 = vmatpush3.bf16.msra.mxu0 %v4016_v58  ;;  %v2612_v44 = vsel %vm7282_vm7, %v2607_v36, %v2611_v20  ;;  %v2630_v46 = vor.u32 %v2629_v18, %v2625_v37  ;;  %v2635_v47 = vrot.slane %v2633_v38, 5  ;;  %v2640_v53 = vrot.slane %v2638_v41, 4  ;;  %v6181_v34 = vld [vmem:[%s7209_s25 + $0x64] sm:$0xf]  ;;  %v6182_v41 = vld [vmem:[%s7209_s25 + $0x68] sm:$0x1] }
  0x89   : > { %v6210_v50 = vcombine.low %v2602_v40, %v2612_v44  ;;  %v2621_v51 = vrot.slane %v2620_v24, 4  ;;  %v2643_v54 = vrot.slane %v2641_v43, 5  ;;  %v2649_v60 = vrot.slane %v2647_v48, 5  ;;  %v6183_v43 = vld [vmem:[%s7209_s25 + $0x6c] sm:$0xf] }
  0x8a   : > { %v2631_v59 = vrot.slane %v2630_v46, 4  ;;  %v2651_v61 = vshrl.u32 %v6172_v35, 16  ;;  %v2657_v58 = vshll.u32 %v6173_v39, 16  ;;  %v2662_v1 = vshrl.u32 %v6174_v49, 16  ;;  %v6184_v48 = vld [vmem:[%s7209_s25 + $0x70] sm:$0xf] }
  0x8b   : > { %6878 = vmatprep.mubr.msk.bf16.mxu0 %vm395_vm1, %v6210_v50  ;;  %v2626_v62 = vsel %vm7282_vm7, %v2621_v51, %v2625_v37  ;;  %v2644_v63 = vor.u32 %v2643_v54, %v2640_v53  ;;  %v2665_v2 = vshll.u32 %v6174_v49, 16  ;;  %v2671_v6 = vshll.u32 %v6175_v57, 16 }
  0x8c   : > { %6845 = vmatmul.mubr.msk.bf16.gmra.mxu1 %vm395_vm1, %v7098_v45  ;;  %v2636_v3 = vsel %vm7282_vm7, %v2631_v59, %v2635_v47  ;;  %v2653_v4 = vrot.slane %v2651_v61, 4  ;;  %v2659_v5 = vrot.slane %v2657_v58, 5  ;;  %v2664_v9 = vrot.slane %v2662_v1, 4 }
  0x8d   : > { %v6211_v56 = vcombine.low %v2626_v62, %v2636_v3  ;;  %6848 = vmatprep.mubr.msk.bf16.mxu1 %vm395_vm1, %v7099_v52  ;;  %v2645_v8 = vrot.slane %v2644_v63, 4  ;;  %v2667_v10 = vrot.slane %v2665_v2, 5  ;;  %v2673_v14 = vrot.slane %v2671_v6, 5  ;;  %v7102_v63 = vld [vmem:[%s7209_s25 + $0x60] sm:$0xff]   ;;  %v6185_v3 = vld [vmem:[%s7209_s25 + $0x74] sm:$0x1] }
  0x8e   : > { %v2654_v12 = vor.u32 %v2653_v4, %v2649_v60  ;;  %v2675_v15 = vshrl.u32 %v6175_v57, 16  ;;  %v2681_v16 = vshll.u32 %v6176_v0, 16  ;;  %v2686_v25 = vshrl.u32 %v6177_v7, 16  ;;  %v7103_v6 = vld [vmem:[%s7209_s25 + $0x6c] sm:$0xff]  }
  0x8f   : > { %6879 = vmatmul.mubr.msk.bf16.gmra.mxu0 %vm395_vm1, %v6211_v56  ;;  %v2650_v17 = vsel %vm7282_vm7, %v2645_v8, %v2649_v60  ;;  %v2668_v20 = vor.u32 %v2667_v10, %v2664_v9  ;;  %v2689_v21 = vshll.u32 %v6177_v7, 16  ;;  %v2695_v19 = vshll.u32 %v6178_v11, 16  ;;  %v6186_v9 = vld [vmem:[%s7209_s25 + $0x78] sm:$0xf] }
  0x90   : > { %v2655_v26 = vrot.slane %v2654_v12, 4  ;;  %v2677_v27 = vrot.slane %v2675_v15, 4  ;;  %v2683_v28 = vrot.slane %v2681_v16, 5  ;;  %v2688_v31 = vrot.slane %v2686_v25, 4 }
  0x91   : > { %v2669_v30 = vrot.slane %v2668_v20, 4  ;;  %v2691_v32 = vrot.slane %v2689_v21, 5  ;;  %v2699_v33 = vshrl.u32 %v6178_v11, 16  ;;  %v2697_v37 = vrot.slane %v2695_v19, 5 }
  0x92   : > { %v2660_v35 = vsel %vm7282_vm7, %v2655_v26, %v2659_v5  ;;  %v2678_v36 = vor.u32 %v2677_v27, %v2673_v14  ;;  %v2705_v18 = vshll.u32 %v6179_v23, 16  ;;  %v2710_v46 = vshrl.u32 %v6180_v29, 16 }
  0x93   : > { %v6212_v38 = vcombine.low %v2650_v17, %v2660_v35  ;;  %v2674_v39 = vsel %vm7282_vm7, %v2669_v30, %v2673_v14  ;;  %v2692_v40 = vor.u32 %v2691_v32, %v2688_v31  ;;  %v2701_v24 = vrot.slane %v2699_v33, 4  ;;  %v6187_v14 = vld [vmem:[%s7209_s25 + $0x7c] sm:$0xf]  ;;  %v6189_v30 = vld [vmem:[%s7209_s25 + $0x84] sm:$0xf] }
  0x94   : > { %6849 = vmatmul.mubr.msk.bf16.gmra.mxu1 %vm395_vm1, %v7100_v13  ;;  %v2679_v44 = vrot.slane %v2678_v36, 4  ;;  %v2707_v45 = vrot.slane %v2705_v18, 5  ;;  %v2713_v47 = vshll.u32 %v6180_v29, 16  ;;  %v2719_v51 = vshll.u32 %v6181_v34, 16  ;;  %v7639_v31 = vld [vmem:[%s8979_s1 + $0x1c] sm:$0xf] }
  0x95   : > { %6882 = vmatprep.mubr.msk.bf16.mxu0 %vm395_vm1, %v6212_v38  ;;  %6852 = vmatprep.mubr.msk.bf16.mxu1 %vm395_vm1, %v7101_v22  ;;  %v2693_v49 = vrot.slane %v2692_v40, 4  ;;  %v2702_v50 = vor.u32 %v2701_v24, %v2697_v37  ;;  %v2723_v52 = vshrl.u32 %v6181_v34, 16  ;;  %v2712_v54 = vrot.slane %v2710_v46, 4  ;;  %v6188_v22 = vld [vmem:[%s7209_s25 + $0x80] sm:$0x1]  ;;  %v7105_v46 = vld [vmem:[%s7209_s25 + $0x84] sm:$0xff]  }
  0x96   : > { %v2684_v53 = vsel %vm7282_vm7, %v2679_v44, %v2683_v28  ;;  %v2715_v57 = vrot.slane %v2713_v47, 5  ;;  %v2729_v59 = vshll.u32 %v6182_v41, 16  ;;  %v2721_v62 = vrot.slane %v2719_v51, 5  ;;  %v6190_v36 = vld [vmem:[%s7209_s25 + $0x88] sm:$0xf]  ;;  %7052 = vmatprep.subr.msk.bf16.mxu1 %vm444_vm0, %v7639_v31 }
  0x97   : > { %v6213_v60 = vcombine.low %v2674_v39, %v2684_v53  ;;  %v2698_v61 = vsel %vm7282_vm7, %v2693_v49, %v2697_v37  ;;  %v2703_v58 = vrot.slane %v2702_v50, 4  ;;  %v2725_v1 = vrot.slane %v2723_v52, 4  ;;  %v7104_v39 = vld [vmem:[%s7209_s25 + $0x78] sm:$0xff]   ;;  %v6191_v24 = vld [vmem:[%s7209_s25 + $0x8c] sm:$0x1] }
  0x98   : > { %v2716_v0 = vor.u32 %v2715_v57, %v2712_v54  ;;  %v2731_v2 = vrot.slane %v2729_v59, 5  ;;  %v2734_v4 = vshrl.u32 %v6183_v43, 16  ;;  %v2737_v7 = vshll.u32 %v6183_v43, 16  ;;  %v6192_v41 = vld [vmem:[%s7209_s25 + $0x90] sm:$0xf] }
  0x99   : > { %6883 = vmatmul.mubr.msk.bf16.gmra.mxu0 %vm395_vm1, %v6213_v60  ;;  %v2708_v5 = vsel %vm7282_vm7, %v2703_v58, %v2707_v45  ;;  %v2743_v56 = vshll.u32 %v6184_v48, 16  ;;  %v2747_v8 = vshrl.u32 %v6184_v48, 16  ;;  %v2726_v12 = vor.u32 %v2725_v1, %v2721_v62  ;;  %v7658_v52 = vld [vmem:[%s8979_s1 + $0x20] sm:$0xf]  ;;  %v6193_v60 = vld [vmem:[%s7209_s25 + $0x94] sm:$0xf] }
  0x9a   : > { %v6214_v10 = vcombine.low %v2698_v61, %v2708_v5  ;;  %v2717_v11 = vrot.slane %v2716_v0, 4  ;;  %v2736_v13 = vrot.slane %v2734_v4, 4  ;;  %v2739_v15 = vrot.slane %v2737_v7, 5  ;;  %7053 = vmatprep.subr.msk.bf16.mxu0 %vm444_vm0, %v7658_v52  ;;  %v6194_v0 = vld [vmem:[%s7209_s25 + $0x98] sm:$0x1] }
  0x9b   : > { %v2745_v16 = vrot.slane %v2743_v56, 5  ;;  %v2749_v17 = vrot.slane %v2747_v8, 4  ;;  %v2753_v20 = vshll.u32 %v6185_v3, 16  ;;  %v2727_v25 = vrot.slane %v2726_v12, 4  ;;  %v6195_v1 = vld [vmem:[%s7209_s25 + $0x9c] sm:$0xf] }
  0x9c   : > { %6886 = vmatprep.mubr.msk.bf16.mxu0 %vm395_vm1, %v6214_v10  ;;  %6853 = vmatmul.mubr.msk.bf16.gmra.mxu1 %vm395_vm1, %v7102_v63  ;;  %v2722_v23 = vsel %vm7282_vm7, %v2717_v11, %v2721_v62  ;;  %v2758_v21 = vshrl.u32 %v6186_v9, 16  ;;  %v2761_v26 = vshll.u32 %v6186_v9, 16  ;;  %v2740_v27 = vor.u32 %v2739_v15, %v2736_v13 }
  0x9d   : > { %6856 = vmatprep.mubr.msk.bf16.mxu1 %vm395_vm1, %v7103_v6  ;;  %v2750_v28 = vor.u32 %v2749_v17, %v2745_v16  ;;  %v2755_v19 = vrot.slane %v2753_v20, 5  ;;  %v2767_v29 = vshll.u32 %v6187_v14, 16  ;;  %v2732_v32 = vsel %vm7282_vm7, %v2727_v25, %v2731_v2  ;;  %v7107_v20 = vld [vmem:[%s7209_s25 + $0x9c] sm:$0xff]  }
  0x9e   : > { %v2760_v33 = vrot.slane %v2758_v21, 4  ;;  %v2763_v34 = vrot.slane %v2761_v26, 5  ;;  %v2771_v35 = vshrl.u32 %v6187_v14, 16  ;;  %v6215_v37 = vcombine.low %v2722_v23, %v2732_v32 }
  0x9f   : > { %v2741_v18 = vrot.slane %v2740_v27, 4  ;;  %v2751_v38 = vrot.slane %v2750_v28, 4  ;;  %v2769_v40 = vrot.slane %v2767_v29, 5  ;;  %v2777_v45 = vshll.u32 %v6188_v22, 16  ;;  %v6196_v22 = vld [vmem:[%s7209_s25 + $0xa0] sm:$0xf] }
  0xa0   : > { %v2764_v43 = vor.u32 %v2763_v34, %v2760_v33  ;;  %v2773_v44 = vrot.slane %v2771_v35, 4  ;;  %v2782_v47 = vshrl.u32 %v6189_v30, 16  ;;  %v2785_v50 = vshll.u32 %v6189_v30, 16  ;;  %v6197_v29 = vld [vmem:[%s7209_s25 + $0xa4] sm:$0x1] }
  0xa1   : > { %6887 = vmatmul.mubr.msk.bf16.gmra.mxu0 %vm395_vm1, %v6215_v37  ;;  %v2746_v48 = vsel %vm7282_vm7, %v2741_v18, %v2745_v16  ;;  %v2756_v49 = vsel %vm7282_vm7, %v2751_v38, %v2755_v19  ;;  %v2791_v51 = vshll.u32 %v6190_v36, 16  ;;  %v2779_v59 = vrot.slane %v2777_v45, 5  ;;  %v7106_v16 = vld [vmem:[%s7209_s25 + $0x90] sm:$0xff]  }
  0xa2   : > { %v6216_v53 = vcombine.low %v2746_v48, %v2756_v49  ;;  %v2765_v54 = vrot.slane %v2764_v43, 4  ;;  %v2774_v57 = vor.u32 %v2773_v44, %v2769_v40  ;;  %v2784_v61 = vrot.slane %v2782_v47, 4  ;;  %v6200_v48 = vld [vmem:[%s7209_s25 + $0xb0] sm:$0x1] }
  0xa3   : > { %v2787_v58 = vrot.slane %v2785_v50, 5  ;;  %v2793_v62 = vrot.slane %v2791_v51, 5  ;;  %v2795_v63 = vshrl.u32 %v6190_v36, 16  ;;  %v2801_v4 = vshll.u32 %v6191_v24, 16  ;;  %v6198_v36 = vld [vmem:[%s7209_s25 + $0xa8] sm:$0xf] }
  0xa4   : > { %6890 = vmatprep.mubr.msk.bf16.mxu0 %vm395_vm1, %v6216_v53  ;;  %6857 = vmatmul.mubr.msk.bf16.gmra.mxu1 %vm395_vm1, %v7104_v39  ;;  %v2770_v2 = vsel %vm7282_vm7, %v2765_v54, %v2769_v40  ;;  %v2775_v3 = vrot.slane %v2774_v57, 4  ;;  %v2806_v5 = vshrl.u32 %v6192_v41, 16  ;;  %v2809_v56 = vshll.u32 %v6192_v41, 16  ;;  %v6199_v40 = vld [vmem:[%s7209_s25 + $0xac] sm:$0xf] }
  0xa5   : > { %6860 = vmatprep.mubr.msk.bf16.mxu1 %vm395_vm1, %v7105_v46  ;;  %v2788_v6 = vor.u32 %v2787_v58, %v2784_v61  ;;  %v2797_v7 = vrot.slane %v2795_v63, 4  ;;  %v2815_v8 = vshll.u32 %v6193_v60, 16  ;;  %v2803_v10 = vrot.slane %v2801_v4, 5  ;;  %v7108_v53 = vld [vmem:[%s7209_s25 + $0xa8] sm:$0xff]   ;;  %v6202_v63 = vld [vmem:[%s7209_s25 + $0xb8] sm:$0xf] }
  0xa6   : > { %v2780_v9 = vsel %vm7282_vm7, %v2775_v3, %v2779_v59  ;;  %v2808_v11 = vrot.slane %v2806_v5, 4  ;;  %v2819_v12 = vshrl.u32 %v6193_v60, 16  ;;  %v2811_v17 = vrot.slane %v2809_v56, 5  ;;  %v6201_v59 = vld [vmem:[%s7209_s25 + $0xb4] sm:$0xf] }
  0xa7   : > { %v6217_v13 = vcombine.low %v2770_v2, %v2780_v9  ;;  %v2789_v14 = vrot.slane %v2788_v6, 4  ;;  %v2798_v15 = vor.u32 %v2797_v7, %v2793_v62  ;;  %v2817_v23 = vrot.slane %v2815_v8, 5  ;;  %v7109_v6 = vld [vmem:[%s7209_s25 + $0xb4] sm:$0xff]   ;;  %v6203_v7 = vld [vmem:[%s7209_s25 + $0xbc] sm:$0x1] }
  0xa8   : > { %v2821_v25 = vrot.slane %v2819_v12, 4  ;;  %v2825_v21 = vshll.u32 %v6194_v0, 16  ;;  %v2830_v26 = vshrl.u32 %v6195_v1, 16  ;;  %v2812_v19 = vor.u32 %v2811_v17, %v2808_v11 }
  0xa9   : > { %6891 = vmatmul.mubr.msk.bf16.gmra.mxu0 %vm395_vm1, %v6217_v13  ;;  %v2794_v27 = vsel %vm7282_vm7, %v2789_v14, %v2793_v62  ;;  %v2799_v28 = vrot.slane %v2798_v15, 4  ;;  %v2833_v30 = vshll.u32 %v6195_v1, 16  ;;  %v2839_v35 = vshll.u32 %v6196_v22, 16  ;;  %v6204_v13 = vld [vmem:[%s7209_s25 + $0xc0] sm:$0xf] }
  0xaa   : > { %v2822_v32 = vor.u32 %v2821_v25, %v2817_v23  ;;  %v2827_v33 = vrot.slane %v2825_v21, 5  ;;  %v2832_v34 = vrot.slane %v2830_v26, 4  ;;  %v2813_v18 = vrot.slane %v2812_v19, 4  ;;  %v6206_v26 = vld [vmem:[%s7209_s25 + $0xc8] sm:$0x1] }
  0xab   : > { %v2804_v37 = vsel %vm7282_vm7, %v2799_v28, %v2803_v10  ;;  %v2835_v38 = vrot.slane %v2833_v30, 5  ;;  %v2843_v39 = vshrl.u32 %v6196_v22, 16  ;;  %v2841_v43 = vrot.slane %v2839_v35, 5  ;;  %v6240_v30 = vld [vmem:[%s7209_s25 + $0xc] sm:$0xe] }
  0xac   : > { %v6218_v24 = vcombine.low %v2794_v27, %v2804_v37  ;;  %6861 = vmatmul.mubr.msk.bf16.gmra.mxu1 %vm395_vm1, %v7106_v16  ;;  %v2823_v41 = vrot.slane %v2822_v32, 4  ;;  %v2849_v44 = vshll.u32 %v6197_v29, 16  ;;  %v2818_v45 = vsel %vm7282_vm7, %v2813_v18, %v2817_v23  ;;  %v6241_v32 = vld [vmem:[%s7209_s25 + $0x10] sm:$0xf]  ;;  %v6242_v37 = vld [vmem:[%s7209_s25 + $0x14] sm:$0x1] }
  0xad   : > { %6864 = vmatprep.mubr.msk.bf16.mxu1 %vm395_vm1, %v7107_v20  ;;  %v2836_v46 = vor.u32 %v2835_v38, %v2832_v34  ;;  %v2845_v47 = vrot.slane %v2843_v39, 4  ;;  %v2854_v49 = vshrl.u32 %v6198_v36, 16  ;;  %v2857_v54 = vshll.u32 %v6198_v36, 16  ;;  %v6205_v20 = vld [vmem:[%s7209_s25 + $0xc4] sm:$0xf] }
  0xae   : > { %6894 = vmatprep.mubr.msk.bf16.mxu0 %vm395_vm1, %v6218_v24  ;;  %v2828_v50 = vsel %vm7282_vm7, %v2823_v41, %v2827_v33  ;;  %v2851_v51 = vrot.slane %v2849_v44, 5  ;;  %v2863_v57 = vshll.u32 %v6199_v40, 16  ;;  %v2867_v2 = vshrl.u32 %v6199_v40, 16  ;;  %v6243_v24 = vld [vmem:[%s7209_s25 + $0x18] sm:$0xe] }
  0xaf   : > { %v6219_v60 = vcombine.low %v2818_v45, %v2828_v50  ;;  %v2837_v61 = vrot.slane %v2836_v46, 4  ;;  %v2846_v58 = vor.u32 %v2845_v47, %v2841_v43  ;;  %v2856_v62 = vrot.slane %v2854_v49, 4  ;;  %v6244_v47 = vld [vmem:[%s7209_s25 + $0x1c] sm:$0xf] }
  0xb0   : > { %v2859_v0 = vrot.slane %v2857_v54, 5  ;;  %v2865_v1 = vrot.slane %v2863_v57, 5  ;;  %v2873_v3 = vshll.u32 %v6200_v48, 16  ;;  %v2878_v56 = vshrl.u32 %v6201_v59, 16  ;;  %v6245_v48 = vld [vmem:[%s7209_s25 + $0x20] sm:$0x1] }
  0xb1   : > { %6895 = vmatmul.mubr.msk.bf16.gmra.mxu0 %vm395_vm1, %v6219_v60  ;;  %v2842_v4 = vsel %vm7282_vm7, %v2837_v61, %v2841_v43  ;;  %v2847_v5 = vrot.slane %v2846_v58, 4  ;;  %v2881_v8 = vshll.u32 %v6201_v59, 16  ;;  %v2869_v10 = vrot.slane %v2867_v2, 4  ;;  %v7110_v43 = vld [vmem:[%s7209_s25 + $0xc0] sm:$0xff]   ;;  %v6247_v58 = vld [vmem:[%s7209_s25 + $0x28] sm:$0xf] }
  0xb2   : > { %v2860_v9 = vor.u32 %v2859_v0, %v2856_v62  ;;  %v2875_v11 = vrot.slane %v2873_v3, 5  ;;  %v2887_v12 = vshll.u32 %v6202_v63, 16  ;;  %v2880_v15 = vrot.slane %v2878_v56, 4  ;;  %v6246_v54 = vld [vmem:[%s7209_s25 + $0x24] sm:$0xe] }
  0xb3   : > { %v2852_v14 = vsel %vm7282_vm7, %v2847_v5, %v2851_v51  ;;  %v2883_v16 = vrot.slane %v2881_v8, 5  ;;  %v2891_v17 = vshrl.u32 %v6202_v63, 16  ;;  %v2870_v25 = vor.u32 %v2869_v10, %v2865_v1  ;;  %v6248_v2 = vld [vmem:[%s7209_s25 + $0x2c] sm:$0x1]  ;;  %v6249_v3 = vld [vmem:[%s7209_s25 + $0x30] sm:$0xe] }
  0xb4   : > { %v6220_v22 = vcombine.low %v2842_v4, %v2852_v14  ;;  %6865 = vmatmul.mubr.msk.bf16.gmra.mxu1 %vm395_vm1, %v7108_v53  ;;  %v2861_v23 = vrot.slane %v2860_v9, 4  ;;  %v2889_v21 = vrot.slane %v2887_v12, 5  ;;  %v2897_v19 = vshll.u32 %v6203_v7, 16  ;;  %v6251_v12 = vld [vmem:[%s7209_s25 + $0x38] sm:$0x1] }
  0xb5   : > { %6868 = vmatprep.mubr.msk.bf16.mxu1 %vm395_vm1, %v7109_v6  ;;  %v2884_v27 = vor.u32 %v2883_v16, %v2880_v15  ;;  %v2893_v28 = vrot.slane %v2891_v17, 4  ;;  %v2902_v29 = vshrl.u32 %v6204_v13, 16  ;;  %v2871_v34 = vrot.slane %v2870_v25, 4  ;;  %v7111_v16 = vld [vmem:[%s7209_s25 + $0x18] sm:$0xff]  }
  0xb6   : > { %6898 = vmatprep.mubr.msk.bf16.mxu0 %vm395_vm1, %v6220_v22  ;;  %v2866_v33 = vsel %vm7282_vm7, %v2861_v23, %v2865_v1  ;;  %v2905_v35 = vshll.u32 %v6204_v13, 16  ;;  %v2911_v36 = vshll.u32 %v6205_v20, 16  ;;  %v2899_v39 = vrot.slane %v2897_v19, 5  ;;  %v6252_v13 = vld [vmem:[%s7209_s25 + $0x3c] sm:$0xe] }
  0xb7   : > { %v2885_v18 = vrot.slane %v2884_v27, 4  ;;  %v2894_v38 = vor.u32 %v2893_v28, %v2889_v21  ;;  %v2904_v40 = vrot.slane %v2902_v29, 4  ;;  %v2876_v41 = vsel %vm7282_vm7, %v2871_v34, %v2875_v11  ;;  %v6250_v11 = vld [vmem:[%s7209_s25 + $0x34] sm:$0xf]  ;;  %v6253_v22 = vld [vmem:[%s7209_s25 + $0x40] sm:$0xf] }
  0xb8   : > { %v2907_v44 = vrot.slane %v2905_v35, 5  ;;  %v2913_v45 = vrot.slane %v2911_v36, 5  ;;  %v2915_v46 = vshrl.u32 %v6205_v20, 16  ;;  %v6221_v49 = vcombine.low %v2866_v33, %v2876_v41  ;;  %v6254_v23 = vld [vmem:[%s7209_s25 + $0x44] sm:$0x1] }
  0xb9   : > { %v2890_v50 = vsel %vm7282_vm7, %v2885_v18, %v2889_v21  ;;  %v2895_v51 = vrot.slane %v2894_v38, 4  ;;  %v2921_v53 = vshll.u32 %v6206_v26, 16  ;;  %v6288_v60 = vrot.slane %v6240_v30, 9  ;;  %v6256_v28 = vld [vmem:[%s7209_s25 + $0x4c] sm:$0xf] }
  0xba   : > { %v2908_v57 = vor.u32 %v2907_v44, %v2904_v40  ;;  %v2917_v59 = vrot.slane %v2915_v46, 4  ;;  %v3381_v61 = vrot.slane %v6241_v32, 5  ;;  %6899 = vmatmul.mubr.msk.bf16.gmra.mxu0 %vm395_vm1, %v6221_v49  ;;  %v3384_v0 = vrot.slane %v6242_v37, 5  ;;  %v6257_v32 = vld [vmem:[%s7209_s25 + $0x50] sm:$0x1] }
  0xbb   : > { %v2900_v62 = vsel %vm7282_vm7, %v2895_v51, %v2899_v39  ;;  %v2923_v63 = vrot.slane %v2921_v53, 5  ;;  %v6289_v1 = vrot.slane %v6243_v24, 9  ;;  %v3388_v8 = vrot.slane %v6244_v47, 5  ;;  %v6258_v37 = vld [vmem:[%s7209_s25 + $0x54] sm:$0xe] }
  0xbc   : > { %v6222_v4 = vcombine.low %v2890_v50, %v2900_v62  ;;  %6869 = vmatmul.mubr.msk.bf16.gmra.mxu1 %vm395_vm1, %v7110_v43  ;;  %v2909_v5 = vrot.slane %v2908_v57, 4  ;;  %v2918_v6 = vor.u32 %v2917_v59, %v2913_v45  ;;  %v3382_v7 = vsel %vm7268_vm6, %v6288_v60, %v3381_v61  ;;  %v6259_v18 = vld [vmem:[%s7209_s25 + $0x58] sm:$0xf]  ;;  %v6260_v41 = vld [vmem:[%s7209_s25 + $0x5c] sm:$0x1]  ;;  %v7112_v59 = vld [vmem:[%s7209_s25 + $0x24] sm:$0xff]  }
  0xbd   : > { %v3383_v56 = vrot.slane %v3381_v61, 4  ;;  %v3391_v9 = vrot.slane %v6245_v48, 5  ;;  %v4806_v10 = vsel %vm444_vm0, %v7639_v31, 0  ;;  %v7741_v17 = vsel %vm444_vm0, %v7658_v52, 0  ;;  %v6255_v31 = vld [vmem:[%s7209_s25 + $0x48] sm:$0xe] }
  0xbe   : > { %6902 = vmatprep.mubr.msk.bf16.mxu0 %vm395_vm1, %v6222_v4  ;;  %v2914_v14 = vsel %vm7282_vm7, %v2909_v5, %v2913_v45  ;;  %v2919_v15 = vrot.slane %v2918_v6, 4  ;;  %v6290_v20 = vrot.slane %v6246_v54, 9  ;;  %v3389_v21 = vsel %vm7268_vm6, %v6289_v1, %v3388_v8  ;;  %v6261_v43 = vld [vmem:[%s7209_s25 + $0x60] sm:$0xe]  ;;  %v6262_v53 = vld [vmem:[%s7209_s25 + $0x64] sm:$0xf] }
  0xbf   : > { %v3385_v25 = vsel %vm7268_vm6, %v3383_v56, %v3384_v0  ;;  %v3390_v26 = vrot.slane %v3388_v8, 4  ;;  %v3395_v27 = vrot.slane %v6247_v58, 5  ;;  %v3398_v29 = vrot.slane %v6248_v2, 5  ;;  %v6263_v54 = vld [vmem:[%s7209_s25 + $0x68] sm:$0x1] }
  0xc0   : > { %v2924_v19 = vsel %vm7282_vm7, %v2919_v15, %v2923_v63  ;;  %v6305_v52 = vcombine.low %v3382_v7, %v3385_v25  ;;  %v6291_v30 = vrot.slane %v6249_v3, 9  ;;  %v3402_v39 = vrot.slane %v6250_v11, 5  ;;  %v6264_v57 = vld [vmem:[%s7209_s25 + $0x6c] sm:$0xe]  ;;  %v6265_v63 = vld [vmem:[%s7209_s25 + $0x70] sm:$0xf] }
  0xc1   : > { %v6223_v33 = vcombine.low %v2914_v14, %v2924_v19  ;;  %v3392_v34 = vsel %vm7268_vm6, %v3390_v26, %v3391_v9  ;;  %v3396_v35 = vsel %vm7268_vm6, %v6290_v20, %v3395_v27  ;;  %v3397_v36 = vrot.slane %v3395_v27, 4  ;;  %v6266_v0 = vld [vmem:[%s7209_s25 + $0x74] sm:$0x1]  ;;  %v6267_v1 = vld [vmem:[%s7209_s25 + $0x78] sm:$0xe] }
  0xc2   : > { %6908 = vmatprep.mubr.msk.bf16.mxu1 %vm395_vm1, %v6305_v52  ;;  %v6306_v38 = vcombine.low %v3389_v21, %v3392_v34  ;;  %v3405_v40 = vrot.slane %v6251_v12, 5  ;;  %v6292_v24 = vrot.slane %v6252_v13, 9  ;;  %v3409_v45 = vrot.slane %v6253_v22, 5  ;;  %v6268_v6 = vld [vmem:[%s7209_s25 + $0x7c] sm:$0xf]  ;;  %v7113_v12 = vld [vmem:[%s7209_s25 + $0x30] sm:$0xff]  }
  0xc3   : > { %6903 = vmatmul.mubr.msk.bf16.gmra.mxu0 %vm395_vm1, %v6223_v33  ;;  %v3399_v44 = vsel %vm7268_vm6, %v3397_v36, %v3398_v29  ;;  %v3412_v46 = vrot.slane %v6254_v23, 5  ;;  %v6293_v47 = vrot.slane %v6255_v31, 9  ;;  %v7770_v49 = vsel %vm7268_vm6, %v6291_v30, %v3402_v39  ;;  %v6270_v11 = vld [vmem:[%s7209_s25 + $0x84] sm:$0xe]  ;;  %v6271_v20 = vld [vmem:[%s7209_s25 + $0x88] sm:$0xf] }
  0xc4   : > { %6942 = vmatprep.mubr.msk.bf16.mxu0 %vm395_vm1, %v7111_v16  ;;  %6909 = vmatmul.mubr.msk.bf16.vlgmr.msra.gmra.mxu1 %vm395_vm1, %v6306_v38  ;;  %v6307_v48 = vcombine.low %v3396_v35, %v3399_v44  ;;  %v3404_v50 = vrot.slane %v3402_v39, 4  ;;  %v3416_v51 = vrot.slane %v6256_v28, 5  ;;  %v3410_v60 = vsel %vm7268_vm6, %v6292_v24, %v3409_v45  ;;  %v6272_v21 = vld [vmem:[%s7209_s25 + $0x8c] sm:$0x1]  ;;  %v6273_v52 = vld [vmem:[%s7209_s25 + $0x90] sm:$0xe] }
  0xc5   : > { %6975 = vmatpush3.bf16.msra.mxu1 %v4806_v10  ;;  %v3411_v61 = vrot.slane %v3409_v45, 4  ;;  %v3419_v58 = vrot.slane %v6257_v32, 5  ;;  %v6294_v62 = vrot.slane %v6258_v37, 9  ;;  %v3423_v5 = vrot.slane %v6259_v18, 5  ;;  %v6269_v10 = vld [vmem:[%s7209_s25 + $0x80] sm:$0x1] }
  0xc6   : > { %6912 = vmatprep.mubr.msk.bf16.mxu1 %vm395_vm1, %v6307_v48  ;;  %v3406_v2 = vsel %vm7268_vm6, %v3404_v50, %v3405_v40  ;;  %v7786_v3 = vsel %vm7268_vm6, %v6293_v47, %v3416_v51  ;;  %v3418_v4 = vrot.slane %v3416_v51, 4  ;;  %v3426_v8 = vrot.slane %v6260_v41, 5  ;;  %v6274_v35 = vld [vmem:[%s7209_s25 + $0x94] sm:$0xf]  ;;  %v7823_v36 = vld [vmem:[%s7209_s25 + $0x98] sm:$0x1] }
  0xc7   : > { %v6308_v7 = vcombine.low %v7770_v49, %v3406_v2  ;;  %v3413_v56 = vsel %vm7268_vm6, %v3411_v61, %v3412_v46  ;;  %v6295_v9 = vrot.slane %v6261_v43, 9  ;;  %v7801_v15 = vsel %vm7268_vm6, %v6294_v62, %v3423_v5  ;;  %v6276_v37 = vld [vmem:[%s7209_s25 + $0x9c] sm:$0xe]  ;;  %v6277_v41 = vld [vmem:[%s7209_s25 + $0xa0] sm:$0xf] }
  0xc8   : > { %v6309_v13 = vcombine.low %v3410_v60, %v3413_v56  ;;  %v7797_v14 = vsel %vm7268_vm6, %v3418_v4, %v3419_v58  ;;  %v3425_v16 = vrot.slane %v3423_v5, 4  ;;  %v3430_v23 = vrot.slane %v6262_v53, 5  ;;  %v6278_v43 = vld [vmem:[%s7209_s25 + $0xa4] sm:$0x1]  ;;  %v6279_v44 = vld [vmem:[%s7209_s25 + $0xa8] sm:$0xe] }
  0xc9   : > { %v6310_v22 = vcombine.low %v7786_v3, %v7797_v14  ;;  %v3433_v31 = vrot.slane %v6263_v54, 5  ;;  %v6296_v25 = vrot.slane %v6264_v57, 9  ;;  %v3437_v27 = vrot.slane %v6265_v63, 5  ;;  %v6280_v49 = vld [vmem:[%s7209_s25 + $0xac] sm:$0xf]  ;;  %v7114_v61 = vld [vmem:[%s7209_s25 + $0x3c] sm:$0xff]  }
  0xca   : > { %v7809_v26 = vsel %vm7268_vm6, %v3425_v16, %v3426_v8  ;;  %v3440_v28 = vrot.slane %v6266_v0, 5  ;;  %v6297_v19 = vrot.slane %v6267_v1, 9  ;;  %v7817_v30 = vsel %vm7268_vm6, %v6295_v9, %v3430_v23  ;;  %v6282_v60 = vld [vmem:[%s7209_s25 + $0xb4] sm:$0xe]  ;;  %v6283_v2 = vld [vmem:[%s7209_s25 + $0xb8] sm:$0xf] }
  0xcb   : > { %6943 = vmatmul.mubr.msk.bf16.vlgmr.msra.gmra.mxu0 %vm395_vm1, %v7112_v59  ;;  %v6311_v29 = vcombine.low %v7801_v15, %v7809_v26  ;;  %v3432_v32 = vrot.slane %v3430_v23, 4  ;;  %v3444_v34 = vrot.slane %v6268_v6, 5  ;;  %v7830_v18 = vsel %vm7268_vm6, %v6296_v25, %v3437_v27  ;;  %v6281_v59 = vld [vmem:[%s7209_s25 + $0xb0] sm:$0x1]  ;;  %v7115_v4 = vld [vmem:[%s7209_s25 + $0x48] sm:$0xff]   ;;  %v7116_v26 = vld [vmem:[%s7209_s25 + $0x54] sm:$0xff]  }
  0xcc   : > { %7009 = vmatpush3.bf16.msra.mxu0 %v7741_v17  ;;  %6946 = vmatprep.mubr.msk.bf16.mxu0 %vm395_vm1, %v7113_v12  ;;  %v3439_v38 = vrot.slane %v3437_v27, 4  ;;  %v3447_v40 = vrot.slane %v6269_v10, 5  ;;  %v6298_v24 = vrot.slane %v6270_v11, 9  ;;  %v3451_v48 = vrot.slane %v6271_v20, 5  ;;  %v6284_v9 = vld [vmem:[%s7209_s25 + $0xbc] sm:$0x1] }
  0xcd   : > { %6913 = vmatmul.mubr.msk.bf16.gmra.mxu1 %vm395_vm1, %v6308_v7  ;;  %v7840_v17 = vsel %vm7268_vm6, %v3432_v32, %v3433_v31  ;;  %v7844_v45 = vsel %vm7268_vm6, %v6297_v19, %v3444_v34  ;;  %v3446_v46 = vrot.slane %v3444_v34, 4  ;;  %v3454_v54 = vrot.slane %v6272_v21, 5  ;;  %v6285_v20 = vld [vmem:[%s7209_s25 + $0xc0] sm:$0xe]  ;;  %v6483_v15 = vld [vmem:[%s7209_s25 + $0x18] sm:$0xe] }
  0xce   : > { %6916 = vmatprep.mubr.msk.bf16.mxu1 %vm395_vm1, %v6309_v13  ;;  %v6312_v50 = vcombine.low %v7817_v30, %v7840_v17  ;;  %v7854_v51 = vsel %vm7268_vm6, %v3439_v38, %v3440_v28  ;;  %v6299_v57 = vrot.slane %v6273_v52, 9  ;;  %v7871_v0 = vsel %vm7268_vm6, %v6298_v24, %v3451_v48  ;;  %v6286_v28 = vld [vmem:[%s7209_s25 + $0xc4] sm:$0xf]  ;;  %v6407_v14 = vld [vmem:[%s7209_s25 + $0x2c] sm:$0x1] }
  0xcf   : > { %v6313_v58 = vcombine.low %v7830_v18, %v7854_v51  ;;  %v7865_v62 = vsel %vm7268_vm6, %v3446_v46, %v3447_v40  ;;  %v3453_v1 = vrot.slane %v3451_v48, 4  ;;  %v3458_v7 = vrot.slane %v6274_v35, 5  ;;  %v6408_v51 = vld [vmem:[%s7209_s25 + $0x30] sm:$0xf] }
  0xd0   : > { %v3461_v56 = vrot.slane %v7823_v36, 5  ;;  %v6300_v8 = vrot.slane %v6276_v37, 9  ;;  %v3465_v12 = vrot.slane %v6277_v41, 5  ;;  %v3468_v13 = vrot.slane %v6278_v43, 5  ;;  %v6287_v41 = vld [vmem:[%s7209_s25 + $0xc8] sm:$0x1] }
  0xd1   : > { %v7885_v11 = vsel %vm7268_vm6, %v3453_v1, %v3454_v54  ;;  %v6301_v16 = vrot.slane %v6279_v44, 9  ;;  %v7894_v25 = vsel %vm7268_vm6, %v6299_v57, %v3458_v7  ;;  %v3460_v21 = vrot.slane %v3458_v7, 4  ;;  %v6402_v43 = vld [vmem:[%s7209_s25 + $0x18] sm:$0xf]  ;;  %v6403_v57 = vld [vmem:[%s7209_s25 + $0x1c] sm:$0xf] }
  0xd2   : > { %v3472_v27 = vrot.slane %v6280_v49, 5  ;;  %v7902_v52 = vsel %vm7268_vm6, %v6300_v8, %v3465_v12  ;;  %v3467_v32 = vrot.slane %v3465_v12, 4  ;;  %v3475_v34 = vrot.slane %v6281_v59, 5  ;;  %v7117_v8 = vld [vmem:[%s7209_s25 + $0x60] sm:$0xff]  }
  0xd3   : > { %6947 = vmatmul.mubr.msk.bf16.gmra.mxu0 %vm395_vm1, %v7114_v61  ;;  %v6302_v35 = vrot.slane %v6282_v60, 9  ;;  %v7909_v37 = vsel %vm7268_vm6, %v3460_v21, %v3461_v56  ;;  %v3479_v24 = vrot.slane %v6283_v2, 5  ;;  %v3482_v49 = vrot.slane %v6284_v9, 5  ;;  %v6404_v61 = vld [vmem:[%s7209_s25 + $0x20] sm:$0x1] }
  0xd4   : > { %v7819_v33 = vpop.f32.mrf.mxu0  ;;  %6950 = vmatprep.mubr.msk.bf16.mxu0 %vm395_vm1, %v7115_v4  ;;  %v7913_v38 = vsel %vm7268_vm6, %v6301_v16, %v3472_v27  ;;  %v3474_v40 = vrot.slane %v3472_v27, 4  ;;  %v7927_v48 = vsel %vm7268_vm6, %v3467_v32, %v3468_v13  ;;  %v6303_v54 = vrot.slane %v6285_v20, 9  ;;  %v6484_v56 = vld [vmem:[%s7209_s25 + $0x1c] sm:$0xf]  ;;  %v6485_v21 = vld [vmem:[%s7209_s25 + $0x20] sm:$0x1] }
  0xd5   : > { %v7832_v39 = vpop.f32.mrf.mxu1  ;;  %6917 = vmatmul.mubr.msk.bf16.gmra.mxu1 %vm395_vm1, %v6310_v22  ;;  %v7944_v59 = vsel %vm7268_vm6, %v6302_v35, %v3479_v24  ;;  %v3481_v60 = vrot.slane %v3479_v24, 4  ;;  %v3486_v2 = vrot.slane %v6286_v28, 5  ;;  %v3489_v4 = vrot.slane %v6287_v41, 5 }
  0xd6   : > { %v7846_v47 = vpop.f32.mrf.mxu0  ;;  %6920 = vmatprep.mubr.msk.bf16.mxu1 %vm395_vm1, %v6311_v29  ;;  %v7940_v22 = vsel %vm7268_vm6, %v3474_v40, %v3475_v34  ;;  %v4324_v7 = vshrl.u32 %v6402_v43, 16  ;;  %v4327_v13 = vshll.u32 %v6402_v43, 16  ;;  %v4333_v16 = vshll.u32 %v6403_v57, 16 }
  0xd7   : > { %v7856_v53 = vpop.f32.mrf.mxu1  ;;  %v7959_v12 = vsel %vm7268_vm6, %v3481_v60, %v3482_v49  ;;  %v4337_v20 = vshrl.u32 %v6403_v57, 16  ;;  %v7968_v32 = vsel %vm7268_vm6, %v6303_v54, %v3486_v2  ;;  %v3488_v34 = vrot.slane %v3486_v2, 4  ;;  %v6405_v57 = vld [vmem:[%s7209_s25 + $0x24] sm:$0xf] }
  0xd8   : > { %v7867_v63 = vpop.f32.mrf.mxu0  ;;  %v4326_v35 = vrot.slane %v4324_v7, 4  ;;  %v4329_v24 = vrot.slane %v4327_v13, 5  ;;  %v4335_v41 = vrot.slane %v4333_v16, 5  ;;  %v4343_v49 = vshll.u32 %v6404_v61, 16  ;;  %v6406_v7 = vld [vmem:[%s7209_s25 + $0x28] sm:$0xf] }
  0xd9   : > { %v7877_v6 = vpop.f32.mrf.mxu1  ;;  %v4339_v43 = vrot.slane %v4337_v20, 4  ;;  %v7978_v28 = vsel %vm7268_vm6, %v3488_v34, %v3489_v4  ;;  %v6531_v54 = vrot.slane %v6483_v15, 9  ;;  %v5163_v29 = vrot.slane %v6484_v56, 5  ;;  %v6486_v34 = vld [vmem:[%s7209_s25 + $0x24] sm:$0xe] }
  0xda   : > { %v7881_v10 = vpop.f32.mrf.mxu0  ;;  %v5166_v2 = vrot.slane %v6485_v21, 5  ;;  %v4345_v20 = vrot.slane %v4343_v49, 5  ;;  %v4351_v21 = vshll.u32 %v6405_v57, 16  ;;  %v6488_v49 = vld [vmem:[%s7209_s25 + $0x2c] sm:$0x1]  ;;  %v4367_v18 = vshll.u32 %v6407_v14, 16 }
  0xdb   : > { %v7888_v23 = vpop.f32.mrf.mxu1  ;;  %6951 = vmatmul.mubr.msk.bf16.gmra.mxu0 %vm395_vm1, %v7116_v26  ;;  %v4330_v26 = vor.u32 %v4329_v24, %v4326_v35  ;;  %v4340_v16 = vor.u32 %v4339_v43, %v4335_v41  ;;  %v7995_v4 = vsel %vm7268_vm6, %v6531_v54, %v5163_v29  ;;  %v5165_v56 = vrot.slane %v5163_v29, 4  ;;  %v6487_v35 = vld [vmem:[%s7209_s25 + $0x28] sm:$0xf]  ;;  %v7118_v29 = vld [vmem:[%s7209_s25 + $0x6c] sm:$0xff]  }
  0xdc   : > { %8986 = vst [vmem:[#allocation3_spill] sm:$0xff] %v7888_v23  ;;  %v7898_v19 = vpop.f32.mrf.mxu0  ;;  %6954 = vmatprep.mubr.msk.bf16.mxu0 %vm395_vm1, %v7117_v8  ;;  %v4348_v8 = vshrl.u32 %v6405_v57, 16  ;;  %v4357_v24 = vshll.u32 %v6406_v7, 16  ;;  %v4361_v43 = vshrl.u32 %v6406_v7, 16  ;;  %v4353_v44 = vrot.slane %v4351_v21, 5 }
  0xdd   : > { %v7905_v36 = vpop.f32.mrf.mxu1  ;;  %6921 = vmatmul.mubr.msk.bf16.gmra.mxu1 %vm395_vm1, %v6312_v50  ;;  %v4331_v17 = vrot.slane %v4330_v26, 4  ;;  %v4341_v50 = vrot.slane %v4340_v16, 4  ;;  %v8011_v57 = vsel %vm7268_vm6, %v5165_v56, %v5166_v2  ;;  %v6409_v2 = vld [vmem:[%s7209_s25 + $0x34] sm:$0xf] }
  0xde   : > { %8987 = vst [vmem:[#allocation4_spill] sm:$0xff] %v7905_v36  ;;  %v7923_v46 = vpop.f32.mrf.mxu0  ;;  %6924 = vmatprep.mubr.msk.bf16.mxu1 %vm395_vm1, %v6313_v58  ;;  %v4350_v61 = vrot.slane %v4348_v8, 4  ;;  %v7119_v58 = vld [vmem:[%s7209_s25 + $0x78] sm:$0xff]   ;;  %v4359_v5 = vrot.slane %v4357_v24, 5  ;;  %v4363_v21 = vrot.slane %v4361_v43, 4 }
  0xdf   : > { %v7934_v3 = vpop.f32.mrf.mxu1  ;;  %v4336_v26 = vsel %vm7282_vm7, %v4331_v17, %v4335_v41  ;;  %v4346_v7 = vsel %vm7282_vm7, %v4341_v50, %v4345_v20  ;;  %v5170_v41 = vrot.slane %v6487_v35, 5  ;;  %v5173_v17 = vrot.slane %v6488_v49, 5  ;;  %v6410_v20 = vld [vmem:[%s7209_s25 + $0x38] sm:$0x1] }
  0xe0   : > { %8988 = vst [vmem:[#allocation5_spill] sm:$0xff] %v7934_v3  ;;  %v7949_v1 = vpop.f32.mrf.mxu0  ;;  %v8026_v8 = vcombine.low %v4336_v26, %v4346_v7  ;;  %v4354_v14 = vor.u32 %v4353_v44, %v4350_v61  ;;  %v4372_v50 = vshrl.u32 %v6408_v51, 16  ;;  %v4375_v26 = vshll.u32 %v6408_v51, 16  ;;  %v6489_v44 = vld [vmem:[%s7209_s25 + $0x30] sm:$0xe] }
  0xe1   : > { %v7955_v9 = vpop.f32.mrf.mxu1  ;;  %v4381_v7 = vshll.u32 %v6409_v2, 16  ;;  %v5172_v35 = vrot.slane %v5170_v41, 4  ;;  %v4385_v49 = vshrl.u32 %v6409_v2, 16  ;;  %v8997_v2 = vcombine.low %v7871_v0, %v7885_v11 }
  0xe2   : > { %8989 = vst [vmem:[#allocation6_spill] sm:$0xff] %v7955_v9  ;;  %v7962_v27 = vpop.f32.mrf.mxu0  ;;  %v4355_v16 = vrot.slane %v4354_v14, 4  ;;  %v4374_v43 = vrot.slane %v4372_v50, 4 }
  0xe3   : > { %v7970_v40 = vpop.f32.mrf.mxu1  ;;  %6955 = vmatmul.mubr.msk.bf16.gmra.mxu0 %vm395_vm1, %v7118_v29  ;;  %v6490_v29 = vld [vmem:[%s7209_s25 + $0x34] sm:$0xf] }
  0xe4   : > { %8990 = vst [vmem:[#allocation7_spill] sm:$0xff] %v7970_v40  ;;  %v7974_v60 = vpop.f32.mrf.mxu0  ;;  %v4364_v40 = vor.u32 %v4363_v21, %v4359_v5  ;;  %6958 = vmatprep.mubr.msk.bf16.mxu0 %vm395_vm1, %v7119_v58  ;;  %v4360_v58 = vsel %vm7282_vm7, %v4355_v16, %v4359_v5  ;;  %v4377_v21 = vrot.slane %v4375_v26, 5  ;;  %v6533_v5 = vrot.slane %v6489_v44, 9  ;;  %v7120_v16 = vld [vmem:[%s7209_s25 + $0x84] sm:$0xff]  }
  0xe5   : > { %v7982_v13 = vpop.f32.mrf.mxu1 }
  0xe6   : > { %8991 = vst [vmem:[#allocation8_spill] sm:$0xff] %v7982_v13  ;;  %v7991_v15 = vpop.f32.mrf.mxu0  ;;  %v6532_v13 = vrot.slane %v6486_v34, 9  ;;  %v4365_v14 = vrot.slane %v4364_v40, 4  ;;  %v6411_v40 = vld [vmem:[%s7209_s25 + $0x3c] sm:$0xf]  ;;  %v4378_v11 = vor.u32 %v4377_v21, %v4374_v43 }
  0xe7   : > { %v8003_v30 = vpop.f32.mrf.mxu1 }
  0xe8   : > { %8992 = vst [vmem:[#allocation9_spill] sm:$0xff] %v8003_v30  ;;  %v8007_v54 = vpop.f32.mrf.mxu0  ;;  %v4369_v30 = vrot.slane %v4367_v18, 5  ;;  %v8040_v34 = vsel %vm7268_vm6, %v6532_v13, %v5170_v41  ;;  %v8996_v18 = vcombine.low %v7844_v45, %v7865_v62  ;;  %v4383_v13 = vrot.slane %v4381_v7, 5  ;;  %v6491_v41 = vld [vmem:[%s7209_s25 + $0x38] sm:$0x1] }
  0xe9   : > { %v8015_v31 = vpop.f32.mrf.mxu1  ;;  %v8060_v45 = vsel %vm7268_vm6, %v5172_v35, %v5173_v17  ;;  %v4387_v62 = vrot.slane %v4385_v49, 4  ;;  %v5180_v49 = vrot.slane %v6491_v41, 5  ;;  %v4379_v3 = vrot.slane %v4378_v11, 4  ;;  %v6492_v41 = vld [vmem:[%s7209_s25 + $0x3c] sm:$0xe] }
  0xea   : > { %8993 = vst [vmem:[#allocation10_spill] sm:$0xff] %v8015_v31  ;;  %v8024_v56 = vpop.f32.mrf.mxu0  ;;  %6925 = vmatmul.mubr.msk.bf16.gmra.mxu1 %vm395_vm1, %v8996_v18  ;;  %v4391_v18 = vshll.u32 %v6410_v20, 16  ;;  %v4370_v7 = vsel %vm7282_vm7, %v4365_v14, %v4369_v30 }
  0xeb   : > { %v8028_v31 = vpop.f32.mrf.mxu1  ;;  %6928 = vmatprep.mubr.msk.bf16.mxu1 %vm395_vm1, %v8997_v2  ;;  %v5177_v2 = vrot.slane %v6490_v29, 5  ;;  %v8074_v20 = vcombine.low %v4360_v58, %v4370_v7  ;;  %v4388_v44 = vor.u32 %v4387_v62, %v4383_v13  ;;  %v4396_v29 = vshrl.u32 %v6411_v40, 16  ;;  %6959 = vmatmul.mubr.msk.bf16.gmra.mxu0 %vm395_vm1, %v7120_v16 }
  0xec   : > { %8994 = vst [vmem:[#allocation11_spill] sm:$0xff] %v8028_v31  ;;  %v8032_v24 = vpop.f32.mrf.mxu0  ;;  %v4393_v35 = vrot.slane %v4391_v18, 5  ;;  %v6413_v31 = vld [vmem:[%s7209_s25 + $0x44] sm:$0x1]  ;;  %v4399_v58 = vshll.u32 %v6411_v40, 16  ;;  %v4384_v11 = vsel %vm7282_vm7, %v4379_v3, %v4383_v13  ;;  %v6534_v16 = vrot.slane %v6492_v41, 9 }
  0xed   : > { %v8036_v61 = vpop.f32.mrf.mxu1  ;;  %v8081_v30 = vsel %vm7268_vm6, %v6533_v5, %v5177_v2  ;;  %v5179_v43 = vrot.slane %v5177_v2, 4  ;;  %v4389_v21 = vrot.slane %v4388_v44, 4  ;;  %v4398_v2 = vrot.slane %v4396_v29, 4  ;;  %v6414_v13 = vld [vmem:[%s7209_s25 + $0x48] sm:$0xf] }
  0xee   : > { %8995 = vst [vmem:[#allocation12_spill] sm:$0xff] %v8036_v61  ;;  %v8047_v51 = vpop.f32.mrf.mxu0  ;;  %v7121_v61 = vld [vmem:[%s7209_s25 + $0x90] sm:$0xff]   ;;  %v4415_v0 = vshll.u32 %v6413_v31, 16  ;;  %v4401_v44 = vrot.slane %v4399_v58, 5 }
  0xef   : > { %v8056_v50 = vpop.f32.mrf.mxu1  ;;  %v8091_v5 = vsel %vm7268_vm6, %v5179_v43, %v5180_v49  ;;  %6962 = vmatprep.mubr.msk.bf16.mxu0 %vm395_vm1, %v7121_v61  ;;  %v9001_v49 = vcombine.low %v7894_v25, %v7909_v37 }
  0xf0   : > { %8998 = vst [vmem:[#allocation13_spill] sm:$0xff] %v8056_v50  ;;  %v8064_v26 = vpop.f32.mrf.mxu0  ;;  %v6412_v50 = vld [vmem:[%s7209_s25 + $0x40] sm:$0xf]  ;;  %v4417_v29 = vrot.slane %v4415_v0, 5  ;;  %v4420_v0 = vshrl.u32 %v6414_v13, 16 }
  0xf1   : > { %v8072_v17 = vpop.f32.mrf.mxu1  ;;  %v4405_v7 = vshll.u32 %v6412_v50, 16  ;;  %v4409_v62 = vshrl.u32 %v6412_v50, 16  ;;  %v4394_v50 = vsel %vm7282_vm7, %v4389_v21, %v4393_v35  ;;  %v9002_v21 = vcombine.low %v7902_v52, %v7927_v48 }
  0xf2   : > { %8999 = vst [vmem:[#allocation14_spill] sm:$0xff] %v8072_v17  ;;  %v8077_v9 = vpop.f32.mrf.mxu0  ;;  %v6493_v17 = vld [vmem:[%s7209_s25 + $0x40] sm:$0xf]  ;;  %6929 = vmatmul.mubr.msk.bf16.gmra.mxu1 %vm395_vm1, %v9001_v49  ;;  %v8106_v43 = vcombine.low %v4384_v11, %v4394_v50  ;;  %v6415_v50 = vld [vmem:[%s7209_s25 + $0x4c] sm:$0xf] }
  0xf3   : > { %v8083_v14 = vpop.f32.mrf.mxu1  ;;  %v4407_v3 = vrot.slane %v4405_v7, 5  ;;  %v4411_v35 = vrot.slane %v4409_v62, 4  ;;  %6932 = vmatprep.mubr.msk.bf16.mxu1 %vm395_vm1, %v9002_v21  ;;  %v4402_v7 = vor.u32 %v4401_v44, %v4398_v2  ;;  %v5184_v25 = vrot.slane %v6493_v17, 5  ;;  %v7122_v49 = vld [vmem:[%s7209_s25 + $0x9c] sm:$0xff]   ;;  %v7123_v62 = vld [vmem:[%s7209_s25 + $0xa8] sm:$0xff]  }
  0xf4   : > { %9000 = vst [vmem:[#allocation15_spill] sm:$0xff] %v8083_v14  ;;  %v6808_v18 = vpop.f32.mrf.mxu0  ;;  %v6494_v14 = vld [vmem:[%s7209_s25 + $0x44] sm:$0x1]  ;;  %v4422_v44 = vrot.slane %v4420_v0, 4  ;;  %6963 = vmatmul.mubr.msk.bf16.gmra.mxu0 %vm395_vm1, %v7122_v49 }
  0xf5   : > { %v6774_v40 = vpop.f32.mrf.mxu1  ;;  %v5187_v37 = vrot.slane %v6494_v14, 5  ;;  %v4403_v52 = vrot.slane %v4402_v7, 4  ;;  %v8120_v48 = vsel %vm7268_vm6, %v6534_v16, %v5184_v25  ;;  %v5186_v17 = vrot.slane %v5184_v25, 4  ;;  %v6416_v16 = vld [vmem:[%s7209_s25 + $0x50] sm:$0x1]  ;;  %6966 = vmatprep.mubr.msk.bf16.mxu0 %vm395_vm1, %v7123_v62 }
  0xf6   : > { %v1404_v31 = vadd.f32 %v6774_v40, %v7819_v33  ;;  %v1844_v61 = vpop.f32.mrf.mxu0  ;;  %v4412_v40 = vor.u32 %v4411_v35, %v4407_v3  ;;  %v4423_v14 = vshll.u32 %v6414_v13, 16  ;;  %v4429_v13 = vshll.u32 %v6415_v50, 16  ;;  %v6496_v25 = vld [vmem:[%s7209_s25 + $0x4c] sm:$0xf] }
  0xf7   : > { %v1275_v58 = vpop.f32.mrf.mxu1  ;;  %v4408_v35 = vsel %vm7282_vm7, %v4403_v52, %v4407_v3  ;;  %v8129_v21 = vsel %vm7268_vm6, %v5186_v17, %v5187_v37  ;;  %v6497_v37 = vld [vmem:[%s7209_s25 + $0x50] sm:$0x1]  ;;  %v6417_v17 = vld [vmem:[%s7209_s25 + $0x54] sm:$0xf]  ;;  %v4439_v62 = vshll.u32 %v6416_v16, 16 }
  0xf8   : > { %v8113_v36 = vadd.f32 %v6808_v18, %v1404_v31  ;;  %v1402_v33 = vadd.f32 %v1275_v58, %v7846_v47  ;;  %v6809_v11 = vpop.f32.mrf.mxu0  ;;  %v4413_v2 = vrot.slane %v4412_v40, 4  ;;  %v4425_v58 = vrot.slane %v4423_v14, 5 }
  0xf9   : > { %v6775_v23 = vpop.f32.mrf.mxu1  ;;  %v6551_v3 = vcombine.low %v8120_v48, %v8129_v21  ;;  %v4431_v49 = vrot.slane %v4429_v13, 5  ;;  %v4441_v16 = vrot.slane %v4439_v62, 5  ;;  %v6418_v13 = vld [vmem:[%s7209_s25 + $0x58] sm:$0xf] }
  0xfa   : > { %v8122_v41 = vadd.f32 %v1844_v61, %v1402_v33  ;;  %v1405_v18 = vadd.f32 %v6775_v23, %v7867_v63  ;;  %v1847_v47 = vpop.f32.mrf.mxu0  ;;  %v6495_v61 = vld [vmem:[%s7209_s25 + $0x48] sm:$0xe]  ;;  %v4418_v7 = vsel %vm7282_vm7, %v4413_v2, %v4417_v29  ;;  %v4426_v52 = vor.u32 %v4425_v58, %v4422_v44  ;;  %v7124_v58 = vld [vmem:[%s7209_s25 + $0xb4] sm:$0xff]  }
  0xfb   : > { %v1278_v31 = vpop.f32.mrf.mxu1  ;;  %v8144_v0 = vcombine.low %v4408_v35, %v4418_v7  ;;  %v9004_v2 = vcombine.low %v7944_v59, %v7959_v12 }
  0xfc   : > { %v8134_v63 = vadd.f32 %v6809_v11, %v1405_v18  ;;  %v1403_v23 = vadd.f32 %v1278_v31, %v7881_v10  ;;  %v6812_v40 = vpop.f32.mrf.mxu0  ;;  %v4433_v11 = vshrl.u32 %v6415_v50, 16  ;;  %v9003_v10 = vcombine.low %v7913_v38, %v7940_v22  ;;  %6967 = vmatmul.mubr.msk.bf16.gmra.mxu0 %vm395_vm1, %v7124_v58 }
  0xfd   : > { %v6778_v33 = vpop.f32.mrf.mxu1  ;;  %v6535_v18 = vrot.slane %v6495_v61, 9  ;;  %v4427_v31 = vrot.slane %v4426_v52, 4  ;;  %v5191_v38 = vrot.slane %v6496_v25, 5  ;;  %v5194_v22 = vrot.slane %v6497_v37, 5  ;;  %v6419_v52 = vld [vmem:[%s7209_s25 + $0x5c] sm:$0x1] }
  0xfe   : > { %6933 = vmatmul.mubr.msk.bf16.gmra.mxu1 %vm395_vm1, %v9003_v10  ;;  %v8151_v29 = vadd.f32 %v1847_v47, %v1403_v23  ;;  %v1408_v14 = vadd.f32 %v6778_v33, %v7898_v19  ;;  %v1860_v44 = vpop.f32.mrf.mxu0  ;;  %v4435_v35 = vrot.slane %v4433_v11, 4  ;;  %v4444_v61 = vshrl.u32 %v6417_v17, 16  ;;  %v7125_v23 = vld [vmem:[%s7209_s25 + $0xc0] sm:$0xff]  }
  0xff   : > { %6936 = vmatprep.mubr.msk.bf16.mxu1 %vm395_vm1, %v9004_v2  ;;  %v1291_v50 = vpop.f32.mrf.mxu1  ;;  %v4432_v7 = vsel %vm7282_vm7, %v4427_v31, %v4431_v49  ;;  %v8168_v25 = vsel %vm7268_vm6, %v6535_v18, %v5191_v38  ;;  %v5193_v37 = vrot.slane %v5191_v38, 4  ;;  %v4447_v10 = vshll.u32 %v6417_v17, 16  ;;  %v6499_v31 = vld [vmem:[%s7209_s25 + $0x58] sm:$0xf]  ;;  %v6500_v38 = vld [vmem:[%s7209_s25 + $0x5c] sm:$0x1]  ;;  %6970 = vmatprep.mubr.msk.bf16.mxu0 %vm395_vm1, %v7125_v23 }
 0x100   : > { %v8159_v47 = vadd.f32 %v6812_v40, %v1408_v14  ;;  %v1406_v19 = vadd.f32 %v1291_v50, %v7923_v46  ;;  %v6813_v12 = vpop.f32.mrf.mxu0  ;;  %v4436_v33 = vor.u32 %v4435_v35, %v4431_v49  ;;  %v4446_v11 = vrot.slane %v4444_v61, 4  ;;  %v6498_v14 = vld [vmem:[%s7209_s25 + $0x54] sm:$0xe] }
 0x101   : > { %v6779_v59 = vpop.f32.mrf.mxu1  ;;  %v8177_v49 = vsel %vm7268_vm6, %v5193_v37, %v5194_v22  ;;  %v4453_v50 = vshll.u32 %v6418_v13, 16  ;;  %v4457_v18 = vshrl.u32 %v6418_v13, 16  ;;  %v4449_v35 = vrot.slane %v4447_v10, 5 }
 0x102   : > { %v8170_v40 = vadd.f32 %v1860_v44, %v1406_v19  ;;  %v1409_v46 = vadd.f32 %v6779_v59, %v7949_v1  ;;  %v4437_v2 = vrot.slane %v4436_v33, 4  ;;  %v6552_v17 = vcombine.low %v8168_v25, %v8177_v49  ;;  %v6420_v19 = vld [vmem:[%s7209_s25 + $0x60] sm:$0xf]  ;;  %v1863_v22 = vpop.f32.mrf.mxu0 }
 0x103   : > { %v1294_v62 = vpop.f32.mrf.mxu1  ;;  %v4455_v61 = vrot.slane %v4453_v50, 5  ;;  %v4459_v59 = vrot.slane %v4457_v18, 4  ;;  %v4463_v58 = vshll.u32 %v6419_v52, 16  ;;  %v6536_v23 = vrot.slane %v6498_v14, 9 }
 0x104   : > { %v8181_v44 = vadd.f32 %v6813_v12, %v1409_v46  ;;  %v1407_v1 = vadd.f32 %v1294_v62, %v7962_v27  ;;  %v4442_v13 = vsel %vm7282_vm7, %v4437_v2, %v4441_v16  ;;  %v6421_v12 = vld [vmem:[%s7209_s25 + $0x64] sm:$0xf]  ;;  %v9005_v27 = vcombine.low %v7968_v32, %v7978_v28  ;;  %v7126_v2 = vld [vmem:[%s7209_s25 + $0xcc] sm:$0xff]  }
 0x105   : > { %v8198_v37 = vcombine.low %v4432_v7, %v4442_v13  ;;  %v4450_v46 = vor.u32 %v4449_v35, %v4446_v11  ;;  %v4460_v10 = vor.u32 %v4459_v59, %v4455_v61  ;;  %v4465_v16 = vrot.slane %v4463_v58, 5  ;;  %v6501_v59 = vld [vmem:[%s7209_s25 + $0x60] sm:$0xe]  ;;  %6971 = vmatmul.mubr.msk.bf16.gmra.mxu0 %vm395_vm1, %v7126_v2 }
 0x106   : > { %6937 = vmatmul.mubr.msk.bf16.gmra.mxu1 %vm395_vm1, %v9005_v27  ;;  %v8196_v33 = vadd.f32 %v1863_v22, %v1407_v1  ;;  %v5198_v62 = vrot.slane %v6499_v31, 5  ;;  %v5201_v52 = vrot.slane %v6500_v38, 5  ;;  %v4468_v28 = vshrl.u32 %v6420_v19, 16  ;;  %v6782_v1 = vpop.f32.mrf.mxu1  ;;  %v6816_v22 = vpop.f32.mrf.mxu0  ;;  %v6422_v38 = vld [vmem:[%s7209_s25 + $0x68] sm:$0x1] }
 0x107   : > { %6976 = vmatprep.mubr.msk.bf16.mxu1 %vm395_vm1, %v8026_v8  ;;  %v4451_v50 = vrot.slane %v4450_v46, 4  ;;  %v4471_v32 = vshll.u32 %v6420_v19, 16  ;;  %v4477_v18 = vshll.u32 %v6421_v12, 16  ;;  %v4461_v7 = vrot.slane %v4460_v10, 4 }
 0x108   : > { %v8205_v11 = vsel %vm7268_vm6, %v6536_v23, %v5198_v62  ;;  %v5200_v8 = vrot.slane %v5198_v62, 4  ;;  %v4481_v14 = vshrl.u32 %v6421_v12, 16  ;;  %v1412_v31 = vadd.f32 %v6782_v1, %v7974_v60  ;;  %v1307_v46 = vpop.f32.mrf.mxu1  ;;  %v1876_v23 = vpop.f32.mrf.mxu0  ;;  %v6502_v60 = vld [vmem:[%s7209_s25 + $0x64] sm:$0xf]  ;;  %v6503_v62 = vld [vmem:[%s7209_s25 + $0x68] sm:$0x1] }
 0x109   : > { %v4456_v35 = vsel %vm7282_vm7, %v4451_v50, %v4455_v61  ;;  %v4470_v13 = vrot.slane %v4468_v28, 4  ;;  %v4473_v19 = vrot.slane %v4471_v32, 5  ;;  %v4466_v58 = vsel %vm7282_vm7, %v4461_v7, %v4465_v16  ;;  %v6423_v32 = vld [vmem:[%s7209_s25 + $0x6c] sm:$0xf] }
 0x10a   : > { %v8216_v27 = vsel %vm7268_vm6, %v5200_v8, %v5201_v52  ;;  %v4479_v12 = vrot.slane %v4477_v18, 5  ;;  %v4483_v10 = vrot.slane %v4481_v14, 4  ;;  %v8221_v61 = vadd.f32 %v6816_v22, %v1412_v31  ;;  %v6783_v18 = vpop.f32.mrf.mxu1  ;;  %v6817_v1 = vpop.f32.mrf.mxu0 }
 0x10b   : > { %v8223_v50 = vcombine.low %v4456_v35, %v4466_v58  ;;  %v6553_v28 = vcombine.low %v8205_v11, %v8216_v27  ;;  %v1410_v16 = vadd.f32 %v1307_v46, %v7991_v15  ;;  %v9006_v52 = vcombine.low %v7995_v4, %v8011_v57 }
 0x10c   : > { %v4474_v7 = vor.u32 %v4473_v19, %v4470_v13  ;;  %v4484_v2 = vor.u32 %v4483_v10, %v4479_v12  ;;  %v4487_v22 = vshll.u32 %v6422_v38, 16  ;;  %v6537_v8 = vrot.slane %v6501_v59, 9  ;;  %v1310_v57 = vpop.f32.mrf.mxu1  ;;  %v6424_v19 = vld [vmem:[%s7209_s25 + $0x70] sm:$0xf]  ;;  %v1879_v10 = vpop.f32.mrf.mxu0 }
 0x10d   : > { %7010 = vmatprep.mubr.msk.bf16.mxu0 %vm395_vm1, %v9006_v52  ;;  %v8235_v14 = vadd.f32 %v1876_v23, %v1410_v16  ;;  %v1413_v15 = vadd.f32 %v6783_v18, %v8007_v54  ;;  %v5205_v31 = vrot.slane %v6502_v60, 5  ;;  %v5208_v4 = vrot.slane %v6503_v62, 5  ;;  %v6425_v23 = vld [vmem:[%s7209_s25 + $0x74] sm:$0x1]  ;;  %v6505_v18 = vld [vmem:[%s7209_s25 + $0x70] sm:$0xf] }
 0x10e   : > { %6977 = vmatmul.mubr.msk.bf16.vlgmr.msra.gmra.mxu1 %vm395_vm1, %v8074_v20  ;;  %v4475_v35 = vrot.slane %v4474_v7, 4  ;;  %v4485_v13 = vrot.slane %v4484_v2, 4  ;;  %v4489_v38 = vrot.slane %v4487_v22, 5  ;;  %v4492_v59 = vshrl.u32 %v6423_v32, 16 }
 0x10f   : > { %6980 = vmatprep.mubr.msk.bf16.mxu1 %vm395_vm1, %v8106_v43  ;;  %v8241_v20 = vadd.f32 %v6817_v1, %v1413_v15  ;;  %v1411_v58 = vadd.f32 %v1310_v57, %v8024_v56  ;;  %v8246_v54 = vsel %vm7268_vm6, %v6537_v8, %v5205_v31  ;;  %v5207_v46 = vrot.slane %v5205_v31, 4  ;;  %v6504_v43 = vld [vmem:[%s7209_s25 + $0x6c] sm:$0xe]  ;;  %v6506_v56 = vld [vmem:[%s7209_s25 + $0x74] sm:$0x1] }
 0x110   : > { %v4480_v60 = vsel %vm7282_vm7, %v4475_v35, %v4479_v12  ;;  %v4490_v62 = vsel %vm7282_vm7, %v4485_v13, %v4489_v38  ;;  %v4494_v16 = vrot.slane %v4492_v59, 4  ;;  %v4495_v52 = vshll.u32 %v6423_v32, 16  ;;  %v6426_v8 = vld [vmem:[%s7209_s25 + $0x78] sm:$0xf] }
 0x111   : > { %v8256_v1 = vadd.f32 %v1879_v10, %v1411_v58  ;;  %v8258_v7 = vcombine.low %v4480_v60, %v4490_v62  ;;  %v8262_v2 = vsel %vm7268_vm6, %v5207_v46, %v5208_v4  ;;  %v4501_v22 = vshll.u32 %v6424_v19, 16  ;;  %v6427_v58 = vld [vmem:[%s7209_s25 + $0x7c] sm:$0xf]  ;;  %v6786_v46 = vpop.f32.mrf.mxu1  ;;  %v6820_v10 = vpop.f32.mrf.mxu0 }
 0x112   : > { %v6554_v12 = vcombine.low %v8246_v54, %v8262_v2  ;;  %v4497_v15 = vrot.slane %v4495_v52, 5  ;;  %v4505_v31 = vshrl.u32 %v6424_v19, 16  ;;  %v4511_v57 = vshll.u32 %v6425_v23, 16 }
 0x113   : > { %v9007_v32 = vcombine.low %v8040_v34, %v8060_v45  ;;  %v4503_v35 = vrot.slane %v4501_v22, 5  ;;  %v6538_v13 = vrot.slane %v6504_v43, 9  ;;  %v5212_v38 = vrot.slane %v6505_v18, 5  ;;  %v1323_v52 = vpop.f32.mrf.mxu1  ;;  %v1892_v18 = vpop.f32.mrf.mxu0 }
 0x114   : > { %v5215_v59 = vrot.slane %v6506_v56, 5  ;;  %v9008_v4 = vcombine.low %v8081_v30, %v8091_v5  ;;  %v4498_v19 = vor.u32 %v4497_v15, %v4494_v16  ;;  %v4507_v23 = vrot.slane %v4505_v31, 4  ;;  %v6428_v56 = vld [vmem:[%s7209_s25 + $0x80] sm:$0x1] }
 0x115   : > { %7011 = vmatmul.mubr.msk.bf16.vlgmr.msra.gmra.mxu0 %vm395_vm1, %v9007_v32  ;;  %v4513_v60 = vrot.slane %v4511_v57, 5  ;;  %v4516_v62 = vshrl.u32 %v6426_v8, 16  ;;  %v1416_v34 = vadd.f32 %v6786_v46, %v8032_v24  ;;  %v8281_v45 = vsel %vm7268_vm6, %v6538_v13, %v5212_v38  ;;  %v6507_v57 = vld [vmem:[%s7209_s25 + $0x78] sm:$0xe]  ;;  %v6508_v32 = vld [vmem:[%s7209_s25 + $0x7c] sm:$0xf]  ;;  %v6821_v46 = vpop.f32.mrf.mxu0 }
 0x116   : > { %7014 = vmatprep.mubr.msk.bf16.mxu0 %vm395_vm1, %v9008_v4  ;;  %6981 = vmatmul.mubr.msk.bf16.gmra.mxu1 %vm395_vm1, %v8144_v0  ;;  %v5214_v30 = vrot.slane %v5212_v38, 4  ;;  %v4519_v5 = vshll.u32 %v6426_v8, 16  ;;  %v4499_v43 = vrot.slane %v4498_v19, 4  ;;  %v4508_v16 = vor.u32 %v4507_v23, %v4503_v35  ;;  %v6787_v4 = vpop.f32.mrf.mxu1 }
 0x117   : > { %6984 = vmatprep.mubr.msk.bf16.mxu1 %vm395_vm1, %v8198_v37  ;;  %v4518_v22 = vrot.slane %v4516_v62, 4  ;;  %v4525_v0 = vshll.u32 %v6427_v58, 16  ;;  %v8286_v15 = vadd.f32 %v6820_v10, %v1416_v34  ;;  %v1414_v31 = vadd.f32 %v1323_v52, %v8047_v51  ;;  %v6509_v62 = vld [vmem:[%s7209_s25 + $0x80] sm:$0x1] }
 0x118   : > { %v8290_v24 = vsel %vm7268_vm6, %v5214_v30, %v5215_v59  ;;  %v4521_v8 = vrot.slane %v4519_v5, 5  ;;  %v4504_v37 = vsel %vm7282_vm7, %v4499_v43, %v4503_v35  ;;  %v4509_v13 = vrot.slane %v4508_v16, 4  ;;  %v1326_v34 = vpop.f32.mrf.mxu1  ;;  %v6429_v16 = vld [vmem:[%s7209_s25 + $0x84] sm:$0xf] }
 0x119   : > { %v6555_v38 = vcombine.low %v8281_v45, %v8290_v24  ;;  %v4527_v10 = vrot.slane %v4525_v0, 5  ;;  %v8299_v19 = vadd.f32 %v1892_v18, %v1414_v31  ;;  %v1417_v59 = vadd.f32 %v6787_v4, %v8064_v26  ;;  %v6510_v31 = vld [vmem:[%s7209_s25 + $0x84] sm:$0xe]  ;;  %v6512_v4 = vld [vmem:[%s7209_s25 + $0x8c] sm:$0x1] }
 0x11a   : > { %v4522_v51 = vor.u32 %v4521_v8, %v4518_v22  ;;  %v4529_v23 = vshrl.u32 %v6427_v58, 16  ;;  %v4514_v35 = vsel %vm7282_vm7, %v4509_v13, %v4513_v60  ;;  %v4535_v30 = vshll.u32 %v6428_v56, 16  ;;  %v6430_v22 = vld [vmem:[%s7209_s25 + $0x88] sm:$0xf]  ;;  %v6431_v60 = vld [vmem:[%s7209_s25 + $0x8c] sm:$0x1]  ;;  %v1895_v56 = vpop.f32.mrf.mxu0 }
 0x11b   : > { %v6539_v5 = vrot.slane %v6507_v57, 9  ;;  %v5219_v43 = vrot.slane %v6508_v32, 5  ;;  %v6458_v52 = vcombine.low %v4504_v37, %v4514_v35  ;;  %v8310_v26 = vadd.f32 %v6821_v46, %v1417_v59  ;;  %v6511_v8 = vld [vmem:[%s7209_s25 + $0x88] sm:$0xf] }
 0x11c   : > { %v1415_v58 = vadd.f32 %v1326_v34, %v8077_v9  ;;  %v4523_v18 = vrot.slane %v4522_v51, 4  ;;  %v4531_v0 = vrot.slane %v4529_v23, 4  ;;  %v4537_v48 = vrot.slane %v4535_v30, 5  ;;  %v6432_v23 = vld [vmem:[%s7209_s25 + $0x90] sm:$0xf]  ;;  %v6790_v34 = vpop.f32.mrf.mxu1 }
 0x11d   : > { %7015 = vmatmul.mubr.msk.bf16.gmra.mxu0 %vm395_vm1, %v6551_v3  ;;  %v8321_v21 = vsel %vm7268_vm6, %v6539_v5, %v5219_v43  ;;  %v5221_v3 = vrot.slane %v5219_v43, 4  ;;  %v5222_v49 = vrot.slane %v6509_v62, 5  ;;  %v4543_v32 = vshll.u32 %v6429_v16, 16 }
 0x11e   : > { %7018 = vmatprep.mubr.msk.bf16.mxu0 %vm395_vm1, %v6552_v17  ;;  %6985 = vmatmul.mubr.msk.bf16.gmra.mxu1 %vm395_vm1, %v8223_v50  ;;  %v8326_v9 = vadd.f32 %v1895_v56, %v1415_v58  ;;  %v4528_v25 = vsel %vm7282_vm7, %v4523_v18, %v4527_v10  ;;  %v4540_v17 = vshrl.u32 %v6429_v16, 16  ;;  %v4532_v57 = vor.u32 %v4531_v0, %v4527_v10  ;;  %v1339_v56 = vpop.f32.mrf.mxu1 }
 0x11f   : > { %6988 = vmatprep.mubr.msk.bf16.mxu1 %vm395_vm1, %v8258_v7  ;;  %v4549_v37 = vshll.u32 %v6430_v22, 16  ;;  %v4553_v13 = vshrl.u32 %v6430_v22, 16  ;;  %v8336_v50 = vsel %vm7268_vm6, %v5221_v3, %v5222_v49  ;;  %v4559_v59 = vshll.u32 %v6431_v60, 16  ;;  %v6824_v7 = vpop.f32.mrf.mxu0  ;;  %v6433_v3 = vld [vmem:[%s7209_s25 + $0x94] sm:$0xf] }
 0x120   : > { %v4542_v46 = vrot.slane %v4540_v17, 4  ;;  %v6540_v51 = vrot.slane %v6510_v31, 9  ;;  %v4533_v62 = vrot.slane %v4532_v57, 4  ;;  %v6556_v35 = vcombine.low %v8321_v21, %v8336_v50  ;;  %v6791_v27 = vpop.f32.mrf.mxu1  ;;  %v6517_v21 = vld [vmem:[%s7209_s25 + $0xa0] sm:$0xf] }
 0x121   : > { %v4545_v10 = vrot.slane %v4543_v32, 5  ;;  %v4551_v30 = vrot.slane %v4549_v37, 5  ;;  %v1420_v5 = vadd.f32 %v6790_v34, %v7832_v39  ;;  %v4555_v43 = vrot.slane %v4553_v13, 4  ;;  %v1908_v0 = vpop.f32.mrf.mxu0  ;;  %v6434_v13 = vld [vmem:[%s7209_s25 + $0x98] sm:$0x1]  ;;  %v9009_v34 = vld [vmem:[#allocation3_spill] sm:$0xff] }
 0x122   : > { %v4561_v16 = vrot.slane %v4559_v59, 5  ;;  %v5226_v58 = vrot.slane %v6511_v8, 5  ;;  %v4538_v18 = vsel %vm7282_vm7, %v4533_v62, %v4537_v48  ;;  %v5229_v60 = vrot.slane %v6512_v4, 5  ;;  %v6513_v59 = vld [vmem:[%s7209_s25 + $0x90] sm:$0xe] }
 0x123   : > { %v4546_v22 = vor.u32 %v4545_v10, %v4542_v46  ;;  %v4564_v31 = vshrl.u32 %v6432_v23, 16  ;;  %v6459_v49 = vcombine.low %v4528_v25, %v4538_v18  ;;  %v8349_v39 = vadd.f32 %v6824_v7, %v1420_v5  ;;  %v6515_v10 = vld [vmem:[%s7209_s25 + $0x98] sm:$0x1]  ;;  %v6518_v50 = vld [vmem:[%s7209_s25 + $0xa4] sm:$0x1] }
 0x124   : > { %v4556_v17 = vor.u32 %v4555_v43, %v4551_v30  ;;  %v8353_v8 = vsel %vm7268_vm6, %v6540_v51, %v5226_v58  ;;  %v5228_v57 = vrot.slane %v5226_v58, 4  ;;  %v1418_v11 = vadd.f32 %v1339_v56, %v7856_v53 }
 0x125   : > { %7019 = vmatmul.mubr.msk.bf16.gmra.mxu0 %vm395_vm1, %v6553_v28  ;;  %v4547_v48 = vrot.slane %v4546_v22, 4  ;;  %v6825_v28 = vpop.f32.mrf.mxu0  ;;  %v4566_v25 = vrot.slane %v4564_v31, 4  ;;  %v1421_v37 = vadd.f32 %v6791_v27, %v7877_v6  ;;  %v4567_v54 = vshll.u32 %v6432_v23, 16  ;;  %v6514_v6 = vld [vmem:[%s7209_s25 + $0x94] sm:$0xf] }
 0x126   : > { %7022 = vmatprep.mubr.msk.bf16.mxu0 %vm395_vm1, %v6554_v12  ;;  %6989 = vmatmul.mubr.msk.bf16.gmra.mxu1 %vm395_vm1, %v6458_v52  ;;  %v4557_v32 = vrot.slane %v4556_v17, 4  ;;  %v4573_v2 = vshll.u32 %v6433_v3, 16  ;;  %v8368_v12 = vsel %vm7268_vm6, %v5228_v57, %v5229_v60  ;;  %v8370_v4 = vadd.f32 %v1908_v0, %v1418_v11  ;;  %v1342_v52 = vpop.f32.mrf.mxu1 }
 0x127   : > { %6992 = vmatprep.mubr.msk.bf16.mxu1 %vm395_vm1, %v6459_v49  ;;  %v4552_v53 = vsel %vm7282_vm7, %v4547_v48, %v4551_v30  ;;  %v4577_v46 = vshrl.u32 %v6433_v3, 16  ;;  %v6557_v23 = vcombine.low %v8353_v8, %v8368_v12  ;;  %v8378_v62 = vadd.f32 %v6825_v28, %v1421_v37  ;;  %v6435_v30 = vld [vmem:[%s7209_s25 + $0x9c] sm:$0xf]  ;;  %v1911_v43 = vpop.f32.mrf.mxu0  ;;  %v6436_v3 = vld [vmem:[%s7209_s25 + $0xa0] sm:$0xf] }
 0x128   : > { %v4562_v51 = vsel %vm7282_vm7, %v4557_v32, %v4561_v16  ;;  %v1419_v7 = vadd.f32 %v1342_v52, %v9009_v34  ;;  %v4569_v58 = vrot.slane %v4567_v54, 5  ;;  %v4575_v18 = vrot.slane %v4573_v2, 5  ;;  %v6437_v28 = vld [vmem:[%s7209_s25 + $0xa4] sm:$0x1]  ;;  %v6516_v54 = vld [vmem:[%s7209_s25 + $0x9c] sm:$0xe] }
 0x129   : > { %v6460_v5 = vcombine.low %v4552_v53, %v4562_v51  ;;  %v4579_v22 = vrot.slane %v4577_v46, 4  ;;  %v4583_v56 = vshll.u32 %v6434_v13, 16  ;;  %v6541_v0 = vrot.slane %v6513_v59, 9  ;;  %v6794_v13 = vpop.f32.mrf.mxu1  ;;  %v6828_v45 = vpop.f32.mrf.mxu0  ;;  %v9010_v53 = vld [vmem:[#allocation4_spill] sm:$0xff] }
 0x12a   : > { %v8383_v60 = vadd.f32 %v1911_v43, %v1419_v7  ;;  %v5233_v16 = vrot.slane %v6514_v6, 5  ;;  %v4570_v31 = vor.u32 %v4569_v58, %v4566_v25  ;;  %v5236_v17 = vrot.slane %v6515_v10, 5 }
 0x12b   : > { %v4580_v49 = vor.u32 %v4579_v22, %v4575_v18  ;;  %v4588_v48 = vshrl.u32 %v6435_v30, 16  ;;  %v4585_v57 = vrot.slane %v4583_v56, 5  ;;  %v4591_v32 = vshll.u32 %v6435_v30, 16  ;;  %v1355_v7 = vpop.f32.mrf.mxu1  ;;  %v1924_v10 = vpop.f32.mrf.mxu0  ;;  %v6438_v22 = vld [vmem:[%s7209_s25 + $0xa8] sm:$0xf] }
 0x12c   : > { %v5234_v11 = vsel %vm7268_vm6, %v6541_v0, %v5233_v16  ;;  %v5235_v27 = vrot.slane %v5233_v16, 4  ;;  %v4571_v25 = vrot.slane %v4570_v31, 4  ;;  %v1424_v52 = vadd.f32 %v6794_v13, %v9010_v53  ;;  %v6439_v13 = vld [vmem:[%s7209_s25 + $0xac] sm:$0xf]  ;;  %v6440_v53 = vld [vmem:[%s7209_s25 + $0xb0] sm:$0x1] }
 0x12d   : > { %7023 = vmatmul.mubr.msk.bf16.gmra.mxu0 %vm395_vm1, %v6555_v38  ;;  %v4581_v37 = vrot.slane %v4580_v49, 4  ;;  %v4590_v24 = vrot.slane %v4588_v48, 4  ;;  %v4597_v38 = vshll.u32 %v6436_v3, 16  ;;  %v4593_v46 = vrot.slane %v4591_v32, 5  ;;  %v6795_v31 = vpop.f32.mrf.mxu1  ;;  %v9011_v48 = vld [vmem:[#allocation5_spill] sm:$0xff] }
 0x12e   : > { %7026 = vmatprep.mubr.msk.bf16.mxu0 %vm395_vm1, %v6556_v35  ;;  %6993 = vmatmul.mubr.msk.bf16.gmra.mxu1 %vm395_vm1, %v6460_v5  ;;  %v5237_v2 = vsel %vm7268_vm6, %v5235_v27, %v5236_v17  ;;  %v4601_v59 = vshrl.u32 %v6436_v3, 16  ;;  %v4576_v35 = vsel %vm7282_vm7, %v4571_v25, %v4575_v18  ;;  %v8408_v5 = vadd.f32 %v6828_v45, %v1424_v52  ;;  %v6829_v18 = vpop.f32.mrf.mxu0 }
 0x12f   : > { %v4586_v6 = vsel %vm7282_vm7, %v4581_v37, %v4585_v57  ;;  %v6558_v51 = vcombine.low %v5234_v11, %v5237_v2  ;;  %v4599_v34 = vrot.slane %v4597_v38, 5  ;;  %v4594_v43 = vor.u32 %v4593_v46, %v4590_v24  ;;  %v9012_v11 = vld [vmem:[#allocation6_spill] sm:$0xff]  ;;  %v9013_v46 = vld [vmem:[#allocation7_spill] sm:$0xff] }
 0x130   : > { %v6461_v30 = vcombine.low %v4576_v35, %v4586_v6  ;;  %v4603_v58 = vrot.slane %v4601_v59, 4  ;;  %v4607_v56 = vshll.u32 %v6437_v28, 16  ;;  %v6542_v0 = vrot.slane %v6516_v54, 9  ;;  %v1358_v28 = vpop.f32.mrf.mxu1  ;;  %v1927_v12 = vpop.f32.mrf.mxu0 }
 0x131   : > { %v5240_v16 = vrot.slane %v6517_v21, 5  ;;  %v5243_v3 = vrot.slane %v6518_v50, 5  ;;  %v4595_v49 = vrot.slane %v4594_v43, 4  ;;  %v1422_v57 = vadd.f32 %v1355_v7, %v9011_v48  ;;  %v6519_v21 = vld [vmem:[%s7209_s25 + $0xa8] sm:$0xe] }
 0x132   : > { %6996 = vmatprep.mubr.msk.bf16.mxu1 %vm395_vm1, %v6461_v30  ;;  %v4604_v17 = vor.u32 %v4603_v58, %v4599_v34  ;;  %v1425_v27 = vadd.f32 %v6795_v31, %v9012_v11  ;;  %v4609_v32 = vrot.slane %v4607_v56, 5  ;;  %v4612_v45 = vshrl.u32 %v6438_v22, 16  ;;  %v6520_v50 = vld [vmem:[%s7209_s25 + $0xac] sm:$0xf]  ;;  %v6441_v30 = vld [vmem:[%s7209_s25 + $0xb4] sm:$0xf]  ;;  %v6798_v48 = vpop.f32.mrf.mxu1 }
 0x133   : > { %v5241_v25 = vsel %vm7268_vm6, %v6542_v0, %v5240_v16  ;;  %v5242_v37 = vrot.slane %v5240_v16, 4  ;;  %v4600_v24 = vsel %vm7282_vm7, %v4595_v49, %v4599_v34  ;;  %v8423_v54 = vadd.f32 %v1924_v10, %v1422_v57  ;;  %v6521_v10 = vld [vmem:[%s7209_s25 + $0xb0] sm:$0x1]  ;;  %v6442_v31 = vld [vmem:[%s7209_s25 + $0xb8] sm:$0xf]  ;;  %v6832_v57 = vpop.f32.mrf.mxu0 }
 0x134   : > { %v4605_v38 = vrot.slane %v4604_v17, 4  ;;  %v8425_v2 = vadd.f32 %v6829_v18, %v1425_v27  ;;  %v1423_v8 = vadd.f32 %v1358_v28, %v9013_v46  ;;  %v4615_v59 = vshll.u32 %v6438_v22, 16  ;;  %v1371_v46 = vpop.f32.mrf.mxu1 }
 0x135   : > { %7027 = vmatmul.mubr.msk.bf16.gmra.mxu0 %vm395_vm1, %v6557_v23  ;;  %v5244_v52 = vsel %vm7268_vm6, %v5242_v37, %v5243_v3  ;;  %v4614_v23 = vrot.slane %v4612_v45, 4  ;;  %v4621_v34 = vshll.u32 %v6439_v13, 16  ;;  %v4625_v7 = vshrl.u32 %v6439_v13, 16  ;;  %v9014_v37 = vld [vmem:[#allocation8_spill] sm:$0xff]  ;;  %v6443_v13 = vld [vmem:[%s7209_s25 + $0xbc] sm:$0x1] }
 0x136   : > { %7030 = vmatprep.mubr.msk.bf16.mxu0 %vm395_vm1, %v6558_v51  ;;  %v4610_v35 = vsel %vm7282_vm7, %v4605_v38, %v4609_v32  ;;  %v6559_v6 = vcombine.low %v5241_v25, %v5244_v52  ;;  %v8438_v43 = vadd.f32 %v1927_v12, %v1423_v8  ;;  %v4617_v58 = vrot.slane %v4615_v59, 5  ;;  %v6522_v52 = vld [vmem:[%s7209_s25 + $0xb4] sm:$0xe]  ;;  %v1940_v8 = vpop.f32.mrf.mxu0 }
 0x137   : > { %v6462_v51 = vcombine.low %v4600_v24, %v4610_v35  ;;  %v4631_v56 = vshll.u32 %v6440_v53, 16  ;;  %v4623_v0 = vrot.slane %v4621_v34, 5  ;;  %v4627_v16 = vrot.slane %v4625_v7, 4  ;;  %v6524_v35 = vld [vmem:[%s7209_s25 + $0xbc] sm:$0x1] }
 0x138   : > { %v6543_v22 = vrot.slane %v6519_v21, 9  ;;  %v5247_v3 = vrot.slane %v6520_v50, 5  ;;  %v4618_v18 = vor.u32 %v4617_v58, %v4614_v23  ;;  %v5250_v17 = vrot.slane %v6521_v10, 5  ;;  %v6523_v50 = vld [vmem:[%s7209_s25 + $0xb8] sm:$0xf]  ;;  %v6833_v58 = vpop.f32.mrf.mxu0 }
 0x139   : > { %6997 = vmatmul.mubr.msk.bf16.gmra.mxu1 %vm395_vm1, %v6462_v51  ;;  %v4633_v49 = vrot.slane %v4631_v56, 5  ;;  %v4636_v11 = vshrl.u32 %v6441_v30, 16  ;;  %v4628_v27 = vor.u32 %v4627_v16, %v4623_v0  ;;  %v1428_v28 = vadd.f32 %v6798_v48, %v9014_v37  ;;  %v6799_v51 = vpop.f32.mrf.mxu1  ;;  %v6444_v48 = vld [vmem:[%s7209_s25 + $0xc0] sm:$0xf] }
 0x13a   : > { %v5248_v32 = vsel %vm7268_vm6, %v6543_v22, %v5247_v3  ;;  %v5249_v25 = vrot.slane %v5247_v3, 4  ;;  %v4619_v45 = vrot.slane %v4618_v18, 4  ;;  %v4639_v38 = vshll.u32 %v6441_v30, 16 }
 0x13b   : > { %v4638_v24 = vrot.slane %v4636_v11, 4  ;;  %v4645_v53 = vshll.u32 %v6442_v31, 16  ;;  %v4629_v12 = vrot.slane %v4628_v27, 4  ;;  %v8450_v59 = vadd.f32 %v6832_v57, %v1428_v28  ;;  %v9015_v27 = vld [vmem:[#allocation9_spill] sm:$0xff] }
 0x13c   : > { %v5251_v23 = vsel %vm7268_vm6, %v5249_v25, %v5250_v17  ;;  %v4649_v21 = vshrl.u32 %v6442_v31, 16  ;;  %v4624_v34 = vsel %vm7282_vm7, %v4619_v45, %v4623_v0  ;;  %v4641_v10 = vrot.slane %v4639_v38, 5  ;;  %v1374_v0 = vpop.f32.mrf.mxu1  ;;  %v9016_v25 = vld [vmem:[#allocation10_spill] sm:$0xff]  ;;  %v9017_v45 = vld [vmem:[#allocation11_spill] sm:$0xff]  ;;  %v1943_v38 = vpop.f32.mrf.mxu0 }
 0x13d   : > { %7031 = vmatmul.mubr.msk.bf16.gmra.mxu0 %vm395_vm1, %v6559_v6  ;;  %v6560_v7 = vcombine.low %v5248_v32, %v5251_v23  ;;  %v4647_v30 = vrot.slane %v4645_v53, 5  ;;  %v4634_v6 = vsel %vm7282_vm7, %v4629_v12, %v4633_v49  ;;  %v4655_v16 = vshll.u32 %v6443_v13, 16  ;;  %v6445_v53 = vld [vmem:[%s7209_s25 + $0xc4] sm:$0xf] }
 0x13e   : > { %v4651_v56 = vrot.slane %v4649_v21, 4  ;;  %v6544_v22 = vrot.slane %v6522_v52, 9  ;;  %v6463_v3 = vcombine.low %v4624_v34, %v4634_v6  ;;  %v4642_v31 = vor.u32 %v4641_v10, %v4638_v24  ;;  %v6527_v6 = vld [vmem:[%s7209_s25 + $0xc8] sm:$0x1] }
 0x13f   : > { %7034 = vmatprep.mubr.msk.bf16.mxu0 %vm395_vm1, %v6560_v7  ;;  %v5254_v18 = vrot.slane %v6523_v50, 5  ;;  %v5257_v17 = vrot.slane %v6524_v35, 5  ;;  %v4657_v11 = vrot.slane %v4655_v16, 5  ;;  %v1426_v32 = vadd.f32 %v1371_v46, %v9015_v27  ;;  %v6446_v46 = vld [vmem:[%s7209_s25 + $0xc8] sm:$0x1] }
 0x140   : > { %v4652_v57 = vor.u32 %v4651_v56, %v4647_v30  ;;  %v1429_v49 = vadd.f32 %v6799_v51, %v9016_v25  ;;  %7000 = vmatprep.mubr.msk.bf16.mxu1 %vm395_vm1, %v6463_v3  ;;  %v4643_v37 = vrot.slane %v4642_v31, 4  ;;  %v1427_v24 = vadd.f32 %v1374_v0, %v9017_v45  ;;  %v6525_v50 = vld [vmem:[%s7209_s25 + $0xc0] sm:$0xe]  ;;  %v6526_v51 = vld [vmem:[%s7209_s25 + $0xc4] sm:$0xf]  ;;  %v6836_v0 = vpop.f32.mrf.mxu0 }
 0x141   : > { %v5255_v28 = vsel %vm7268_vm6, %v6544_v22, %v5254_v18  ;;  %v5256_v13 = vrot.slane %v5254_v18, 4  ;;  %v8467_v12 = vadd.f32 %v1940_v8, %v1426_v32  ;;  %v4660_v21 = vshrl.u32 %v6444_v48, 16  ;;  %v6802_v18 = vpop.f32.mrf.mxu1  ;;  %v6448_v25 = vld [vmem:[%s7209_s25 + $0xd0] sm:$0xf] }
 0x142   : > { %v4653_v52 = vrot.slane %v4652_v57, 4  ;;  %v8469_v23 = vadd.f32 %v6833_v58, %v1429_v49  ;;  %v4648_v35 = vsel %vm7282_vm7, %v4643_v37, %v4647_v30  ;;  %v8477_v7 = vadd.f32 %v1943_v38, %v1427_v24  ;;  %v6447_v57 = vld [vmem:[%s7209_s25 + $0xcc] sm:$0xf]  ;;  %v1956_v24 = vpop.f32.mrf.mxu0 }
 0x143   : > { %v5258_v34 = vsel %vm7268_vm6, %v5256_v13, %v5257_v17  ;;  %v4663_v10 = vshll.u32 %v6444_v48, 16  ;;  %v4662_v56 = vrot.slane %v4660_v21, 4  ;;  %v4669_v16 = vshll.u32 %v6445_v53, 16  ;;  %v1387_v45 = vpop.f32.mrf.mxu1 }
 0x144   : > { %v4658_v8 = vsel %vm7282_vm7, %v4653_v52, %v4657_v11  ;;  %v6561_v58 = vcombine.low %v5255_v28, %v5258_v34  ;;  %v4673_v31 = vshrl.u32 %v6445_v53, 16  ;;  %v4679_v30 = vshll.u32 %v6446_v46, 16  ;;  %v9018_v28 = vld [vmem:[#allocation12_spill] sm:$0xff]  ;;  %v6449_v52 = vld [vmem:[%s7209_s25 + $0xd4] sm:$0x1] }
 0x145   : > { %v6464_v22 = vcombine.low %v4648_v35, %v4658_v8  ;;  %v4665_v3 = vrot.slane %v4663_v10, 5  ;;  %v4671_v17 = vrot.slane %v4669_v16, 5  ;;  %v6545_v48 = vrot.slane %v6525_v50, 9  ;;  %v6803_v8 = vpop.f32.mrf.mxu1 }
 0x146   : > { %7035 = vmatmul.mubr.msk.bf16.gmra.mxu0 %vm395_vm1, %v6561_v58  ;;  %v5261_v27 = vrot.slane %v6526_v51, 5  ;;  %v5264_v32 = vrot.slane %v6527_v6, 5  ;;  %v4675_v49 = vrot.slane %v4673_v31, 4  ;;  %v4681_v37 = vrot.slane %v4679_v30, 5  ;;  %v6528_v51 = vld [vmem:[%s7209_s25 + $0xcc] sm:$0xe]  ;;  %v6837_v58 = vpop.f32.mrf.mxu0 }
 0x147   : > { %7001 = vmatmul.mubr.msk.bf16.gmra.mxu1 %vm395_vm1, %v6464_v22  ;;  %v4666_v11 = vor.u32 %v4665_v3, %v4662_v56  ;;  %v1432_v13 = vadd.f32 %v6802_v18, %v9018_v28  ;;  %v4684_v46 = vshrl.u32 %v6447_v57, 16  ;;  %v4687_v21 = vshll.u32 %v6447_v57, 16  ;;  %v6529_v6 = vld [vmem:[%s7209_s25 + $0xd0] sm:$0xf]  ;;  %v6530_v31 = vld [vmem:[%s7209_s25 + $0xd4] sm:$0x1] }
 0x148   : > { %v5262_v38 = vsel %vm7268_vm6, %v6545_v48, %v5261_v27  ;;  %v5263_v53 = vrot.slane %v5261_v27, 4  ;;  %v4676_v35 = vor.u32 %v4675_v49, %v4671_v17  ;;  %v4693_v10 = vshll.u32 %v6448_v25, 16 }
 0x149   : > { %v4667_v50 = vrot.slane %v4666_v11, 4  ;;  %v8491_v34 = vadd.f32 %v6836_v0, %v1432_v13  ;;  %v4686_v16 = vrot.slane %v4684_v46, 4  ;;  %v4689_v22 = vrot.slane %v4687_v21, 5  ;;  %v1390_v0 = vpop.f32.mrf.mxu1  ;;  %v1959_v13 = vpop.f32.mrf.mxu0 }
 0x14a   : > { %v5265_v56 = vsel %vm7268_vm6, %v5263_v53, %v5264_v32  ;;  %v4697_v3 = vshrl.u32 %v6448_v25, 16  ;;  %v4677_v18 = vrot.slane %v4676_v35, 4  ;;  %v4695_v48 = vrot.slane %v4693_v10, 5  ;;  %v9020_v53 = vld [vmem:[#allocation13_spill] sm:$0xff] }
 0x14b   : > { %9019 = vst [vmem:[#allocation3_spill] sm:$0xff] %v8491_v34  ;;  %v4672_v30 = vsel %vm7282_vm7, %v4667_v50, %v4671_v17  ;;  %v6562_v57 = vcombine.low %v5262_v38, %v5265_v56  ;;  %v4690_v27 = vor.u32 %v4689_v22, %v4686_v16  ;;  %v4703_v49 = vshll.u32 %v6449_v52, 16  ;;  %v6842_v21 = vpop.f32.mrf.mxu1  ;;  %v9021_v56 = vld [vmem:[#allocation14_spill] sm:$0xff]  ;;  %v9022_v22 = vld [vmem:[#allocation15_spill] sm:$0xff] }
 0x14c   : > { %v4699_v11 = vrot.slane %v4697_v3, 4  ;;  %v6546_v28 = vrot.slane %v6528_v51, 9  ;;  %v4682_v34 = vsel %vm7282_vm7, %v4677_v18, %v4681_v37  ;;  %v5268_v32 = vrot.slane %v6529_v6, 5 }
 0x14d   : > { %7038 = vmatprep.mubr.msk.bf16.mxu0 %vm395_vm1, %v6562_v57  ;;  %v5271_v25 = vrot.slane %v6530_v31, 5  ;;  %v1430_v46 = vadd.f32 %v1387_v45, %v9020_v53  ;;  %v6465_v17 = vcombine.low %v4672_v30, %v4682_v34  ;;  %v4691_v50 = vrot.slane %v4690_v27, 4  ;;  %v2270_v37 = vpop.f32.mrf.mxu1  ;;  %v6876_v31 = vpop.f32.mrf.mxu0 }
 0x14e   : > { %v4700_v38 = vor.u32 %v4699_v11, %v4695_v48  ;;  %v4705_v35 = vrot.slane %v4703_v49, 5  ;;  %v5269_v10 = vsel %vm7268_vm6, %v6546_v28, %v5268_v32  ;;  %v5270_v52 = vrot.slane %v5268_v32, 4 }
 0x14f   : > { %v8506_v51 = vadd.f32 %v1956_v24, %v1430_v46  ;;  %v1433_v16 = vadd.f32 %v6803_v8, %v9021_v56  ;;  %7004 = vmatprep.mubr.msk.bf16.mxu1 %vm395_vm1, %v6465_v17  ;;  %v4696_v6 = vsel %vm7282_vm7, %v4691_v50, %v4695_v48  ;;  %v1431_v34 = vadd.f32 %v1390_v0, %v9022_v22  ;;  %v6843_v8 = vpop.f32.mrf.mxu1  ;;  %v3060_v0 = vpop.f32.mrf.mxu0 }
 0x150   : > { %v4701_v45 = vrot.slane %v4700_v38, 4  ;;  %v2399_v3 = vadd.f32 %v6842_v21, %v8113_v36  ;;  %v5272_v30 = vsel %vm7268_vm6, %v5270_v52, %v5271_v25  ;;  %v2397_v24 = vadd.f32 %v2270_v37, %v8122_v41 }
 0x151   : > { %v8516_v18 = vadd.f32 %v6837_v58, %v1433_v16  ;;  %v6563_v27 = vcombine.low %v5269_v10, %v5272_v30  ;;  %v8521_v11 = vadd.f32 %v1959_v13, %v1431_v34  ;;  %v2400_v42 = vadd.f32 %v6843_v8, %v8134_v63  ;;  %v2273_v28 = vpop.f32.mrf.mxu1  ;;  %v6877_v58 = vpop.f32.mrf.mxu0 }
 0x152   : > { %v4706_v57 = vsel %vm7282_vm7, %v4701_v45, %v4705_v35  ;;  %v8523_v48 = vadd.f32 %v6876_v31, %v2399_v3  ;;  %v8525_v36 = vadd.f32 %v3060_v0, %v2397_v24  ;;  %v2398_v41 = vadd.f32 %v2273_v28, %v8151_v29 }
 0x153   : > { %v6466_v49 = vcombine.low %v4696_v6, %v4706_v57  ;;  %7039 = vmatmul.mubr.msk.bf16.gmra.mxu0 %vm395_vm1, %v6563_v27  ;;  %v8531_v55 = vadd.f32 %v6877_v58, %v2400_v42  ;;  %v6846_v13 = vpop.f32.mrf.mxu1  ;;  %v3063_v32 = vpop.f32.mrf.mxu0 }
 0x154   : > { %v2403_v25 = vadd.f32 %v6846_v13, %v8159_v47  ;;  %v8534_v53 = vadd.f32 %v3063_v32, %v2398_v41 }
 0x155   : > { %7005 = vmatmul.mubr.msk.bf16.gmra.mxu1 %vm395_vm1, %v6466_v49  ;;  %v2286_v46 = vpop.f32.mrf.mxu1  ;;  %v6880_v21 = vpop.f32.mrf.mxu0 }
 0x156   : > { %v2401_v63 = vadd.f32 %v2286_v46, %v8170_v40  ;;  %v8537_v17 = vadd.f32 %v6880_v21, %v2403_v25 }
 0x157   : > { %v6847_v50 = vpop.f32.mrf.mxu1  ;;  %v3076_v38 = vpop.f32.mrf.mxu0 }
 0x158   : > { %v2404_v29 = vadd.f32 %v6847_v50, %v8181_v44  ;;  %v8540_v35 = vadd.f32 %v3076_v38, %v2401_v63 }
 0x159   : > { %v2289_v10 = vpop.f32.mrf.mxu1  ;;  %v6881_v52 = vpop.f32.mrf.mxu0 }
 0x15a   : > { %v2402_v56 = vadd.f32 %v2289_v10, %v8196_v33  ;;  %v8543_v16 = vadd.f32 %v6881_v52, %v2404_v29 }
 0x15b   : > { %v6850_v47 = vpop.f32.mrf.mxu1  ;;  %v3079_v37 = vpop.f32.mrf.mxu0 }
 0x15c   : > { %v2407_v6 = vadd.f32 %v6850_v47, %v8221_v61  ;;  %v8546_v45 = vadd.f32 %v3079_v37, %v2402_v56 }
 0x15d   : > { %v2302_v40 = vpop.f32.mrf.mxu1  ;;  %v6884_v3 = vpop.f32.mrf.mxu0 }
 0x15e   : > { %v2405_v22 = vadd.f32 %v2302_v40, %v8235_v14  ;;  %v8550_v31 = vadd.f32 %v6884_v3, %v2407_v6 }
 0x15f   : > { %v6851_v34 = vpop.f32.mrf.mxu1  ;;  %v3092_v24 = vpop.f32.mrf.mxu0 }
 0x160   : > { %v2408_v44 = vadd.f32 %v6851_v34, %v8241_v20  ;;  %v8553_v8 = vadd.f32 %v3092_v24, %v2405_v22 }
 0x161   : > { %v2305_v30 = vpop.f32.mrf.mxu1  ;;  %v6885_v27 = vpop.f32.mrf.mxu0 }
 0x162   : > { %v2406_v33 = vadd.f32 %v2305_v30, %v8256_v1  ;;  %v8556_v0 = vadd.f32 %v6885_v27, %v2408_v44 }
 0x163   : > { %v6854_v57 = vpop.f32.mrf.mxu1  ;;  %v3095_v14 = vpop.f32.mrf.mxu0 }
 0x164   : > { %v2411_v61 = vadd.f32 %v6854_v57, %v8286_v15  ;;  %v8559_v28 = vadd.f32 %v3095_v14, %v2406_v33 }
 0x165   : > { %v2318_v49 = vpop.f32.mrf.mxu1  ;;  %v6888_v58 = vpop.f32.mrf.mxu0 }
 0x166   : > { %v2409_v42 = vadd.f32 %v2318_v49, %v8299_v19  ;;  %v8562_v13 = vadd.f32 %v6888_v58, %v2411_v61 }
 0x167   : > { %v6855_v20 = vpop.f32.mrf.mxu1  ;;  %v3108_v32 = vpop.f32.mrf.mxu0 }
 0x168   : > { %v2412_v41 = vadd.f32 %v6855_v20, %v8310_v26  ;;  %v8565_v46 = vadd.f32 %v3108_v32, %v2409_v42 }
 0x169   : > { %v2321_v1 = vpop.f32.mrf.mxu1  ;;  %v6889_v21 = vpop.f32.mrf.mxu0 }
 0x16a   : > { %v2410_v25 = vadd.f32 %v2321_v1, %v8326_v9  ;;  %v8568_v50 = vadd.f32 %v6889_v21, %v2412_v41 }
 0x16b   : > { %v6858_v15 = vpop.f32.mrf.mxu1  ;;  %v3111_v38 = vpop.f32.mrf.mxu0 }
 0x16c   : > { %v2415_v63 = vadd.f32 %v6858_v15, %v8349_v39  ;;  %v8571_v10 = vadd.f32 %v3111_v38, %v2410_v25 }
 0x16d   : > { %v2334_v19 = vpop.f32.mrf.mxu1  ;;  %v6892_v52 = vpop.f32.mrf.mxu0 }
 0x16e   : > { %v2413_v29 = vadd.f32 %v2334_v19, %v8370_v4  ;;  %v8574_v47 = vadd.f32 %v6892_v52, %v2415_v63 }
 0x16f   : > { %v6859_v26 = vpop.f32.mrf.mxu1  ;;  %v3124_v37 = vpop.f32.mrf.mxu0 }
 0x170   : > { %v2416_v56 = vadd.f32 %v6859_v26, %v8378_v62  ;;  %v8577_v40 = vadd.f32 %v3124_v37, %v2413_v29 }
 0x171   : > { %v2337_v9 = vpop.f32.mrf.mxu1  ;;  %v6893_v22 = vpop.f32.mrf.mxu0 }
 0x172   : > { %v2414_v6 = vadd.f32 %v2337_v9, %v8383_v60  ;;  %v8580_v3 = vadd.f32 %v6893_v22, %v2416_v56 }
 0x173   : > { %v6862_v39 = vpop.f32.mrf.mxu1  ;;  %v3127_v44 = vpop.f32.mrf.mxu0 }
 0x174   : > { %v2419_v34 = vadd.f32 %v6862_v39, %v8408_v5  ;;  %v8583_v24 = vadd.f32 %v3127_v44, %v2414_v6 }
 0x175   : > { %v2350_v4 = vpop.f32.mrf.mxu1  ;;  %v6896_v33 = vpop.f32.mrf.mxu0 }
 0x176   : > { %v2417_v30 = vadd.f32 %v2350_v4, %v8423_v54  ;;  %v8586_v27 = vadd.f32 %v6896_v33, %v2419_v34 }
 0x177   : > { %v6863_v62 = vpop.f32.mrf.mxu1  ;;  %v3140_v61 = vpop.f32.mrf.mxu0 }
 0x178   : > { %v2420_v57 = vadd.f32 %v6863_v62, %v8425_v2  ;;  %v8589_v14 = vadd.f32 %v3140_v61, %v2417_v30 }
 0x179   : > { %v2353_v60 = vpop.f32.mrf.mxu1  ;;  %v6897_v42 = vpop.f32.mrf.mxu0 }
 0x17a   : > { %v2418_v49 = vadd.f32 %v2353_v60, %v8438_v43  ;;  %v8592_v58 = vadd.f32 %v6897_v42, %v2420_v57 }
 0x17b   : > { %v6866_v5 = vpop.f32.mrf.mxu1  ;;  %v3143_v41 = vpop.f32.mrf.mxu0 }
 0x17c   : > { %v2423_v20 = vadd.f32 %v6866_v5, %v8450_v59  ;;  %v8595_v32 = vadd.f32 %v3143_v41, %v2418_v49  ;;  %v9023_v59 = vld [vmem:[#allocation3_spill] sm:$0xff] }
 0x17d   : > { %v2366_v54 = vpop.f32.mrf.mxu1  ;;  %v6900_v21 = vpop.f32.mrf.mxu0 }
 0x17e   : > { %v2421_v1 = vadd.f32 %v2366_v54, %v8467_v12  ;;  %v8599_v63 = vadd.f32 %v6900_v21, %v2423_v20 }
 0x17f   : > { %v6867_v2 = vpop.f32.mrf.mxu1  ;;  %v3156_v38 = vpop.f32.mrf.mxu0 }
 0x180   : > { %v2424_v25 = vadd.f32 %v6867_v2, %v8469_v23  ;;  %v8602_v26 = vadd.f32 %v3156_v38, %v2421_v1 }
 0x181   : > { %v2369_v15 = vpop.f32.mrf.mxu1  ;;  %v6901_v56 = vpop.f32.mrf.mxu0 }
 0x182   : > { %v2422_v43 = vadd.f32 %v2369_v15, %v8477_v7  ;;  %v8605_v9 = vadd.f32 %v6901_v56, %v2424_v25 }
 0x183   : > { %v6870_v19 = vpop.f32.mrf.mxu1  ;;  %v3159_v23 = vpop.f32.mrf.mxu0 }
 0x184   : > { %v2427_v29 = vadd.f32 %v6870_v19, %v9023_v59  ;;  %v8608_v39 = vadd.f32 %v3159_v23, %v2422_v43 }
 0x185   : > { %v2382_v52 = vpop.f32.mrf.mxu1  ;;  %v6904_v22 = vpop.f32.mrf.mxu0 }
 0x186   : > { %v2425_v12 = vadd.f32 %v2382_v52, %v8506_v51  ;;  %v8611_v4 = vadd.f32 %v6904_v22, %v2427_v29 }
 0x187   : > { %v6871_v37 = vpop.f32.mrf.mxu1  ;;  %v3172_v30 = vpop.f32.mrf.mxu0 }
 0x188   : > { %v2428_v6 = vadd.f32 %v6871_v37, %v8516_v18  ;;  %v8614_v33 = vadd.f32 %v3172_v30, %v2425_v12 }
 0x189   : > { %v2385_v7 = vpop.f32.mrf.mxu1  ;;  %v6905_v57 = vpop.f32.mrf.mxu0 }
 0x18a   : > { %v2426_v34 = vadd.f32 %v2385_v7, %v8521_v11  ;;  %v8618_v60 = vadd.f32 %v6905_v57, %v2428_v6 }
 0x18b   : > { %v6910_v44 = vpop.f32.mrf.mxu1  ;;  %v3175_v61 = vpop.f32.mrf.mxu0 }
 0x18c   : > { %v3755_v62 = vadd.f32 %v6910_v44, %v8523_v48  ;;  %v8621_v5 = vadd.f32 %v3175_v61, %v2426_v34 }
 0x18d   : > { %v8616_v51 = vpop.f32.mrf.mxu1  ;;  %v6944_v42 = vpop.f32.mrf.mxu0 }
 0x18e   : > { %v8625_v20 = vadd.f32 %v6944_v42, %v3755_v62 }
 0x18f   : > { %v6911_v18 = vpop.f32.mrf.mxu1  ;;  %v8627_v54 = vpop.f32.mrf.mxu0 }
 0x190   : > { %v3756_v49 = vadd.f32 %v6911_v18, %v8531_v55 }
 0x191   : > { %v8623_v11 = vpop.f32.mrf.mxu1  ;;  %v6945_v1 = vpop.f32.mrf.mxu0 }
 0x192   : > { %v8630_v25 = vadd.f32 %v6945_v1, %v3756_v49 }
 0x193   : > { %v6914_v48 = vpop.f32.mrf.mxu1  ;;  %v8633_v21 = vpop.f32.mrf.mxu0 }
 0x194   : > { %v3759_v41 = vadd.f32 %v6914_v48, %v8537_v17 }
 0x195   : > { %v3642_v2 = vpop.f32.mrf.mxu1  ;;  %v6948_v19 = vpop.f32.mrf.mxu0 }
 0x196   : > { %v3757_v15 = vadd.f32 %v3642_v2, %v8540_v35  ;;  %v8636_v59 = vadd.f32 %v6948_v19, %v3759_v41 }
 0x197   : > { %v6915_v55 = vpop.f32.mrf.mxu1  ;;  %v4068_v52 = vpop.f32.mrf.mxu0 }
 0x198   : > { %v3760_v43 = vadd.f32 %v6915_v55, %v8543_v16  ;;  %v8639_v17 = vadd.f32 %v4068_v52, %v3757_v15 }
 0x199   : > { %v3645_v38 = vpop.f32.mrf.mxu1  ;;  %v6949_v37 = vpop.f32.mrf.mxu0 }
 0x19a   : > { %v3758_v29 = vadd.f32 %v3645_v38, %v8546_v45  ;;  %v8642_v35 = vadd.f32 %v6949_v37, %v3760_v43 }
 0x19b   : > { %v6918_v56 = vpop.f32.mrf.mxu1  ;;  %v4071_v7 = vpop.f32.mrf.mxu0 }
 0x19c   : > { %v3763_v12 = vadd.f32 %v6918_v56, %v8550_v31  ;;  %v8645_v22 = vadd.f32 %v4071_v7, %v3758_v29 }
 0x19d   : > { %v3658_v23 = vpop.f32.mrf.mxu1  ;;  %v6952_v44 = vpop.f32.mrf.mxu0 }
 0x19e   : > { %v3761_v6 = vadd.f32 %v3658_v23, %v8553_v8  ;;  %v8648_v30 = vadd.f32 %v6952_v44, %v3763_v12 }
 0x19f   : > { %v6919_v16 = vpop.f32.mrf.mxu1  ;;  %v4084_v57 = vpop.f32.mrf.mxu0 }
 0x1a0   : > { %v3764_v34 = vadd.f32 %v6919_v16, %v8556_v0  ;;  %v8651_v18 = vadd.f32 %v4084_v57, %v3761_v6 }
 0x1a1   : > { %v3661_v45 = vpop.f32.mrf.mxu1  ;;  %v6953_v49 = vpop.f32.mrf.mxu0 }
 0x1a2   : > { %v3762_v62 = vadd.f32 %v3661_v45, %v8559_v28  ;;  %v8654_v42 = vadd.f32 %v6953_v49, %v3764_v34 }
 0x1a3   : > { %v6922_v31 = vpop.f32.mrf.mxu1  ;;  %v4087_v41 = vpop.f32.mrf.mxu0 }
 0x1a4   : > { %v3767_v61 = vadd.f32 %v6922_v31, %v8562_v13  ;;  %v8657_v1 = vadd.f32 %v4087_v41, %v3762_v62 }
 0x1a5   : > { %v3674_v8 = vpop.f32.mrf.mxu1  ;;  %v6956_v15 = vpop.f32.mrf.mxu0 }
 0x1a6   : > { %v3765_v48 = vadd.f32 %v3674_v8, %v8565_v46  ;;  %v8660_v55 = vadd.f32 %v6956_v15, %v3767_v61 }
 0x1a7   : > { %v6923_v0 = vpop.f32.mrf.mxu1  ;;  %v4100_v19 = vpop.f32.mrf.mxu0 }
 0x1a8   : > { %v3768_v2 = vadd.f32 %v6923_v0, %v8568_v50  ;;  %v8663_v38 = vadd.f32 %v4100_v19, %v3765_v48 }
 0x1a9   : > { %v3677_v28 = vpop.f32.mrf.mxu1  ;;  %v6957_v52 = vpop.f32.mrf.mxu0 }
 0x1aa   : > { %v3766_v43 = vadd.f32 %v3677_v28, %v8571_v10  ;;  %v8668_v56 = vadd.f32 %v6957_v52, %v3768_v2 }
 0x1ab   : > { %v6926_v13 = vpop.f32.mrf.mxu1  ;;  %v4103_v12 = vpop.f32.mrf.mxu0 }
 0x1ac   : > { %v3771_v29 = vadd.f32 %v6926_v13, %v8574_v47  ;;  %v8670_v50 = vadd.f32 %v4103_v12, %v3766_v43 }
 0x1ad   : > { %v8666_v46 = vpop.f32.mrf.mxu1  ;;  %v6960_v6 = vpop.f32.mrf.mxu0 }
 0x1ae   : > { %v8675_v10 = vadd.f32 %v6960_v6, %v3771_v29 }
 0x1af   : > { %v6927_v37 = vpop.f32.mrf.mxu1  ;;  %v8677_v16 = vpop.f32.mrf.mxu0 }
 0x1b0   : > { %v3772_v23 = vadd.f32 %v6927_v37, %v8580_v3 }
 0x1b1   : > { %v8673_v7 = vpop.f32.mrf.mxu1  ;;  %v6961_v44 = vpop.f32.mrf.mxu0 }
 0x1b2   : > { %v8680_v62 = vadd.f32 %v6961_v44, %v3772_v23 }
 0x1b3   : > { %v6930_v34 = vpop.f32.mrf.mxu1  ;;  %v8683_v31 = vpop.f32.mrf.mxu0 }
 0x1b4   : > { %v3775_v47 = vadd.f32 %v6930_v34, %v8586_v27 }
 0x1b5   : > { %v3706_v45 = vpop.f32.mrf.mxu1  ;;  %v6964_v49 = vpop.f32.mrf.mxu0 }
 0x1b6   : > { %v3773_v57 = vadd.f32 %v3706_v45, %v8589_v14  ;;  %v8686_v48 = vadd.f32 %v6964_v49, %v3775_v47 }
 0x1b7   : > { %v6931_v61 = vpop.f32.mrf.mxu1  ;;  %v4132_v0 = vpop.f32.mrf.mxu0 }
 0x1b8   : > { %v3776_v3 = vadd.f32 %v6931_v61, %v8592_v58  ;;  %v8689_v27 = vadd.f32 %v4132_v0, %v3773_v57 }
 0x1b9   : > { %v3709_v8 = vpop.f32.mrf.mxu1  ;;  %v6965_v28 = vpop.f32.mrf.mxu0 }
 0x1ba   : > { %v3774_v41 = vadd.f32 %v3709_v8, %v8595_v32  ;;  %v8692_v14 = vadd.f32 %v6965_v28, %v3776_v3 }
 0x1bb   : > { %v4135_v13 = vpop.f32.mrf.mxu0 }
 0x1bc   : > { %v8695_v29 = vadd.f32 %v4135_v13, %v3774_v41  ;;  %v3753_v41 = vadd.f32 %v8616_v51, %v8525_v36 }
 0x1bd   : > { %v6968_v12 = vpop.f32.mrf.mxu0 }
 0x1be   : > { %v6934_v2 = vpop.f32.mrf.mxu1 }
 0x1bf   : > { %v3779_v15 = vadd.f32 %v6934_v2, %v8599_v63  ;;  %v4148_v6 = vpop.f32.mrf.mxu0 }
 0x1c0   : > { %v3722_v43 = vpop.f32.mrf.mxu1 }
 0x1c1   : > { %v3777_v19 = vadd.f32 %v3722_v43, %v8602_v26  ;;  %v8698_v37 = vadd.f32 %v6968_v12, %v3779_v15  ;;  %v6969_v44 = vpop.f32.mrf.mxu0 }
 0x1c2   : > { %v6935_v58 = vpop.f32.mrf.mxu1 }
 0x1c3   : > { %v3780_v52 = vadd.f32 %v6935_v58, %v8605_v9  ;;  %v8701_v34 = vadd.f32 %v4148_v6, %v3777_v19  ;;  %v4151_v61 = vpop.f32.mrf.mxu0  ;;  %v4179_v19 = vadd.f32 %v8627_v54, %v3753_v41 }
 0x1c4   : > { %v3725_v32 = vpop.f32.mrf.mxu1 }
 0x1c5   : > { %v3778_v23 = vadd.f32 %v3725_v32, %v8608_v39  ;;  %v8704_v45 = vadd.f32 %v6969_v44, %v3780_v52  ;;  %v6972_v8 = vpop.f32.mrf.mxu0 }
 0x1c6   : > { %v6938_v63 = vpop.f32.mrf.mxu1 }
 0x1c7   : > { %v3783_v47 = vadd.f32 %v6938_v63, %v8611_v4  ;;  %v8707_v3 = vadd.f32 %v4151_v61, %v3778_v23  ;;  %v4164_v2 = vpop.f32.mrf.mxu0 }
 0x1c8   : > { %v3738_v26 = vpop.f32.mrf.mxu1 }
 0x1c9   : > { %v3781_v57 = vadd.f32 %v3738_v26, %v8614_v33  ;;  %v8712_v0 = vadd.f32 %v6972_v8, %v3783_v47  ;;  %v6973_v33 = vpop.f32.mrf.mxu0 }
 0x1ca   : > { %v6939_v9 = vpop.f32.mrf.mxu1 }
 0x1cb   : > { %v3784_v49 = vadd.f32 %v6939_v9, %v8618_v60  ;;  %v8715_v28 = vadd.f32 %v4164_v2, %v3781_v57  ;;  %v3754_v60 = vadd.f32 %v8623_v11, %v8534_v53  ;;  %v4167_v58 = vpop.f32.mrf.mxu0 }
 0x1cc   : > { %v3741_v39 = vpop.f32.mrf.mxu1 }
 0x1cd   : > { %v3782_v4 = vadd.f32 %v3741_v39, %v8621_v5  ;;  %v8720_v13 = vadd.f32 %v6973_v33, %v3784_v49  ;;  %v4180_v32 = vadd.f32 %v8633_v21, %v3754_v60 }
 0x1ce   : > { %v6978_v15 = vpop.f32.mrf.mxu1 }
 0x1cf   : > { %v8722_v36 = vadd.f32 %v4167_v58, %v3782_v4  ;;  %v4971_v53 = vadd.f32 %v6978_v15, %v8625_v20 }
 0x1d0   : > { %v4842_v43 = vpop.f32.mrf.mxu1 }
 0x1d1   : > { %v4969_v51 = vadd.f32 %v4842_v43, %v4179_v19 }
 0x1d2   : > { %v6979_v52 = vpop.f32.mrf.mxu1 }
 0x1d3   : > { %v4972_v57 = vadd.f32 %v6979_v52, %v8630_v25 }
 0x1d4   : > { %v4845_v5 = vpop.f32.mrf.mxu1 }
 0x1d5   : > { %v7012_v12 = vpop.f32.mrf.mxu0  ;;  %v4970_v47 = vadd.f32 %v4845_v5, %v4180_v32 }
 0x1d6   : > { %v6982_v6 = vpop.f32.mrf.mxu1  ;;  %v8732_v21 = vadd.f32 %v7012_v12, %v4971_v53 }
 0x1d7   : > { %v5408_v23 = vpop.f32.mrf.mxu0  ;;  %v4975_v43 = vadd.f32 %v6982_v6, %v8636_v59 }
 0x1d8   : > { %v8725_v63 = vadd.f32 %v5408_v23, %v4969_v51  ;;  %v4858_v44 = vpop.f32.mrf.mxu1 }
 0x1d9   : > { %v7013_v54 = vpop.f32.mrf.mxu0  ;;  %v4973_v39 = vadd.f32 %v4858_v44, %v8639_v17 }
 0x1da   : > { %5773 = vxpose.xlu0.b32.start [1/16] (narrow) %v8725_v63, 8  ;;  %v6983_v26 = vpop.f32.mrf.mxu1  ;;  %v8738_v4 = vadd.f32 %v7013_v54, %v4972_v57 }
 0x1db   : > { %v5411_v11 = vpop.f32.mrf.mxu0  ;;  %v4976_v51 = vadd.f32 %v6983_v26, %v8642_v35 }
 0x1dc   : > { %v8730_v61 = vadd.f32 %v5411_v11, %v4970_v47  ;;  %v4861_v49 = vpop.f32.mrf.mxu1 }
 0x1dd   : > { %v7016_v9 = vpop.f32.mrf.mxu0  ;;  %v4974_v25 = vadd.f32 %v4861_v49, %v8645_v22 }
 0x1de   : > { %v5631_v8 = vadd.f32 %v8730_v61, %v8725_v63  ;;  %5774 = vxpose.xlu0.b32.cont [2/16] (narrow) %v8730_v61, 8  ;;  %v6986_v41 = vpop.f32.mrf.mxu1  ;;  %v8751_v32 = vadd.f32 %v7016_v9, %v4975_v43 }
 0x1df   : > { %v5424_v20 = vpop.f32.mrf.mxu0  ;;  %v4979_v26 = vadd.f32 %v6986_v41, %v8648_v30 }
 0x1e0   : > { %v5632_v2 = vadd.f32 %v5631_v8, %v8732_v21  ;;  %v4874_v33 = vpop.f32.mrf.mxu1  ;;  %v8743_v19 = vadd.f32 %v5424_v20, %v4973_v39 }
 0x1e1   : > { %v7017_v15 = vpop.f32.mrf.mxu0  ;;  %v4977_v23 = vadd.f32 %v4874_v33, %v8651_v18 }
 0x1e2   : > { %v5633_v60 = vadd.f32 %v5632_v2, %v8738_v4  ;;  %5775 = vxpose.xlu0.b32.cont [3/16] (narrow) %v8732_v21, 8  ;;  %v6987_v58 = vpop.f32.mrf.mxu1  ;;  %v8756_v54 = vadd.f32 %v7017_v15, %v4976_v51 }
 0x1e3   : > { %v5427_v17 = vpop.f32.mrf.mxu0  ;;  %v4980_v39 = vadd.f32 %v6987_v58, %v8654_v42  ;;  %v3770_v58 = vadd.f32 %v8673_v7, %v8583_v24 }
 0x1e4   : > { %v5634_v52 = vadd.f32 %v5633_v60, %v8743_v19  ;;  %v8749_v12 = vadd.f32 %v5427_v17, %v4974_v25  ;;  %v4877_v22 = vpop.f32.mrf.mxu1  ;;  %v3769_v25 = vadd.f32 %v8666_v46, %v8577_v40 }
 0x1e5   : > { %v7020_v5 = vpop.f32.mrf.mxu0  ;;  %v4978_v35 = vadd.f32 %v4877_v22, %v8657_v1 }
 0x1e6   : > { %v5635_v59 = vadd.f32 %v5634_v52, %v8749_v12  ;;  %5776 = vxpose.xlu0.b32.cont [4/16] (narrow) %v8738_v4, 8  ;;  %v6990_v47 = vpop.f32.mrf.mxu1  ;;  %v8771_v30 = vadd.f32 %v7020_v5, %v4979_v26  ;;  %v4195_v52 = vadd.f32 %v8677_v16, %v3769_v25  ;;  %v4196_v16 = vadd.f32 %v8683_v31, %v3770_v58 }
 0x1e7   : > { %v5440_v6 = vpop.f32.mrf.mxu0  ;;  %v4983_v51 = vadd.f32 %v6990_v47, %v8660_v55 }
 0x1e8   : > { %v5636_v44 = vadd.f32 %v5635_v59, %v8751_v32  ;;  %v4890_v11 = vpop.f32.mrf.mxu1  ;;  %v8761_v57 = vadd.f32 %v5440_v6, %v4977_v23 }
 0x1e9   : > { %v7021_v53 = vpop.f32.mrf.mxu0  ;;  %v4981_v15 = vadd.f32 %v4890_v11, %v8663_v38 }
 0x1ea   : > { %v5637_v9 = vadd.f32 %v5636_v44, %v8756_v54  ;;  %5777 = vxpose.xlu0.b32.cont [5/16] (narrow) %v8743_v19, 8  ;;  %v6991_v49 = vpop.f32.mrf.mxu1  ;;  %v8776_v60 = vadd.f32 %v7021_v53, %v4980_v39 }
 0x1eb   : > { %v5443_v18 = vpop.f32.mrf.mxu0 }
 0x1ec   : > { %v5638_v8 = vadd.f32 %v5637_v9, %v8761_v57  ;;  %v8767_v20 = vadd.f32 %v5443_v18, %v4978_v35  ;;  %v4893_v1 = vpop.f32.mrf.mxu1 }
 0x1ed   : > { %v7024_v2 = vpop.f32.mrf.mxu0  ;;  %v4982_v17 = vadd.f32 %v4893_v1, %v8670_v50  ;;  %v4984_v50 = vadd.f32 %v6991_v49, %v8668_v56 }
 0x1ee   : > { %v5639_v41 = vadd.f32 %v5638_v8, %v8767_v20  ;;  %5778 = vxpose.xlu0.b32.cont [6/16] (narrow) %v8749_v12, 8  ;;  %v6994_v43 = vpop.f32.mrf.mxu1  ;;  %v8793_v55 = vadd.f32 %v7024_v2, %v4983_v51 }
 0x1ef   : > { %v5456_v33 = vpop.f32.mrf.mxu0  ;;  %v4987_v18 = vadd.f32 %v6994_v43, %v8675_v10 }
 0x1f0   : > { %v5640_v42 = vadd.f32 %v5639_v41, %v8771_v30  ;;  %v4906_v46 = vpop.f32.mrf.mxu1  ;;  %v8784_v38 = vadd.f32 %v5456_v33, %v4981_v15 }
 0x1f1   : > { %v7025_v40 = vpop.f32.mrf.mxu0  ;;  %v4985_v24 = vadd.f32 %v4906_v46, %v4195_v52 }
 0x1f2   : > { %v5641_v5 = vadd.f32 %v5640_v42, %v8776_v60  ;;  %5779 = vxpose.xlu0.b32.cont [7/16] (narrow) %v8751_v32, 8  ;;  %v6995_v59 = vpop.f32.mrf.mxu1  ;;  %v8797_v53 = vadd.f32 %v7025_v40, %v4984_v50 }
 0x1f3   : > { %v5459_v22 = vpop.f32.mrf.mxu0  ;;  %v4988_v2 = vadd.f32 %v6995_v59, %v8680_v62 }
 0x1f4   : > { %v5642_v23 = vadd.f32 %v5641_v5, %v8784_v38  ;;  %v8790_v6 = vadd.f32 %v5459_v22, %v4982_v17  ;;  %v4909_v44 = vpop.f32.mrf.mxu1 }
 0x1f5   : > { %v7028_v7 = vpop.f32.mrf.mxu0  ;;  %v4986_v56 = vadd.f32 %v4909_v44, %v4196_v16 }
 0x1f6   : > { %v5643_v47 = vadd.f32 %v5642_v23, %v8790_v6  ;;  %5780 = vxpose.xlu0.b32.cont [8/16] (narrow) %v8756_v54, 8  ;;  %v8810_v15 = vadd.f32 %v7028_v7, %v4987_v18 }
 0x1f7   : > { %v5472_v35 = vpop.f32.mrf.mxu0 }
 0x1f8   : > { %v5644_v11 = vadd.f32 %v5643_v47, %v8793_v55  ;;  %v8800_v26 = vadd.f32 %v5472_v35, %v4985_v24 }
 0x1f9   : > { %v7029_v9 = vpop.f32.mrf.mxu0  ;;  %v6998_v31 = vpop.f32.mrf.mxu1 }
 0x1fa   : > { %v5645_v49 = vadd.f32 %v5644_v11, %v8797_v53  ;;  %5781 = vxpose.xlu0.b32.cont [9/16] (narrow) %v8761_v57, 8  ;;  %5805 = vxpose.xlu1.b32.start [1/16] (narrow) %v8800_v26, 8  ;;  %v8816_v17 = vadd.f32 %v7029_v9, %v4988_v2  ;;  %v4991_v52 = vadd.f32 %v6998_v31, %v8686_v48 }
 0x1fb   : > { %v5475_v8 = vpop.f32.mrf.mxu0  ;;  %v4922_v25 = vpop.f32.mrf.mxu1 }
 0x1fc   : > { %v5646_v39 = vadd.f32 %v5645_v49, %v8800_v26  ;;  %v8808_v1 = vadd.f32 %v5475_v8, %v4986_v56  ;;  %v4989_v33 = vadd.f32 %v4922_v25, %v8689_v27 }
 0x1fd   : > { %v7032_v41 = vpop.f32.mrf.mxu0  ;;  %v6999_v43 = vpop.f32.mrf.mxu1 }
 0x1fe   : > { %v5647_v10 = vadd.f32 %v5646_v39, %v8808_v1  ;;  %5782 = vxpose.xlu0.b32.cont [10/16] (narrow) %v8767_v20, 8  ;;  %5806 = vxpose.xlu1.b32.cont [2/16] (narrow) %v8808_v1, 8  ;;  %v4992_v59 = vadd.f32 %v6999_v43, %v8692_v14  ;;  %v8830_v50 = vadd.f32 %v7032_v41, %v4991_v52 }
 0x1ff   : > { %v5488_v42 = vpop.f32.mrf.mxu0  ;;  %v4925_v58 = vpop.f32.mrf.mxu1 }
 0x200   : > { %v5648_v62 = vadd.f32 %v5647_v10, %v8810_v15  ;;  %v4990_v46 = vadd.f32 %v4925_v58, %v8695_v29  ;;  %v8821_v51 = vadd.f32 %v5488_v42, %v4989_v33 }
 0x201   : > { %v7033_v40 = vpop.f32.mrf.mxu0 }
 0x202   : > { %v5649_v27 = vadd.f32 %v5648_v62, %v8816_v17  ;;  %5783 = vxpose.xlu0.b32.cont [11/16] (narrow) %v8771_v30, 8  ;;  %5807 = vxpose.xlu1.b32.cont [3/16] (narrow) %v8810_v15, 8  ;;  %v8835_v24 = vadd.f32 %v7033_v40, %v4992_v59 }
 0x203   : > { %v5491_v5 = vpop.f32.mrf.mxu0 }
 0x204   : > { %v5650_v22 = vadd.f32 %v5649_v27, %v8821_v51  ;;  %v8828_v23 = vadd.f32 %v5491_v5, %v4990_v46 }
 0x206   : > { %v5651_v29 = vadd.f32 %v5650_v22, %v8828_v23  ;;  %5784 = vxpose.xlu0.b32.cont [12/16] (narrow) %v8776_v60, 8  ;;  %5808 = vxpose.xlu1.b32.cont [4/16] (narrow) %v8816_v17, 8  ;;  %v7036_v48 = vpop.f32.mrf.mxu0 }
 0x207   : > { %v7002_v44 = vpop.f32.mrf.mxu1 }
 0x208   : > { %v5652_v7 = vadd.f32 %v5651_v29, %v8830_v50  ;;  %v5504_v16 = vpop.f32.mrf.mxu0  ;;  %v4995_v49 = vadd.f32 %v7002_v44, %v8698_v37 }
 0x209   : > { %v4938_v47 = vpop.f32.mrf.mxu1 }
 0x20a   : > { %v5653_v14 = vadd.f32 %v5652_v7, %v8835_v24  ;;  %5785 = vxpose.xlu0.b32.cont [13/16] (narrow) %v8784_v38, 8  ;;  %5809 = vxpose.xlu1.b32.cont [5/16] (narrow) %v8821_v51, 8  ;;  %v4993_v35 = vadd.f32 %v4938_v47, %v8701_v34  ;;  %v7037_v56 = vpop.f32.mrf.mxu0  ;;  %v8854_v34 = vadd.f32 %v7036_v48, %v4995_v49 }
 0x20b   : > { %v7003_v11 = vpop.f32.mrf.mxu1 }
 0x20c   : > { %v8842_v9 = vadd.f32 %v5504_v16, %v4993_v35  ;;  %v5507_v39 = vpop.f32.mrf.mxu0  ;;  %v4996_v2 = vadd.f32 %v7003_v11, %v8704_v45 }
 0x20d   : > { %v4941_v18 = vpop.f32.mrf.mxu1 }
 0x20e   : > { %5810 = vxpose.xlu1.b32.cont [6/16] (narrow) %v8828_v23, 8  ;;  %5786 = vxpose.xlu0.b32.cont [14/16] (narrow) %v8790_v6, 8  ;;  %v5654_v31 = vadd.f32 %v5653_v14, %v8842_v9  ;;  %v4994_v8 = vadd.f32 %v4941_v18, %v8707_v3  ;;  %v8857_v10 = vadd.f32 %v7037_v56, %v4996_v2 }
 0x210   : > { %v8850_v25 = vadd.f32 %v5507_v39, %v4994_v8 }
 0x212   : > { %5811 = vxpose.xlu1.b32.cont [7/16] (narrow) %v8830_v50, 8  ;;  %5787 = vxpose.xlu0.b32.cont [15/16] (narrow) %v8793_v55, 8  ;;  %v5655_v41 = vadd.f32 %v5654_v31, %v8850_v25 }
 0x213   : > { %v7040_v33 = vpop.f32.mrf.mxu0 }
 0x214   : > { %v5656_v37 = vadd.f32 %v5655_v41, %v8854_v34 }
 0x215   : > { %v7006_v43 = vpop.f32.mrf.mxu1  ;;  %v5520_v45 = vpop.f32.mrf.mxu0 }
 0x216   : > { %5812 = vxpose.xlu1.b32.cont [8/16] (narrow) %v8835_v24, 8  ;;  %5788 = vxpose.xlu0.b32.end [16/16] (narrow) %v8797_v53, 8  ;;  %v5657_v3 = vadd.f32 %v5656_v37, %v8857_v10  ;;  %v4999_v27 = vadd.f32 %v7006_v43, %v8712_v0 }
 0x217   : > { %v4954_v42 = vpop.f32.mrf.mxu1  ;;  %v7041_v40 = vpop.f32.mrf.mxu0 }
 0x218   : > { %v4997_v62 = vadd.f32 %v4954_v42, %v8715_v28  ;;  %v8874_v28 = vadd.f32 %v7040_v33, %v4999_v27 }
 0x219   : > { %v7007_v58 = vpop.f32.mrf.mxu1  ;;  %v5523_v59 = vpop.f32.mrf.mxu0 }
 0x21a   : > { %5813 = vxpose.xlu1.b32.cont [9/16] (narrow) %v8842_v9, 8  ;;  %v8865_v46 = vadd.f32 %v5520_v45, %v4997_v62  ;;  %v5000_v29 = vadd.f32 %v7007_v58, %v8720_v13 }
 0x21b   : > { %v4957_v52 = vpop.f32.mrf.mxu1 }
 0x21c   : > { %v5658_v5 = vadd.f32 %v5657_v3, %v8865_v46  ;;  %v4998_v22 = vadd.f32 %v4957_v52, %v8722_v36  ;;  %v8878_v44 = vadd.f32 %v7041_v40, %v5000_v29 }
 0x21e   : > { %5814 = vxpose.xlu1.b32.cont [10/16] (narrow) %v8850_v25, 8  ;;  %v8872_v48 = vadd.f32 %v5523_v59, %v4998_v22 }
 0x220   : > { %v5659_v7 = vadd.f32 %v5658_v5, %v8872_v48 }
 0x222   : > { %5815 = vxpose.xlu1.b32.cont [11/16] (narrow) %v8854_v34, 8  ;;  %v5660_v0 = vadd.f32 %v5659_v7, %v8874_v28 }
 0x224   : > { %v5661_v16 = vadd.f32 %v5660_v0, %v8878_v44 }
 0x226   : > { %5816 = vxpose.xlu1.b32.cont [12/16] (narrow) %v8857_v10, 8  ;;  %v5662_v36 = vrot.slane %v5661_v16, 4 }
 0x228   : > { %v5663_v47 = vadd.f32 %v5662_v36, %v5661_v16 }
 0x22a   : > { %5817 = vxpose.xlu1.b32.cont [13/16] (narrow) %v8865_v46, 8  ;;  %v5664_v13 = vrot.slane %v5663_v47, 2 }
 0x22c   : > { %v5665_v14 = vadd.f32 %v5664_v13, %v5663_v47 }
 0x22e   : > { %5818 = vxpose.xlu1.b32.cont [14/16] (narrow) %v8872_v48, 8  ;;  %v5666_v35 = vrot.slane %v5665_v14, 1 }
 0x230   : > { %v8886_v11 = vadd.f32 %v5666_v35, %v5665_v14 }
 0x232   : > { %5819 = vxpose.xlu1.b32.cont [15/16] (narrow) %v8874_v28, 8  ;;  %v8890_v56 = vmul.f32 0.00390625, %v8886_v11 }
 0x234   : > { %v5669_v18 = vsub.f32 %v8725_v63, %v8890_v56  ;;  %v5670_v49 = vsub.f32 %v8730_v61, %v8890_v56  ;;  %v5671_v31 = vsub.f32 %v8732_v21, %v8890_v56  ;;  %v5672_v2 = vsub.f32 %v8738_v4, %v8890_v56 }
 0x235   : > { %v5673_v41 = vsub.f32 %v8743_v19, %v8890_v56  ;;  %v5674_v43 = vsub.f32 %v8749_v12, %v8890_v56  ;;  %v5675_v61 = vsub.f32 %v8751_v32, %v8890_v56  ;;  %v5676_v42 = vsub.f32 %v8756_v54, %v8890_v56 }
 0x236   : > { %5820 = vxpose.xlu1.b32.end [16/16] (narrow) %v8878_v44, 8  ;;  %v5701_v8 = vmul.f32 %v5669_v18, %v5669_v18  ;;  %v5702_v39 = vmul.f32 %v5670_v49, %v5670_v49  ;;  %v5703_v37 = vmul.f32 %v5671_v31, %v5671_v31  ;;  %v5704_v63 = vmul.f32 %v5672_v2, %v5672_v2 }
 0x237   : > { %v5705_v21 = vmul.f32 %v5673_v41, %v5673_v41  ;;  %v5706_v4 = vmul.f32 %v5674_v43, %v5674_v43  ;;  %v5677_v19 = vsub.f32 %v8761_v57, %v8890_v56  ;;  %v5707_v58 = vmul.f32 %v5675_v61, %v5675_v61 }
 0x238   : > { %v5733_v33 = vadd.f32 %v5702_v39, %v5701_v8  ;;  %v5678_v12 = vsub.f32 %v8767_v20, %v8890_v56  ;;  %v5708_v52 = vmul.f32 %v5676_v42, %v5676_v42  ;;  %v5679_v32 = vsub.f32 %v8771_v30, %v8890_v56 }
 0x239   : > { %v5709_v5 = vmul.f32 %v5677_v19, %v5677_v19  ;;  %v5680_v54 = vsub.f32 %v8776_v60, %v8890_v56  ;;  %v5681_v57 = vsub.f32 %v8784_v38, %v8890_v56  ;;  %v5682_v0 = vsub.f32 %v8790_v6, %v8890_v56 }
 0x23a   : > { %v5734_v45 = vadd.f32 %v5733_v33, %v5703_v37  ;;  %v5710_v59 = vmul.f32 %v5678_v12, %v5678_v12  ;;  %v5711_v20 = vmul.f32 %v5679_v32, %v5679_v32  ;;  %v5683_v60 = vsub.f32 %v8793_v55, %v8890_v56 }
 0x23b   : > { %v5712_v16 = vmul.f32 %v5680_v54, %v5680_v54  ;;  %v5713_v47 = vmul.f32 %v5681_v57, %v5681_v57  ;;  %v5684_v14 = vsub.f32 %v8797_v53, %v8890_v56  ;;  %v5714_v35 = vmul.f32 %v5682_v0, %v5682_v0 }
 0x23c   : > { %v5735_v3 = vadd.f32 %v5734_v45, %v5704_v63  ;;  %v5685_v38 = vsub.f32 %v8800_v26, %v8890_v56  ;;  %v5715_v49 = vmul.f32 %v5683_v60, %v5683_v60  ;;  %v5686_v6 = vsub.f32 %v8808_v1, %v8890_v56 }
 0x23d   : > { %v5716_v8 = vmul.f32 %v5684_v14, %v5684_v14  ;;  %v5687_v55 = vsub.f32 %v8810_v15, %v8890_v56  ;;  %v5688_v53 = vsub.f32 %v8816_v17, %v8890_v56  ;;  %v5689_v26 = vsub.f32 %v8821_v51, %v8890_v56 }
 0x23e   : > { %v5736_v62 = vadd.f32 %v5735_v3, %v5705_v21  ;;  %v5717_v2 = vmul.f32 %v5685_v38, %v5685_v38  ;;  %v5718_v37 = vmul.f32 %v5686_v6, %v5686_v6  ;;  %v5690_v1 = vsub.f32 %v8828_v23, %v8890_v56 }
 0x23f   : > { %v5719_v43 = vmul.f32 %v5687_v55, %v5687_v55  ;;  %v5720_v45 = vmul.f32 %v5688_v53, %v5688_v53  ;;  %v5691_v15 = vsub.f32 %v8830_v50, %v8890_v56  ;;  %v5721_v21 = vmul.f32 %v5689_v26, %v5689_v26 }
 0x240   : > { %v5737_v40 = vadd.f32 %v5736_v62, %v5706_v4  ;;  %v5692_v17 = vsub.f32 %v8835_v24, %v8890_v56  ;;  %v5722_v42 = vmul.f32 %v5690_v1, %v5690_v1  ;;  %v5693_v51 = vsub.f32 %v8842_v9, %v8890_v56 }
 0x241   : > { %v5723_v62 = vmul.f32 %v5691_v15, %v5691_v15  ;;  %v5694_v23 = vsub.f32 %v8850_v25, %v8890_v56  ;;  %v5695_v50 = vsub.f32 %v8854_v34, %v8890_v56  ;;  %v5696_v24 = vsub.f32 %v8857_v10, %v8890_v56 }
 0x242   : > { %v5738_v27 = vadd.f32 %v5737_v40, %v5707_v58  ;;  %v5724_v58 = vmul.f32 %v5692_v17, %v5692_v17  ;;  %v5725_v12 = vmul.f32 %v5693_v51, %v5693_v51  ;;  %v5697_v9 = vsub.f32 %v8865_v46, %v8890_v56 }
 0x243   : > { %v5698_v25 = vsub.f32 %v8872_v48, %v8890_v56  ;;  %v5699_v34 = vsub.f32 %v8874_v28, %v8890_v56 }
 0x244   : > { %v5739_v22 = vadd.f32 %v5738_v27, %v5708_v52  ;;  %v5726_v27 = vmul.f32 %v5694_v23, %v5694_v23  ;;  %v5729_v57 = vmul.f32 %v5697_v9, %v5697_v9 }
 0x246   : > { %v5740_v29 = vadd.f32 %v5739_v22, %v5709_v5  ;;  %v5727_v5 = vmul.f32 %v5695_v50, %v5695_v50 }
 0x248   : > { %v5741_v7 = vadd.f32 %v5740_v29, %v5710_v59  ;;  %v5728_v59 = vmul.f32 %v5696_v24, %v5696_v24 }
 0x24a   : > { %v5742_v36 = vadd.f32 %v5741_v7, %v5711_v20  ;;  %v5700_v20 = vsub.f32 %v8878_v44, %v8890_v56  ;;  %v5730_v7 = vmul.f32 %v5698_v25, %v5698_v25 }
 0x24c   : > { %v5743_v13 = vadd.f32 %v5742_v36, %v5712_v16  ;;  %v5732_v16 = vmul.f32 %v5700_v20, %v5700_v20 }
 0x24e   : > { %v5744_v18 = vadd.f32 %v5743_v13, %v5713_v47 }
 0x250   : > { %v5745_v31 = vadd.f32 %v5744_v18, %v5714_v35 }
 0x252   : > { %v5746_v39 = vadd.f32 %v5745_v31, %v5715_v49 }
 0x254   : > { %v5747_v41 = vadd.f32 %v5746_v39, %v5716_v8 }
 0x256   : > { %v5789_v30 = vpop.trf.xlu0  ;;  %v5748_v33 = vadd.f32 %v5747_v41, %v5717_v2 }
 0x257   : > { %5837 = vst [vmem:[%s8920_s18] sm:$0xff] %v5789_v30  ;;  %v5731_v30 = vmul.f32 %v5699_v34, %v5699_v34 }
 0x258   : > { %v5749_v63 = vadd.f32 %v5748_v33, %v5718_v37 }
 0x25a   : > { %v5750_v61 = vadd.f32 %v5749_v63, %v5719_v43 }
 0x25c   : > { %v5751_v3 = vadd.f32 %v5750_v61, %v5720_v45 }
 0x25e   : > { %v5752_v4 = vadd.f32 %v5751_v3, %v5721_v21 }
 0x260   : > { %v5753_v19 = vadd.f32 %v5752_v4, %v5722_v42 }
 0x262   : > { %v5754_v40 = vadd.f32 %v5753_v19, %v5723_v62 }
 0x264   : > { %v5755_v52 = vadd.f32 %v5754_v40, %v5724_v58 }
 0x266   : > { %v5756_v32 = vadd.f32 %v5755_v52, %v5725_v12 }
 0x268   : > { %v5757_v22 = vadd.f32 %v5756_v32, %v5726_v27 }
 0x26a   : > { %v5758_v29 = vadd.f32 %v5757_v22, %v5727_v5 }
 0x26c   : > { %v5759_v10 = vadd.f32 %v5758_v29, %v5728_v59 }
 0x26e   : > { %v5760_v46 = vadd.f32 %v5759_v10, %v5729_v57 }
 0x270   : > { %v5761_v0 = vadd.f32 %v5760_v46, %v5730_v7 }
 0x272   : > { %v5762_v36 = vadd.f32 %v5761_v0, %v5731_v30 }
 0x274   : > { %v5763_v60 = vadd.f32 %v5762_v36, %v5732_v16 }
 0x276   : > { %v5821_v54 = vpop.trf.xlu1  ;;  %v5764_v48 = vrot.slane %v5763_v60, 4 }
 0x277   : > { %5838 = vst [vmem:[%s8920_s18 + $0x8] sm:$0xff] %v5821_v54 }
 0x278   : > { %v5765_v47 = vadd.f32 %v5764_v48, %v5763_v60 }
 0x27a   : > { %v5766_v13 = vrot.slane %v5765_v47, 2 }
 0x27c   : > { %v5767_v14 = vadd.f32 %v5766_v13, %v5765_v47 }
 0x27e   : > { %v5768_v35 = vrot.slane %v5767_v14, 1 }
 0x280   : > { %v5769_v28 = vadd.f32 %v5768_v35, %v5767_v14 }
 0x282   : > { %v5771_v44 = vsel %vm5770_vm8, %v8886_v11, %v5769_v28 }
 0x283   : > { %5772 = vst [vmem:[%s212_s22] sm:$0x3] %v5771_v44 }
 0x284 PF: > { %s14_s14 = sadd.s32 1, %s7149_s14   ;;  %s9024_s12 = smov %s7145_s13 }
 0x285   : > { %p11_p5 = scmp.ge.s32.totalorder %s14_s14, 4   ;;  %s9025_s13 = smov %s9027_s15 }
 0x287   :  { %13 = sbr.rel (!%p11_p5) target bundleno = 2 (0x2), region = 81 }

</bundles_post_ra>
